<compile_context>
chip_gen: v7x
topology: tpu7x:2x2x1
jax: 0.10.0
libtpu: 0.0.40
codegen_flags: <defaults>
</compile_context>

<pallas_src>
import functools

import jax
import jax.numpy as jnp
from jax.experimental import pallas as pl
from jax.experimental.pallas import tpu as pltpu


# ---------------------------------------------------------------------------
# Compiler / tiling helpers
# ---------------------------------------------------------------------------
def _vmem_limit_bytes():
    """~3/4 of physical VMEM, capped at 100 MiB; 48 MiB fallback (safe on v7x)."""
    try:
        cap = int(pltpu.get_tpu_info().vmem_capacity_bytes)
    except Exception:
        cap = 64 * 1024 * 1024
    return max(32 * 1024 * 1024, min((cap * 3) // 4, 100 * 1024 * 1024))


def _cparams(sems):
    return pltpu.CompilerParams(dimension_semantics=sems,
                                vmem_limit_bytes=_vmem_limit_bytes())


def _choose_th(H, W, s, target_rows=1024):
    """Largest TH with H % TH == 0, TH % s == 0 and TH * W ~<= target_rows."""
    target = max(s, min(H, max(s, target_rows // max(1, W))))
    for th in range(min(H, target), 0, -1):
        if H % th == 0 and th % s == 0:
            return th
    return H


# ---------------------------------------------------------------------------
# Pallas kernels
# ---------------------------------------------------------------------------
def _conv12_pool_kernel(x_ref, w1_ref, sh1_ref, w2_ref, sh2_ref, o_ref, h1_sc,
                        *, H, W, TH, s):
    """Fused conv1(1x1)+bn1+relu  +  conv2(3x3,pad=1)+bn2+relu  +  AvgPool(s).

    Grid: (N, H // TH).  x_ref: (1, H, W, cin) bf16, resident per image (index
    map keyed on n only).  h1_sc: (H+2, W+2, planes) bf16 zero-padded conv1
    output, filled once per image at the first H-block (the H axis is
    "arbitrary", so it is never split across TensorCores).
    o_ref: (1, TH//s, W//s, planes) bf16.
    """
    hb = pl.program_id(1)
    cin = x_ref.shape[-1]
    planes = o_ref.shape[-1]

    @pl.when(hb == 0)
    def _():
        # conv1 + bn1 (scale folded into w1) + relu over the whole image,
        # written into the interior of the zero-padded scratch (1-px halo).
        h1_sc[...] = jnp.zeros(h1_sc.shape, h1_sc.dtype)
        h1 = jnp.dot(x_ref[0].reshape(H * W, cin), w1_ref[...],
                     preferred_element_type=jnp.float32)
        h1 = jnp.maximum(h1 + sh1_ref[...], 0.0)
        h1_sc[pl.ds(1, H), pl.ds(1, W), :] = (
            h1.reshape(H, W, planes).astype(h1_sc.dtype))

    # conv2 as ONE K-stacked (im2col) matmul: K = 9 * planes.
    row0 = pl.multiple_of(hb * TH, TH)
    taps = []
    for dy in range(3):
        for dx in range(3):
            taps.append(h1_sc[pl.ds(row0 + dy, TH), pl.ds(dx, W), :])
    lhs = jnp.concatenate(taps, axis=-1).reshape(TH * W, 9 * planes)
    y = jnp.dot(lhs, w2_ref[...], preferred_element_type=jnp.float32)
    y = jnp.maximum(y + sh2_ref[...], 0.0)                 # (TH*W, planes) f32

    if s == 1:
        o_ref[0] = y.reshape(TH, W, planes).astype(o_ref.dtype)
    else:
        tho, wo = TH // s, W // s
        y5 = y.reshape(tho, s, wo, s, planes)
        pooled = y5[:, 0, :, 0, :]
        for py in range(s):
            for px in range(s):
                if py == 0 and px == 0:
                    continue
                pooled = pooled + y5[:, py, :, px, :]
        o_ref[0] = (pooled * (1.0 / (s * s))).astype(o_ref.dtype)


def _conv3_ds_add_relu_kernel(y2_ref, w3_ref, sh3_ref, xi_ref, wd_ref, shd_ref,
                              o_ref, *, s):
    """conv3(1x1)+bn3  +  fused downsample(AvgPool(s)+1x1 conv+bn)  + add + relu.

    y2_ref: (1, THo, Wo, cmid) bf16.  xi_ref: (1, THo, s, Wo, s, cin) bf16
    (identity, W/H pre-split in the wrapper so pooling uses static slices).
    o_ref: (1, THo, Wo, cout) bf16.
    """
    _, THo, Wo, cmid = y2_ref.shape
    cin = xi_ref.shape[-1]
    cout = o_ref.shape[-1]

    y = jnp.dot(y2_ref[0].reshape(THo * Wo, cmid), w3_ref[...],
                preferred_element_type=jnp.float32) + sh3_ref[...]

    xi = xi_ref[0]                                   # (THo, s, Wo, s, cin) bf16
    pooled = xi[:, 0, :, 0, :].astype(jnp.float32)
    for py in range(s):
        for px in range(s):
            if py == 0 and px == 0:
                continue
            pooled = pooled + xi[:, py, :, px, :].astype(jnp.float32)
    pooled = (pooled * (1.0 / (s * s))).astype(jnp.bfloat16)
    idn = jnp.dot(pooled.reshape(THo * Wo, cin), wd_ref[...],
                  preferred_element_type=jnp.float32) + shd_ref[...]

    out = jnp.maximum(y + idn, 0.0)
    o_ref[0] = out.reshape(THo, Wo, cout).astype(o_ref.dtype)


def _conv3_add_relu_kernel(y2_ref, w3_ref, sh3_ref, xi_ref, o_ref):
    """conv3(1x1)+bn3 + identity residual + relu (no downsample branch)."""
    _, THo, Wo, cmid = y2_ref.shape
    cout = o_ref.shape[-1]
    y = jnp.dot(y2_ref[0].reshape(THo * Wo, cmid), w3_ref[...],
                preferred_element_type=jnp.float32) + sh3_ref[...]
    idn = xi_ref[0].reshape(THo * Wo, cout).astype(jnp.float32)
    out = jnp.maximum(y + idn, 0.0)
    o_ref[0] = out.reshape(THo, Wo, cout).astype(o_ref.dtype)


# ---------------------------------------------------------------------------
# pallas_call wrappers
# ---------------------------------------------------------------------------
def conv12_pool(x_nhwc, w1f, sh1, w2f, sh2, stride):
    """x_nhwc: (N,H,W,cin) bf16 -> (N, H//s, W//s, planes) bf16."""
    N, H, W, cin = x_nhwc.shape
    planes = w1f.shape[1]
    s = stride
    TH = _choose_th(H, W, s)
    Ho, Wo = H // s, W // s
    return pl.pallas_call(
        functools.partial(_conv12_pool_kernel, H=H, W=W, TH=TH, s=s),
        out_shape=jax.ShapeDtypeStruct((N, Ho, Wo, planes), jnp.bfloat16),
        grid=(N, H // TH),
        in_specs=[
            pl.BlockSpec((1, H, W, cin), lambda n, h: (n, 0, 0, 0)),
            pl.BlockSpec((cin, planes), lambda n, h: (0, 0)),
            pl.BlockSpec((1, planes), lambda n, h: (0, 0)),
            pl.BlockSpec((9 * planes, planes), lambda n, h: (0, 0)),
            pl.BlockSpec((1, planes), lambda n, h: (0, 0)),
        ],
        out_specs=pl.BlockSpec((1, TH // s, Wo, planes),
                               lambda n, h: (n, h, 0, 0)),
        scratch_shapes=[pltpu.VMEM((H + 2, W + 2, planes), jnp.bfloat16)],
        # H axis must stay "arbitrary": the conv1 scratch is filled at hb == 0.
        compiler_params=_cparams(("parallel", "arbitrary")),
    )(x_nhwc, w1f, sh1, w2f, sh2)


def conv3_residual(y2, w3f, sh3, x_nhwc, *, stride, wdf=None, shd=None):
    """conv3 + bn3 + residual (+ fused downsample) + relu. Returns bf16."""
    N, Ho, Wo, cmid = y2.shape
    cout = w3f.shape[1]
    s = stride
    THo = _choose_th(Ho, Wo, 1)
    grid = (N, Ho // THo)

    if wdf is not None:
        cin = x_nhwc.shape[-1]
        x6 = x_nhwc.reshape(N, Ho, s, Wo, s, cin)       # free split of H and W
        return pl.pallas_call(
            functools.partial(_conv3_ds_add_relu_kernel, s=s),
            out_shape=jax.ShapeDtypeStruct((N, Ho, Wo, cout), jnp.bfloat16),
            grid=grid,
            in_specs=[
                pl.BlockSpec((1, THo, Wo, cmid), lambda n, h: (n, h, 0, 0)),
                pl.BlockSpec((cmid, cout), lambda n, h: (0, 0)),
                pl.BlockSpec((1, cout), lambda n, h: (0, 0)),
                pl.BlockSpec((1, THo, s, Wo, s, cin),
                             lambda n, h: (n, h, 0, 0, 0, 0)),
                pl.BlockSpec((cin, cout), lambda n, h: (0, 0)),
                pl.BlockSpec((1, cout), lambda n, h: (0, 0)),
            ],
            out_specs=pl.BlockSpec((1, THo, Wo, cout), lambda n, h: (n, h, 0, 0)),
            compiler_params=_cparams(("parallel", "parallel")),
        )(y2, w3f, sh3, x6, wdf, shd)

    return pl.pallas_call(
        _conv3_add_relu_kernel,
        out_shape=jax.ShapeDtypeStruct((N, Ho, Wo, cout), jnp.bfloat16),
        grid=grid,
        in_specs=[
            pl.BlockSpec((1, THo, Wo, cmid), lambda n, h: (n, h, 0, 0)),
            pl.BlockSpec((cmid, cout), lambda n, h: (0, 0)),
            pl.BlockSpec((1, cout), lambda n, h: (0, 0)),
            pl.BlockSpec((1, THo, Wo, cout), lambda n, h: (n, h, 0, 0)),
        ],
        out_specs=pl.BlockSpec((1, THo, Wo, cout), lambda n, h: (n, h, 0, 0)),
        compiler_params=_cparams(("parallel", "parallel")),
    )(y2, w3f, sh3, x_nhwc)


# ---------------------------------------------------------------------------
# Parameters (deterministic synthetic init), BN folded to scale/shift
# ---------------------------------------------------------------------------
def _fold_bn(gamma, beta, mean, var, eps=1e-5):
    scale = gamma / jnp.sqrt(var + eps)
    return scale, beta - mean * scale


def _init_bn(key, c):
    k1, k2, k3, k4 = jax.random.split(key, 4)
    gamma = 1.0 + 0.1 * jax.random.normal(k1, (c,), jnp.float32)
    beta = 0.1 * jax.random.normal(k2, (c,), jnp.float32)
    mean = 0.1 * jax.random.normal(k3, (c,), jnp.float32)
    var = 0.5 + jnp.abs(jax.random.normal(k4, (c,), jnp.float32))
    return _fold_bn(gamma, beta, mean, var)


def init_params(key, inplanes, planes, stride):
    exp = 4
    ks = jax.random.split(key, 8)
    p = {}
    p["w1"] = 0.2 * jax.random.normal(ks[0], (inplanes, planes), jnp.float32)
    p["bn1_scale"], p["bn1_shift"] = _init_bn(ks[1], planes)
    p["w2"] = 0.2 * jax.random.normal(ks[2], (3, 3, planes, planes), jnp.float32)
    p["bn2_scale"], p["bn2_shift"] = _init_bn(ks[3], planes)
    p["w3"] = 0.2 * jax.random.normal(ks[4], (planes, planes * exp), jnp.float32)
    p["bn3_scale"], p["bn3_shift"] = _init_bn(ks[5], planes * exp)
    if stride > 1 or inplanes != planes * exp:
        p["wd"] = 0.2 * jax.random.normal(ks[6], (inplanes, planes * exp),
                                          jnp.float32)
        p["bnd_scale"], p["bnd_shift"] = _init_bn(ks[7], planes * exp)
    return p


# ---------------------------------------------------------------------------
# Bottleneck forward (Pallas) and pure-JAX reference
# ---------------------------------------------------------------------------
def bottleneck_forward(x_nchw, params, stride):
    # TODO(synk): BatchNorm is reproduced in eval mode (running stats folded
    # into scale/shift); training-mode batch statistics are not implemented.
    N, cin, H, W = x_nchw.shape
    s = stride
    assert H % s == 0 and W % s == 0, "spatial dims must be divisible by stride"
    planes = params["w1"].shape[1]
    cout = params["w3"].shape[1]

    x = jnp.transpose(x_nchw, (0, 2, 3, 1)).astype(jnp.bfloat16)  # NHWC bf16

    # Fold BN scales into the conv weights (trace-time); keep only the shifts.
    w1f = (params["w1"] * params["bn1_scale"][None, :]).astype(jnp.bfloat16)
    sh1 = params["bn1_shift"].reshape(1, planes).astype(jnp.float32)
    w2f = (params["w2"] * params["bn2_scale"][None, None, None, :]).reshape(
        9 * planes, planes).astype(jnp.bfloat16)
    sh2 = params["bn2_shift"].reshape(1, planes).astype(jnp.float32)
    w3f = (params["w3"] * params["bn3_scale"][None, :]).astype(jnp.bfloat16)
    sh3 = params["bn3_shift"].reshape(1, cout).astype(jnp.float32)

    # conv1 + bn1 + relu1 + conv2 + bn2 + relu2 + avgpool, fully fused.
    y2 = conv12_pool(x, w1f, sh1, w2f, sh2, s)          # (N, Ho, Wo, planes)

    # conv3 + bn3 + residual (+ fused downsample avgpool/conv/bn) + relu3.
    if s > 1 or cin != cout:
        wdf = (params["wd"] * params["bnd_scale"][None, :]).astype(jnp.bfloat16)
        shd = params["bnd_shift"].reshape(1, cout).astype(jnp.float32)
        y = conv3_residual(y2, w3f, sh3, x, stride=s, wdf=wdf, shd=shd)
    else:
        y = conv3_residual(y2, w3f, sh3, x, stride=1)
    return jnp.transpose(y, (0, 3, 1, 2))               # NHWC -> NCHW (bf16)


def bottleneck_reference(x_nchw, params, stride):
    """Plain-JAX f32 reference (same math, different code path)."""
    x = jnp.transpose(x_nchw, (0, 2, 3, 1)).astype(jnp.float32)
    N, H, W, cin = x.shape
    planes = params["w1"].shape[1]
    cout = params["w3"].shape[1]

    def bn(y, sc, b):
        return y * sc + b

    def pool(y, s):
        if s == 1:
            return y
        n, h, w, c = y.shape
        return y.reshape(n, h // s, s, w // s, s, c).mean(axis=(2, 4))

    out = jnp.maximum(bn(jnp.einsum("nhwc,cd->nhwd", x, params["w1"]),
                         params["bn1_scale"], params["bn1_shift"]), 0.0)
    xp = jnp.pad(out, ((0, 0), (1, 1), (1, 1), (0, 0)))
    acc = jnp.zeros((N, H, W, planes), jnp.float32)
    for dy in range(3):
        for dx in range(3):
            acc = acc + jnp.einsum("nhwc,cd->nhwd",
                                   xp[:, dy:dy + H, dx:dx + W, :],
                                   params["w2"][dy, dx])
    out = jnp.maximum(bn(acc, params["bn2_scale"], params["bn2_shift"]), 0.0)
    out = pool(out, stride)
    out = bn(jnp.einsum("nhwc,cd->nhwd", out, params["w3"]),
             params["bn3_scale"], params["bn3_shift"])
    if stride > 1 or cin != cout:
        idn = pool(x, stride)
        idn = bn(jnp.einsum("nhwc,cd->nhwd", idn, params["wd"]),
                 params["bnd_scale"], params["bnd_shift"])
    else:
        idn = x
    out = jnp.maximum(out + idn, 0.0)
    return jnp.transpose(out, (0, 3, 1, 2))


def _check(out, ref, name):
    err = float(jnp.max(jnp.abs(out.astype(jnp.float32) - ref)))
    scale = float(jnp.max(jnp.abs(ref))) + 1e-6
    assert err < 5e-2 or err / scale < 2e-2, (
        f"{name}: max abs error {err} too large (ref scale {scale})")


# ---------------------------------------------------------------------------
if __name__ == "__main__":
    key = jax.random.PRNGKey(0)
    kx, kp, kx2, kp2 = jax.random.split(key, 4)

    # Case 1: stride=2 bottleneck with downsample (AvgPool + 1x1 conv + BN).
    # NOTE: toy channel widths (<128) force masked stores / low MXU lane use;
    # real ResNet stages (C >= 256) hit the lane-dense, MXU-filling paths.
    N, inplanes, H, W = 2, 8, 16, 16
    planes, stride = 4, 2
    x = jax.random.normal(kx, (N, inplanes, H, W), jnp.float32)
    params = init_params(kp, inplanes, planes, stride)
    out = jax.block_until_ready(bottleneck_forward(x, params, stride))
    assert out.shape == (N, planes * 4, H // stride, W // stride), out.shape
    _check(out, bottleneck_reference(x, params, stride), "stride-2")

    # Case 2: stride=1, inplanes == planes*4 -> identity residual path.
    N2, inplanes2, H2, W2 = 1, 16, 8, 8
    planes2, stride2 = 4, 1
    x2 = jax.random.normal(kx2, (N2, inplanes2, H2, W2), jnp.float32)
    params2 = init_params(kp2, inplanes2, planes2, stride2)
    out2 = jax.block_until_ready(bottleneck_forward(x2, params2, stride2))
    assert out2.shape == (N2, planes2 * 4, H2, W2), out2.shape
    _check(out2, bottleneck_reference(x2, params2, stride2), "stride-1")

    print("KERNEL_OK")
</pallas_src>

<mosaic_0001>
module attributes {stable_mosaic.version = 11 : i64} {
  func.func @_conv12_pool_kernel(%arg0: i32, %arg1: i32, %arg2: memref<1x16x16x8xbf16, #tpu.memory_space<vmem>>, %arg3: memref<8x4xbf16, #tpu.memory_space<vmem>>, %arg4: memref<1x4xf32, #tpu.memory_space<vmem>>, %arg5: memref<36x4xbf16, #tpu.memory_space<vmem>>, %arg6: memref<1x4xf32, #tpu.memory_space<vmem>>, %arg7: memref<1x8x8x4xbf16, #tpu.memory_space<vmem>>, %arg8: memref<18x18x4xbf16, #tpu.memory_space<vmem>>) attributes {dimension_semantics = [#tpu.dimension_semantics<parallel>, #tpu.dimension_semantics<arbitrary>], iteration_bounds = array<i64: 2, 1>, scalar_prefetch = 0 : i64, scratch_operands = 1 : i64, tpu.core_type = #tpu.core_type<tc>, window_params = [{transform_indices = @transform_0, window_bounds = array<i64: 1, 16, 16, 8>}, {pipeline_mode = #tpu.pipeline_mode<synchronous>, transform_indices = @transform_1, window_bounds = array<i64: 8, 4>}, {pipeline_mode = #tpu.pipeline_mode<synchronous>, transform_indices = @transform_2, window_bounds = array<i64: 1, 4>}, {pipeline_mode = #tpu.pipeline_mode<synchronous>, transform_indices = @transform_3, window_bounds = array<i64: 36, 4>}, {pipeline_mode = #tpu.pipeline_mode<synchronous>, transform_indices = @transform_4, window_bounds = array<i64: 1, 4>}, {transform_indices = @transform_5, window_bounds = array<i64: 1, 8, 8, 4>}]} {
    %c0_i32 = arith.constant 0 : i32
    %0 = arith.cmpi eq, %arg1, %c0_i32 : i32
    %1 = arith.extui %0 : i1 to i32
    %c0_i32_0 = arith.constant 0 : i32
    %2 = arith.cmpi ne, %1, %c0_i32_0 : i32
    scf.if %2 {
      %cst_33 = arith.constant 0.000000e+00 : bf16
      %59 = vector.broadcast %cst_33 : bf16 to vector<18x18x4xbf16>
      %c0_34 = arith.constant 0 : index
      %c0_35 = arith.constant 0 : index
      %c0_36 = arith.constant 0 : index
      %60 = vector.load %arg8[%c0_34, %c0_35, %c0_36] : memref<18x18x4xbf16, #tpu.memory_space<vmem>>, vector<18x18x4xbf16>
      tpu.vector_store %arg8[%c0_34, %c0_35, %c0_36], %59 {strides = array<i32>} : memref<18x18x4xbf16, #tpu.memory_space<vmem>>, vector<18x18x4xbf16>,
      %c0_37 = arith.constant 0 : index
      %c0_38 = arith.constant 0 : index
      %c0_39 = arith.constant 0 : index
      %c0_40 = arith.constant 0 : index
      %61 = vector.load %arg2[%c0_37, %c0_38, %c0_39, %c0_40] : memref<1x16x16x8xbf16, #tpu.memory_space<vmem>>, vector<1x16x16x8xbf16>
      %62 = vector.shape_cast %61 : vector<1x16x16x8xbf16> to vector<16x16x8xbf16>
      %63 = vector.shape_cast %62 : vector<16x16x8xbf16> to vector<256x8xbf16>
      %c0_41 = arith.constant 0 : index
      %c0_42 = arith.constant 0 : index
      %64 = vector.load %arg3[%c0_41, %c0_42] : memref<8x4xbf16, #tpu.memory_space<vmem>>, vector<8x4xbf16>
      %cst_43 = arith.constant dense<0.000000e+00> : vector<256x4xf32>
      %65 = tpu.matmul %63, %64, %cst_43 {dimension_numbers = #tpu.dot_dimension_numbers<[1], [0], [0], [1], [0, 0, 1, 1], [], []>} : vector<256x8xbf16>, vector<8x4xbf16>, vector<256x4xf32> -> vector<256x4xf32>
      %c0_44 = arith.constant 0 : index
      %c0_45 = arith.constant 0 : index
      %66 = vector.load %arg4[%c0_44, %c0_45] : memref<1x4xf32, #tpu.memory_space<vmem>>, vector<1x4xf32>
      %67 = vector.broadcast %66 : vector<1x4xf32> to vector<256x4xf32>
      %68 = arith.addf %65, %67 : vector<256x4xf32>
      %cst_46 = arith.constant 0.000000e+00 : f32
      %69 = vector.broadcast %cst_46 : f32 to vector<256x4xf32>
      %70 = arith.maximumf %68, %69 : vector<256x4xf32>
      %71 = vector.shape_cast %70 : vector<256x4xf32> to vector<16x16x4xf32>
      %72 = arith.truncf %71 : vector<16x16x4xf32> to vector<16x16x4xbf16>
      %c1_47 = arith.constant 1 : index
      %c1_48 = arith.constant 1 : index
      %c0_49 = arith.constant 0 : index
      %73 = vector.load %arg8[%c1_47, %c1_48, %c0_49] : memref<18x18x4xbf16, #tpu.memory_space<vmem>>, vector<16x16x4xbf16>
      tpu.vector_store %arg8[%c1_47, %c1_48, %c0_49], %72 {strides = array<i32>} : memref<18x18x4xbf16, #tpu.memory_space<vmem>>, vector<16x16x4xbf16>,
    } else {
    }
    %c16_i32 = arith.constant 16 : i32
    %3 = arith.muli %arg1, %c16_i32 : i32
    %4 = tpu.assume_multiple %3, 16 : i32
    %c0_i32_1 = arith.constant 0 : i32
    %5 = arith.addi %4, %c0_i32_1 : i32
    %6 = arith.index_cast %5 : i32 to index
    %c0 = arith.constant 0 : index
    %c0_2 = arith.constant 0 : index
    %7 = vector.load %arg8[%6, %c0, %c0_2] : memref<18x18x4xbf16, #tpu.memory_space<vmem>>, vector<16x16x4xbf16>
    %c0_i32_3 = arith.constant 0 : i32
    %8 = arith.addi %4, %c0_i32_3 : i32
    %9 = arith.index_cast %8 : i32 to index
    %c1 = arith.constant 1 : index
    %c0_4 = arith.constant 0 : index
    %10 = vector.load %arg8[%9, %c1, %c0_4] : memref<18x18x4xbf16, #tpu.memory_space<vmem>>, vector<16x16x4xbf16>
    %c0_i32_5 = arith.constant 0 : i32
    %11 = arith.addi %4, %c0_i32_5 : i32
    %12 = arith.index_cast %11 : i32 to index
    %c2 = arith.constant 2 : index
    %c0_6 = arith.constant 0 : index
    %13 = vector.load %arg8[%12, %c2, %c0_6] : memref<18x18x4xbf16, #tpu.memory_space<vmem>>, vector<16x16x4xbf16>
    %c1_i32 = arith.constant 1 : i32
    %14 = arith.addi %4, %c1_i32 : i32
    %15 = arith.index_cast %14 : i32 to index
    %c0_7 = arith.constant 0 : index
    %c0_8 = arith.constant 0 : index
    %16 = vector.load %arg8[%15, %c0_7, %c0_8] : memref<18x18x4xbf16, #tpu.memory_space<vmem>>, vector<16x16x4xbf16>
    %c1_i32_9 = arith.constant 1 : i32
    %17 = arith.addi %4, %c1_i32_9 : i32
    %18 = arith.index_cast %17 : i32 to index
    %c1_10 = arith.constant 1 : index
    %c0_11 = arith.constant 0 : index
    %19 = vector.load %arg8[%18, %c1_10, %c0_11] : memref<18x18x4xbf16, #tpu.memory_space<vmem>>, vector<16x16x4xbf16>
    %c1_i32_12 = arith.constant 1 : i32
    %20 = arith.addi %4, %c1_i32_12 : i32
    %21 = arith.index_cast %20 : i32 to index
    %c2_13 = arith.constant 2 : index
    %c0_14 = arith.constant 0 : index
    %22 = vector.load %arg8[%21, %c2_13, %c0_14] : memref<18x18x4xbf16, #tpu.memory_space<vmem>>, vector<16x16x4xbf16>
    %c2_i32 = arith.constant 2 : i32
    %23 = arith.addi %4, %c2_i32 : i32
    %24 = arith.index_cast %23 : i32 to index
    %c0_15 = arith.constant 0 : index
    %c0_16 = arith.constant 0 : index
    %25 = vector.load %arg8[%24, %c0_15, %c0_16] : memref<18x18x4xbf16, #tpu.memory_space<vmem>>, vector<16x16x4xbf16>
    %c2_i32_17 = arith.constant 2 : i32
    %26 = arith.addi %4, %c2_i32_17 : i32
    %27 = arith.index_cast %26 : i32 to index
    %c1_18 = arith.constant 1 : index
    %c0_19 = arith.constant 0 : index
    %28 = vector.load %arg8[%27, %c1_18, %c0_19] : memref<18x18x4xbf16, #tpu.memory_space<vmem>>, vector<16x16x4xbf16>
    %c2_i32_20 = arith.constant 2 : i32
    %29 = arith.addi %4, %c2_i32_20 : i32
    %30 = arith.index_cast %29 : i32 to index
    %c2_21 = arith.constant 2 : index
    %c0_22 = arith.constant 0 : index
    %31 = vector.load %arg8[%30, %c2_21, %c0_22] : memref<18x18x4xbf16, #tpu.memory_space<vmem>>, vector<16x16x4xbf16>
    %32 = tpu.concatenate %7, %10, %13, %16, %19, %22, %25, %28, %31 in 2 : vector<16x16x4xbf16>, vector<16x16x4xbf16>, vector<16x16x4xbf16>, vector<16x16x4xbf16>, vector<16x16x4xbf16>, vector<16x16x4xbf16>, vector<16x16x4xbf16>, vector<16x16x4xbf16>, vector<16x16x4xbf16> -> vector<16x16x36xbf16>
    %33 = vector.shape_cast %32 : vector<16x16x36xbf16> to vector<256x36xbf16>
    %c0_23 = arith.constant 0 : index
    %c0_24 = arith.constant 0 : index
    %34 = vector.load %arg5[%c0_23, %c0_24] : memref<36x4xbf16, #tpu.memory_space<vmem>>, vector<36x4xbf16>
    %cst = arith.constant dense<0.000000e+00> : vector<256x4xf32>
    %35 = tpu.matmul %33, %34, %cst {dimension_numbers = #tpu.dot_dimension_numbers<[1], [0], [0], [1], [0, 0, 1, 1], [], []>} : vector<256x36xbf16>, vector<36x4xbf16>, vector<256x4xf32> -> vector<256x4xf32>
    %c0_25 = arith.constant 0 : index
    %c0_26 = arith.constant 0 : index
    %36 = vector.load %arg6[%c0_25, %c0_26] : memref<1x4xf32, #tpu.memory_space<vmem>>, vector<1x4xf32>
    %37 = vector.broadcast %36 : vector<1x4xf32> to vector<256x4xf32>
    %38 = arith.addf %35, %37 : vector<256x4xf32>
    %cst_27 = arith.constant 0.000000e+00 : f32
    %39 = vector.broadcast %cst_27 : f32 to vector<256x4xf32>
    %40 = arith.maximumf %38, %39 : vector<256x4xf32>
    %41 = vector.shape_cast %40 : vector<256x4xf32> to vector<8x2x8x2x4xf32>
    %42 = vector.extract_strided_slice %41 {offsets = [0, 0, 0, 0, 0], sizes = [8, 1, 8, 1, 4], strides = [1, 1, 1, 1, 1]} : vector<8x2x8x2x4xf32> to vector<8x1x8x1x4xf32>
    %43 = vector.shape_cast %42 : vector<8x1x8x1x4xf32> to vector<8x8x4xf32>
    %44 = vector.extract_strided_slice %41 {offsets = [0, 0, 0, 1, 0], sizes = [8, 1, 8, 1, 4], strides = [1, 1, 1, 1, 1]} : vector<8x2x8x2x4xf32> to vector<8x1x8x1x4xf32>
    %45 = vector.shape_cast %44 : vector<8x1x8x1x4xf32> to vector<8x8x4xf32>
    %46 = arith.addf %43, %45 : vector<8x8x4xf32>
    %47 = vector.extract_strided_slice %41 {offsets = [0, 1, 0, 0, 0], sizes = [8, 1, 8, 1, 4], strides = [1, 1, 1, 1, 1]} : vector<8x2x8x2x4xf32> to vector<8x1x8x1x4xf32>
    %48 = vector.shape_cast %47 : vector<8x1x8x1x4xf32> to vector<8x8x4xf32>
    %49 = arith.addf %46, %48 : vector<8x8x4xf32>
    %50 = vector.extract_strided_slice %41 {offsets = [0, 1, 0, 1, 0], sizes = [8, 1, 8, 1, 4], strides = [1, 1, 1, 1, 1]} : vector<8x2x8x2x4xf32> to vector<8x1x8x1x4xf32>
    %51 = vector.shape_cast %50 : vector<8x1x8x1x4xf32> to vector<8x8x4xf32>
    %52 = arith.addf %49, %51 : vector<8x8x4xf32>
    %cst_28 = arith.constant 2.500000e-01 : f32
    %53 = vector.broadcast %cst_28 : f32 to vector<8x8x4xf32>
    %54 = arith.mulf %52, %53 : vector<8x8x4xf32>
    %55 = arith.truncf %54 : vector<8x8x4xf32> to vector<8x8x4xbf16>
    %c0_29 = arith.constant 0 : index
    %c0_30 = arith.constant 0 : index
    %c0_31 = arith.constant 0 : index
    %c0_32 = arith.constant 0 : index
    %56 = vector.load %arg7[%c0_29, %c0_30, %c0_31, %c0_32] : memref<1x8x8x4xbf16, #tpu.memory_space<vmem>>, vector<1x8x8x4xbf16>
    %57 = vector.shape_cast %56 : vector<1x8x8x4xbf16> to vector<8x8x4xbf16>
    %58 = vector.shape_cast %55 : vector<8x8x4xbf16> to vector<1x8x8x4xbf16>
    tpu.vector_store %arg7[%c0_29, %c0_30, %c0_31, %c0_32], %58 {strides = array<i32>} : memref<1x8x8x4xbf16, #tpu.memory_space<vmem>>, vector<1x8x8x4xbf16>,
    return
  }
  func.func @transform_0(%arg0: i32, %arg1: i32) -> (i32, i32, i32, i32) {
    %c0_i32 = arith.constant 0 : i32
    %c0_i32_0 = arith.constant 0 : i32
    %c0_i32_1 = arith.constant 0 : i32
    %c0_i32_2 = arith.constant 0 : i32
    return %arg0, %c0_i32, %c0_i32_0, %c0_i32_1 : i32, i32, i32, i32
  }
  func.func @transform_1(%arg0: i32, %arg1: i32) -> (i32, i32) {
    %c0_i32 = arith.constant 0 : i32
    %c0_i32_0 = arith.constant 0 : i32
    %c0_i32_1 = arith.constant 0 : i32
    return %c0_i32, %c0_i32_0 : i32, i32
  }
  func.func @transform_2(%arg0: i32, %arg1: i32) -> (i32, i32) {
    %c0_i32 = arith.constant 0 : i32
    %c0_i32_0 = arith.constant 0 : i32
    %c0_i32_1 = arith.constant 0 : i32
    return %c0_i32, %c0_i32_0 : i32, i32
  }
  func.func @transform_3(%arg0: i32, %arg1: i32) -> (i32, i32) {
    %c0_i32 = arith.constant 0 : i32
    %c0_i32_0 = arith.constant 0 : i32
    %c0_i32_1 = arith.constant 0 : i32
    return %c0_i32, %c0_i32_0 : i32, i32
  }
  func.func @transform_4(%arg0: i32, %arg1: i32) -> (i32, i32) {
    %c0_i32 = arith.constant 0 : i32
    %c0_i32_0 = arith.constant 0 : i32
    %c0_i32_1 = arith.constant 0 : i32
    return %c0_i32, %c0_i32_0 : i32, i32
  }
  func.func @transform_5(%arg0: i32, %arg1: i32) -> (i32, i32, i32, i32) {
    %c0_i32 = arith.constant 0 : i32
    %c0_i32_0 = arith.constant 0 : i32
    %c0_i32_1 = arith.constant 0 : i32
    return %arg0, %arg1, %c0_i32, %c0_i32_0 : i32, i32, i32, i32
  }
}

</mosaic_0001>

<bundles_post_ra>
// kernel: tpu_custom_call.1
= control target key start
LH: loop header
LB: loop body
LE: loop exit
PB: predicated region body
PF: predicated region fallthrough
CT: control target
= control target key end

     0   :  { %s6375_s18 = smov 0   ;;  %s6377_s19 = smov 0   ;;  %s8095_s0 = inlined_call_operand.vmem [shape: bf16[2,16,16,8], index: 0, kind: input, shape index: {}]   ;;  %s8096_s1 = inlined_call_operand.vmem [shape: bf16[8,4], index: 1, kind: input, shape index: {}]   ;;  %s8097_s2 = inlined_call_operand.vmem [shape: f32[1,4], index: 2, kind: input, shape index: {}]   ;;  %s8098_s3 = inlined_call_operand.vmem [shape: bf16[36,4], index: 3, kind: input, shape index: {}]   ;;  %s8099_s4 = inlined_call_operand.vmem [shape: f32[1,4], index: 4, kind: input, shape index: {}]   ;;  %s8100_s5 = inlined_call_operand.vmem [shape: bf16[2,8,8,4], index: 5, kind: output, shape index: {}]  }
   0x1   :  { %s6379_s20 = smov 0  }
   0x2 LB: > { %s27_s21 = sadd.s32 1, %s6329_s19  ;;  %p5346_p0 = scmp.ge.s32.totalorder %s6333_s20, 1  ;;  %s6333_s20 = sphi %s6379_s20, %s15_s20   ;;  %s6329_s19 = sphi %s6377_s19, %s8144_s19   ;;  %s6325_s18 = sphi %s6375_s18, %s8143_s18  }
   0x3   : > { %p29_p1 = scmp.ge.s32.totalorder %s27_s21, 2  ;;  %p201_p2 = scmp.lt.s32.totalorder %s6333_s20, 3 }
   0x5   : > { %s8146_s21 = smov (%p29_p1, %s27_s21), 0  ;;  %p202_p3 = pnand %p5346_p0, %p201_p2 }
   0x7   : > { %205 = sbr.rel (%p202_p3) target bundleno = 888 (0x378), region = 40 }
   0xe   : > { %v341_v0 = vld [vmem:[%s8096_s1] sm:$0xf]  ;;  %vm478_vm0 = vcmask 1043456   ;;  %p233_p4 = scmp.lt.s32.totalorder %s6325_s18, 1  ;;  %vm253_vm1 = vcmask 27648   ;;  %v6335_v2 = vmov 0  }
   0xf   : > { %6108 = vmatprep.subr.msk.bf16.mxu0 %vm478_vm0, %v341_v0  ;;  %v480_v1 = vsel %vm478_vm0, %v341_v0, 0  ;;  %261 = vst.msk [vmem:[#allocation2 + $0x18] sm:$0xf] %vm253_vm1, %v6335_v2  ;;  %254 = vst.msk [vmem:[#allocation2] sm:$0xf] %vm253_vm1, %v6335_v2  ;;  %vm429_vm2 = vcmask 64512  }
  0x10   : > { %6037 = vmatpush3.bf16.msra.mxu0 %v480_v1  ;;  %s8148_s18 = smov (!%p233_p4, %s6325_s18), 1  ;;  %255 = vst.msk [vmem:[#allocation2 + $0x4] sm:$0xf] %vm253_vm1, %v6335_v2  ;;  %258 = vst.msk [vmem:[#allocation2 + $0xc] sm:$0xf] %vm253_vm1, %v6335_v2  ;;  %vm256_vm3 = vcmask 24576  }
  0x11   : > { %259 = vst.msk [vmem:[#allocation2 + $0x10] sm:$0xf] %vm253_vm1, %v6335_v2  ;;  %262 = vst.msk [vmem:[#allocation2 + $0x1c] sm:$0xf] %vm253_vm1, %v6335_v2  ;;  %s5902_s24 = sshll.u32 %s8148_s18, 7  ;;  %s6336_s28 = smov 24  }
  0x12   : > { %264 = vst.msk [vmem:[#allocation2 + $0x24] sm:$0xf] %vm253_vm1, %v6335_v2  ;;  %265 = vst.msk [vmem:[#allocation2 + $0x28] sm:$0xf] %vm253_vm1, %v6335_v2  ;;  %s6474_s27 = scalar_lea.vmem %s8095_s0, %s5902_s24  ;;  %vm1817_vm4 = vcmask 1046528   ;;  %s6337_s29 = smov 8  }
  0x13   : > { %267 = vst.msk [vmem:[#allocation2 + $0x30] sm:$0xf] %vm253_vm1, %v6335_v2  ;;  %268 = vst.msk [vmem:[#allocation2 + $0x34] sm:$0xf] %vm253_vm1, %v6335_v2  ;;  %v6144_v3 = vld [vmem:[%s6474_s27] sm:$0xff]   ;;  %v6145_v4 = vld [vmem:[%s6474_s27 + $0x8] sm:$0xff]  }
  0x14   : > { %270 = vst.msk [vmem:[#allocation2 + $0x3c] sm:$0xf] %vm253_vm1, %v6335_v2  ;;  %271 = vst.msk [vmem:[#allocation2 + $0x40] sm:$0xf] %vm253_vm1, %v6335_v2  ;;  %6038 = vmatprep.mubr.msk.bf16.mxu0 %vm429_vm2, %v6144_v3  ;;  %v6146_v5 = vld [vmem:[%s6474_s27 + $0x10] sm:$0xff]   ;;  %v6147_v6 = vld [vmem:[%s6474_s27 + $0x18] sm:$0xff]  }
  0x15   : > { %273 = vst.msk [vmem:[#allocation2 + $0x48] sm:$0xf] %vm253_vm1, %v6335_v2  ;;  %274 = vst.msk [vmem:[#allocation2 + $0x4c] sm:$0xf] %vm253_vm1, %v6335_v2  ;;  %6039 = vmatmul.mubr.msk.bf16.vlgmr.msra.gmra.mrb[0].mxu0 %vm429_vm2, %v6145_v4  ;;  %v6148_v7 = vld [vmem:[%s6474_s27 + $0x20] sm:$0xff]   ;;  %v6149_v8 = vld [vmem:[%s6474_s27 + $0x28] sm:$0xff]  }
  0x16   : > { %276 = vst.msk [vmem:[#allocation2 + $0x54] sm:$0xf] %vm253_vm1, %v6335_v2  ;;  %277 = vst.msk [vmem:[#allocation2 + $0x58] sm:$0xf] %vm253_vm1, %v6335_v2  ;;  %6042 = vmatprep.mubr.msk.bf16.mxu0 %vm429_vm2, %v6146_v5  ;;  %v6150_v9 = vld [vmem:[%s6474_s27 + $0x30] sm:$0xff]   ;;  %v6151_v10 = vld [vmem:[%s6474_s27 + $0x38] sm:$0xff]  }
  0x17   : > { %279 = vst.msk [vmem:[#allocation2 + $0x60] sm:$0xf] %vm253_vm1, %v6335_v2  ;;  %280 = vst.msk [vmem:[#allocation2 + $0x64] sm:$0xf] %vm253_vm1, %v6335_v2  ;;  %v6152_v11 = vld [vmem:[%s6474_s27 + $0x40] sm:$0xff]   ;;  %v6153_v12 = vld [vmem:[%s6474_s27 + $0x48] sm:$0xff]  }
  0x18   : > { %282 = vst.msk [vmem:[#allocation2 + $0x6c] sm:$0xf] %vm253_vm1, %v6335_v2  ;;  %283 = vst.msk [vmem:[#allocation2 + $0x70] sm:$0xf] %vm253_vm1, %v6335_v2  ;;  %v6154_v13 = vld [vmem:[%s6474_s27 + $0x50] sm:$0xff]   ;;  %v6155_v14 = vld [vmem:[%s6474_s27 + $0x58] sm:$0xff]  }
  0x19   : > { %285 = vst.msk [vmem:[#allocation2 + $0x78] sm:$0xf] %vm253_vm1, %v6335_v2  ;;  %286 = vst.msk [vmem:[#allocation2 + $0x7c] sm:$0xf] %vm253_vm1, %v6335_v2  ;;  %v6156_v15 = vld [vmem:[%s6474_s27 + $0x60] sm:$0xff]   ;;  %v6157_v16 = vld [vmem:[%s6474_s27 + $0x68] sm:$0xff]  }
  0x1a   : > { %288 = vst.msk [vmem:[#allocation2 + $0x84] sm:$0xf] %vm253_vm1, %v6335_v2  ;;  %289 = vst.msk [vmem:[#allocation2 + $0x88] sm:$0xf] %vm253_vm1, %v6335_v2  ;;  %v6158_v17 = vld [vmem:[%s6474_s27 + $0x70] sm:$0xff]   ;;  %v6159_v18 = vld [vmem:[%s6474_s27 + $0x78] sm:$0xff]  }
  0x1b   : > { %291 = vst.msk [vmem:[#allocation2 + $0x90] sm:$0xf] %vm253_vm1, %v6335_v2  ;;  %292 = vst.msk [vmem:[#allocation2 + $0x94] sm:$0xf] %vm253_vm1, %v6335_v2  ;;  %v1217_v19 = vld [vmem:[#allocation2 + $0x4] sm:$0xf] }
  0x1c   : > { %294 = vst.msk [vmem:[#allocation2 + $0x9c] sm:$0xf] %vm253_vm1, %v6335_v2  ;;  %295 = vst.msk [vmem:[#allocation2 + $0xa0] sm:$0xf] %vm253_vm1, %v6335_v2  ;;  %v1216_v20 = vld [vmem:[#allocation2] sm:$0xf] }
  0x1d   : > { %297 = vst.msk [vmem:[#allocation2 + $0xa8] sm:$0xf] %vm253_vm1, %v6335_v2  ;;  %298 = vst.msk [vmem:[#allocation2 + $0xac] sm:$0xf] %vm253_vm1, %v6335_v2  ;;  %6043 = vmatmul.mubr.msk.bf16.gmra.mrb[4].mxu0 %vm429_vm2, %v6147_v6  ;;  %v6544_v21 = vcombine.low %v1216_v20, %v1217_v19  ;;  %v1264_v25 = vld [vmem:[#allocation2] sm:$0xe] }
  0x1e   : > { %300 = vst.msk [vmem:[#allocation2 + $0xb4] sm:$0xf] %vm253_vm1, %v6335_v2  ;;  %301 = vst.msk [vmem:[#allocation2 + $0xb8] sm:$0xf] %vm253_vm1, %v6335_v2  ;;  %6046 = vmatprep.mubr.msk.bf16.mxu0 %vm429_vm2, %v6148_v7  ;;  %v5576_v28 = vcombine.low %v1264_v25, %v1217_v19  ;;  %vm1544_vm5 = vsmask.f32 7424 }
  0x1f   : > { %303 = vst.msk [vmem:[#allocation2 + $0xc0] sm:$0xf] %vm253_vm1, %v6335_v2  ;;  %304 = vst.msk [vmem:[#allocation2 + $0xc4] sm:$0xf] %vm253_vm1, %v6335_v2  ;;  %v1548_v23 = vshll.u32 %v6544_v21, 16  ;;  %v1546_v29 = vshrl.u32 %v6544_v21, 16 }
  0x20   : > { %306 = vst.msk [vmem:[#allocation2 + $0xcc] sm:$0xf] %vm253_vm1, %v6335_v2  ;;  %307 = vst.msk [vmem:[#allocation2 + $0xd0] sm:$0xf] %vm253_vm1, %v6335_v2  ;;  %v1818_v31 = vrot.slane %v5576_v28, 1  ;;  %s6338_s30 = smov 4  }
  0x21   : > { %263 = vst.msk [vmem:[#allocation2 + $0x20] sm:$0x1] %vm256_vm3, %v6335_v2  ;;  %257 = vst.msk [vmem:[#allocation2 + $0x8] sm:$0x1] %vm256_vm3, %v6335_v2  ;;  %v1550_v30 = vrot.slane %v1548_v23, 1  ;;  %s6339_s8 = smov 12  }
  0x22   : > { %260 = vst.msk [vmem:[#allocation2 + $0x14] sm:$0x1] %vm256_vm3, %v6335_v2  ;;  %266 = vst.msk [vmem:[#allocation2 + $0x2c] sm:$0x1] %vm256_vm3, %v6335_v2  ;;  %v6559_v38 = vld [vmem:[%s8097_s2] ss:$0 sm:$0xff] }
  0x23   : > { %269 = vst.msk [vmem:[#allocation2 + $0x38] sm:$0x1] %vm256_vm3, %v6335_v2  ;;  %272 = vst.msk [vmem:[#allocation2 + $0x44] sm:$0x1] %vm256_vm3, %v6335_v2  ;;  %v1551_v34 = vor.u32 %v1550_v30, %v1546_v29  ;;  %vm1096_vm6 = vsmask.f32 7938 }
  0x24   : > { %275 = vst.msk [vmem:[#allocation2 + $0x50] sm:$0x1] %vm256_vm3, %v6335_v2  ;;  %278 = vst.msk [vmem:[#allocation2 + $0x5c] sm:$0x1] %vm256_vm3, %v6335_v2  ;;  %vm771_vm7 = vsmask.f32 256 }
  0x25   : > { %6047 = vmatmul.mubr.msk.bf16.gmra.mrb[8].mxu0 %vm429_vm2, %v6149_v8  ;;  %281 = vst.msk [vmem:[#allocation2 + $0x68] sm:$0x1] %vm256_vm3, %v6335_v2  ;;  %284 = vst.msk [vmem:[#allocation2 + $0x74] sm:$0x1] %vm256_vm3, %v6335_v2  ;;  %vm772_vm8 = vsmask.f32 4368 }
  0x26   : > { %6050 = vmatprep.mubr.msk.bf16.mxu0 %vm429_vm2, %v6150_v9  ;;  %287 = vst.msk [vmem:[#allocation2 + $0x80] sm:$0x1] %vm256_vm3, %v6335_v2  ;;  %290 = vst.msk [vmem:[#allocation2 + $0x8c] sm:$0x1] %vm256_vm3, %v6335_v2  ;;  %s6340_s9 = smov 20   ;;  %s6341_s10 = smov 32  }
  0x27   : > { %293 = vst.msk [vmem:[#allocation2 + $0x98] sm:$0x1] %vm256_vm3, %v6335_v2  ;;  %296 = vst.msk [vmem:[#allocation2 + $0xa4] sm:$0x1] %vm256_vm3, %v6335_v2  ;;  %v5510_v22 = vld [vmem:[#allocation2 + $0xcc] sm:$0xf] }
  0x28   : > { %299 = vst.msk [vmem:[#allocation2 + $0xb0] sm:$0x1] %vm256_vm3, %v6335_v2  ;;  %302 = vst.msk [vmem:[#allocation2 + $0xbc] sm:$0x1] %vm256_vm3, %v6335_v2  ;;  %v5511_v24 = vld [vmem:[#allocation2 + $0xd0] sm:$0xf] }
  0x29   : > { %305 = vst.msk [vmem:[#allocation2 + $0xc8] sm:$0x1] %vm256_vm3, %v6335_v2  ;;  %308 = vst.msk [vmem:[#allocation2 + $0xd4] sm:$0x1] %vm256_vm3, %v6335_v2  ;;  %v6547_v26 = vcombine.low %v5510_v22, %v5511_v24  ;;  %v1107_v2 = vld [vmem:[#allocation2 + $0x18] sm:$0xf] }
  0x2a   : > { %v6162_v27 = vld [vmem:[#allocation2 + $0x8] ss:$0 sps:$4 sm:$0x11]   ;;  %vm6568_vm9 = vmand %vm253_vm1, %vm1096_vm6  ;;  %v1104_v25 = vld [vmem:[#allocation2 + $0x14] sm:$0x1]  ;;  %s6342_s11 = smov 16  }
  0x2b   : > { %8111 = vst [vmem:[#allocation3_spill] sm:$0xff] %v6547_v26  ;;  %2520 = vrot.lane.b32.xlu1 %v6547_v26, %s6336_s28  ;;  %v1819_v32 = vrot.slane %v6162_v27, 1  ;;  %v1553_v35 = vshll.u32 %v6162_v27, 16  ;;  %vm6575_vm10 = vmor %vm771_vm7, %vm772_vm8  ;;  %s6343_s12 = smov 28   ;;  %vm2922_vm12 = vcmask 31744   ;;  %vm2988_vm13 = vcmask 97280  }
  0x2c   : > { %vm6581_vm11 = vmand %vm256_vm3, %vm771_vm7  ;;  %vm3246_vm14 = vcmask 1041408   ;;  %vm3021_vm15 = vcmask 130048   ;;  %vm3054_vm0 = vcmask 162816   ;;  %vm3087_vm3 = vcmask 195584  }
  0x2d   : > { %6051 = vmatmul.mubr.msk.bf16.gmra.mrb[12].mxu0 %vm429_vm2, %v6151_v10  ;;  %v1820_v33 = vsel %vm1817_vm4, %v1818_v31, %v1819_v32  ;;  %v1555_v36 = vrot.slane %v1553_v35, 1  ;;  %v1098_v10 = vld [vmem:[#allocation2 + $0xc] sm:$0xf]  ;;  %vm3120_vm6 = vcmask 228352   ;;  %vm3153_vm7 = vcmask 261120  }
  0x2e   : > { %6054 = vmatprep.mubr.msk.bf16.mxu0 %vm429_vm2, %v6152_v11  ;;  %vm3213_vm8 = vcmask 293888  }
  0x2f   : > { %1866 = vrot.lane.b32.xlu1 %v1820_v33, %s6337_s29  ;;  %v1556_v37 = vsel %vm1544_vm5, %v1551_v34, %v1555_v36 }
  0x30   : > { %1737 = vrot.lane.b32.xlu0 %v1556_v37, %s6338_s30 }
  0x35   : > { %6055 = vmatmul.mubr.msk.bf16.gmra.mrb[16].mxu0 %vm429_vm2, %v6153_v12 }
  0x36   : > { %6058 = vmatprep.mubr.msk.bf16.mxu0 %vm429_vm2, %v6154_v13 }
  0x3d   : > { %6059 = vmatmul.mubr.msk.bf16.gmra.mrb[20].mxu0 %vm429_vm2, %v6155_v14 }
  0x3e   : > { %6062 = vmatprep.mubr.msk.bf16.mxu0 %vm429_vm2, %v6156_v15 }
  0x45   : > { %6063 = vmatmul.mubr.msk.bf16.gmra.mrb[24].mxu0 %vm429_vm2, %v6157_v16 }
  0x46   : > { %6066 = vmatprep.mubr.msk.bf16.mxu0 %vm429_vm2, %v6158_v17 }
  0x4d   : > { %6067 = vmatmul.mubr.msk.bf16.gmra.mrb[28].mxu0 %vm429_vm2, %v6159_v18  ;;  %v1111_v18 = vld [vmem:[#allocation2 + $0x20] sm:$0x1] }
  0xe8   : > { %v6040_v39 = vpop.f32.mrb[0].mxu0 }
  0xe9   : > { %v525_v40 = vadd.f32 %v6040_v39, %v6559_v38  ;;  %v516_v41 = vpop.f32.mrb[1].mxu0 }
  0xea   : > { %v517_v42 = vadd.f32 %v6559_v38, %v516_v41  ;;  %v6041_v43 = vpop.f32.mrb[2].mxu0 }
  0xeb   : > { %v645_v44 = vmax.f32 %v525_v40, 0.0  ;;  %v528_v45 = vadd.f32 %v6041_v43, %v6559_v38  ;;  %v519_v46 = vpop.f32.mrb[3].mxu0 }
  0xec   : > { %v643_v47 = vmax.f32 %v517_v42, 0.0  ;;  %v520_v48 = vadd.f32 %v6559_v38, %v519_v46 }
  0xed   : > { %v5906_v49 = vpack.c.bf16 %v645_v44, %v645_v44  ;;  %v646_v50 = vmax.f32 %v528_v45, 0.0 }
  0xee   : > { %v5904_v51 = vpack.c.bf16 %v643_v47, %v643_v47  ;;  %v644_v52 = vmax.f32 %v520_v48, 0.0  ;;  %v1121_v47 = vld [vmem:[#allocation2 + $0x30] sm:$0xf] }
  0xef   : > { %v792_v53 = vshrl.u32 %v5906_v49, 16  ;;  %v5907_v54 = vpack.c.bf16 %v646_v50, %v646_v50  ;;  %v795_v55 = vshll.u32 %v5906_v49, 16 }
  0xf0   : > { %v775_v56 = vshrl.u32 %v5904_v51, 16  ;;  %v778_v57 = vshll.u32 %v5904_v51, 16  ;;  %v5905_v58 = vpack.c.bf16 %v644_v52, %v644_v52  ;;  %v6044_v59 = vpop.f32.mrb[4].mxu0  ;;  %v1114_v52 = vld [vmem:[#allocation2 + $0x24] sm:$0xf] }
  0xf1   : > { %v794_v60 = vrot.slane %v792_v53, 7  ;;  %v800_v61 = vshrl.u32 %v5907_v54, 16  ;;  %v803_v62 = vshll.u32 %v5907_v54, 16  ;;  %v541_v63 = vadd.f32 %v6044_v59, %v6559_v38  ;;  %v532_v0 = vpop.f32.mrb[5].mxu0 }
  0xf2   : > { %v777_v3 = vrot.slane %v775_v56, 7  ;;  %v783_v4 = vshrl.u32 %v5905_v58, 16  ;;  %v786_v5 = vshll.u32 %v5905_v58, 16  ;;  %v533_v6 = vadd.f32 %v6559_v38, %v532_v0  ;;  %v6045_v7 = vpop.f32.mrb[6].mxu0 }
  0xf3   : > { %v797_v8 = vor.u32 %v795_v55, %v794_v60  ;;  %v798_v9 = vrot.slane %v794_v60, 4  ;;  %v802_v12 = vrot.slane %v800_v61, 7  ;;  %v649_v13 = vmax.f32 %v541_v63, 0.0  ;;  %v535_v14 = vpop.f32.mrb[7].mxu0 }
  0xf4   : > { %v780_v15 = vor.u32 %v778_v57, %v777_v3  ;;  %v781_v16 = vrot.slane %v777_v3, 4  ;;  %v785_v19 = vrot.slane %v783_v4, 7  ;;  %v647_v20 = vmax.f32 %v533_v6, 0.0 }
  0xf5   : > { %v1108_v22 = vsel %vm6568_vm9, %v797_v8, %v1107_v2  ;;  %v805_v23 = vor.u32 %v803_v62, %v802_v12  ;;  %v807_v24 = vrot.slane %v802_v12, 4  ;;  %v5910_v27 = vpack.c.bf16 %v649_v13, %v649_v13  ;;  %v1125_v12 = vld [vmem:[#allocation2 + $0x38] sm:$0x1]  ;;  %v1118_v13 = vld [vmem:[#allocation2 + $0x2c] sm:$0x1] }
  0xf6   : > { %1109 = vst [vmem:[#allocation2 + $0x18] sm:$0xf] %v1108_v22  ;;  %v1099_v28 = vsel %vm6568_vm9, %v780_v15, %v1098_v10  ;;  %v788_v29 = vor.u32 %v786_v5, %v785_v19  ;;  %v790_v30 = vrot.slane %v785_v19, 4  ;;  %v5908_v31 = vpack.c.bf16 %v647_v20, %v647_v20 }
  0xf7   : > { %1100 = vst [vmem:[#allocation2 + $0xc] sm:$0xf] %v1099_v28  ;;  %v806_v32 = vsel %vm6575_vm10, %v798_v9, %v805_v23  ;;  %v1112_v33 = vsel %vm6581_vm11, %v807_v24, %v1111_v18  ;;  %v826_v34 = vshrl.u32 %v5910_v27, 16  ;;  %v829_v35 = vshll.u32 %v5910_v27, 16 }
  0xf8   : > { %1110 = vst.msk [vmem:[#allocation2 + $0x1c] sm:$0xf] %vm253_vm1, %v806_v32  ;;  %1113 = vst [vmem:[#allocation2 + $0x20] sm:$0x1] %v1112_v33  ;;  %v789_v36 = vsel %vm6575_vm10, %v781_v16, %v788_v29  ;;  %v1105_v37 = vsel %vm6581_vm11, %v790_v30, %v1104_v25  ;;  %v809_v39 = vshrl.u32 %v5908_v31, 16  ;;  %v812_v40 = vshll.u32 %v5908_v31, 16 }
  0xf9   : > { %v6048_v41 = vpop.f32.mrb[8].mxu0  ;;  %1101 = vst.msk [vmem:[#allocation2 + $0x10] sm:$0xf] %vm253_vm1, %v789_v36  ;;  %1106 = vst [vmem:[#allocation2 + $0x14] sm:$0x1] %v1105_v37  ;;  %v6599_v42 = vrot.slane %v826_v34, 7  ;;  %v544_v43 = vadd.f32 %v6045_v7, %v6559_v38  ;;  %v536_v44 = vadd.f32 %v6559_v38, %v535_v14 }
  0xfa   : > { %v6604_v45 = vadd.f32 %v6048_v41, %v6559_v38  ;;  %v548_v46 = vpop.f32.mrb[9].mxu0  ;;  %v811_v48 = vrot.slane %v809_v39, 7 }
  0xfb   : > { %v6607_v49 = vadd.f32 %v6559_v38, %v548_v46  ;;  %v6609_v50 = vpop.f32.mrb[10].mxu0  ;;  %v831_v51 = vor.u32 %v829_v35, %v6599_v42  ;;  %v650_v53 = vmax.f32 %v544_v43, 0.0  ;;  %v648_v54 = vmax.f32 %v536_v44, 0.0 }
  0xfc   : > { %v6612_v55 = vpop.f32.mrb[11].mxu0  ;;  %v832_v56 = vrot.slane %v6599_v42, 4  ;;  %v814_v57 = vor.u32 %v812_v40, %v811_v48  ;;  %v815_v58 = vrot.slane %v811_v48, 4  ;;  %v653_v59 = vmax.f32 %v6604_v45, 0.0 }
  0xfd   : > { %v1122_v60 = vsel %vm6568_vm9, %v831_v51, %v1121_v47  ;;  %v5911_v61 = vpack.c.bf16 %v650_v53, %v650_v53  ;;  %v5909_v62 = vpack.c.bf16 %v648_v54, %v648_v54  ;;  %v651_v63 = vmax.f32 %v6607_v49, 0.0  ;;  %v5480_v2 = vld [vmem:[#allocation2 + $0x18] sm:$0xf] }
  0xfe   : > { %1123 = vst [vmem:[#allocation2 + $0x30] sm:$0xf] %v1122_v60  ;;  %v1115_v0 = vsel %vm6568_vm9, %v814_v57, %v1114_v52  ;;  %v5418_v3 = vld [vmem:[#allocation2 + $0x18] sm:$0xf]  ;;  %v5416_v24 = vld [vmem:[#allocation2 + $0xc] sm:$0xf] }
  0xff   : > { %v5465_v4 = vld [vmem:[#allocation2 + $0x18] sm:$0xe]  ;;  %1116 = vst [vmem:[#allocation2 + $0x24] sm:$0xf] %v1115_v0  ;;  %v834_v5 = vshrl.u32 %v5911_v61, 16  ;;  %v837_v6 = vshll.u32 %v5911_v61, 16 }
 0x100   : > { %v817_v7 = vshrl.u32 %v5909_v62, 16  ;;  %v820_v8 = vshll.u32 %v5909_v62, 16  ;;  %v5481_v9 = vld [vmem:[#allocation2 + $0x1c] sm:$0xf]  ;;  %v5528_v10 = vld [vmem:[#allocation2 + $0x18] sm:$0xe] }
 0x101   : > { %v6621_v14 = vcombine.low %v5480_v2, %v5481_v9  ;;  %v5419_v15 = vld [vmem:[#allocation2 + $0x1c] sm:$0xf]  ;;  %v6623_v16 = vld [vmem:[#allocation2 + $0x10] sm:$0xf]  ;;  %v836_v18 = vrot.slane %v834_v5, 7  ;;  %v6625_v25 = vpop.f32.mrb[12].mxu0  ;;  %v5672_v27 = vcombine.low %v5528_v10, %v5481_v9  ;;  %v6666_v10 = vadd.f32 %v6609_v50, %v6559_v38 }
 0x102   : > { %v819_v19 = vrot.slane %v817_v7, 7  ;;  %v5593_v20 = vcombine.low %v5418_v3, %v5419_v15  ;;  %v5625_v22 = vcombine.low %v5465_v4, %v5419_v15  ;;  %v6169_v23 = vld [vmem:[#allocation2 + $0x20] ss:$0 sps:$4 sm:$0x11]   ;;  %v1219_v34 = vld [vmem:[#allocation2 + $0x10] sm:$0xf]  ;;  %v6634_v40 = vcombine.low %v5416_v24, %v6623_v16 }
 0x103   : > { %2490 = vrot.lane.b32.xlu0 %v6621_v14, %s6336_s28  ;;  %v2573_v28 = vshll.u32 %v6621_v14, 16  ;;  %v6630_v29 = vld [vmem:[#allocation2 + $0x20] ss:$0 sps:$4 sm:$0x11]   ;;  %v839_v30 = vor.u32 %v837_v6, %v836_v18  ;;  %v841_v31 = vrot.slane %v836_v18, 4  ;;  %v2334_v37 = vrot.slane %v6169_v23, 1 }
 0x104   : > { %v822_v32 = vor.u32 %v820_v8, %v819_v19  ;;  %v824_v33 = vrot.slane %v819_v19, 4  ;;  %1980 = vrot.lane.b32.xlu1 %v5593_v20, %s6339_s8  ;;  %v2073_v35 = vshll.u32 %v5593_v20, 16  ;;  %v2333_v36 = vrot.slane %v5625_v22, 1  ;;  %v5464_v39 = vld [vmem:[#allocation2 + $0xc] sm:$0xe]  ;;  %v6646_v48 = vpop.f32.mrb[13].mxu0 }
 0x105   : > { %v840_v41 = vsel %vm6575_vm10, %v832_v56, %v839_v30  ;;  %v1126_v42 = vsel %vm6581_vm11, %v841_v31, %v1125_v12  ;;  %v1265_v46 = vld [vmem:[#allocation2 + $0xc] sm:$0xe]  ;;  %v6644_v47 = vld [vmem:[#allocation2 + $0x14] ss:$0 sps:$4 sm:$0x11]   ;;  %v2842_v52 = vrot.slane %v5672_v27, 1  ;;  %v5914_v22 = vpack.c.bf16 %v653_v59, %v653_v59 }
 0x106   : > { %v823_v43 = vsel %vm6575_vm10, %v815_v58, %v822_v32  ;;  %v1119_v44 = vsel %vm6581_vm11, %v824_v33, %v1118_v13  ;;  %1124 = vst.msk [vmem:[#allocation2 + $0x34] sm:$0xf] %vm253_vm1, %v840_v41  ;;  %1127 = vst [vmem:[#allocation2 + $0x38] sm:$0x1] %v1126_v42  ;;  %v2335_v51 = vsel %vm1817_vm4, %v2333_v36, %v2334_v37  ;;  %v2843_v53 = vrot.slane %v6630_v29, 1  ;;  %v6659_v6 = vpop.f32.mrb[14].mxu0 }
 0x107   : > { %1117 = vst.msk [vmem:[#allocation2 + $0x28] sm:$0xf] %vm253_vm1, %v823_v43  ;;  %1120 = vst [vmem:[#allocation2 + $0x2c] sm:$0x1] %v1119_v44  ;;  %1978 = vrot.lane.b32.xlu0 %v6634_v40, %s6339_s8  ;;  %v5577_v54 = vcombine.low %v1265_v46, %v1219_v34  ;;  %v1220_v56 = vld [vmem:[#allocation2 + $0x18] sm:$0xf]  ;;  %v5624_v58 = vcombine.low %v5464_v39, %v6623_v16  ;;  %v6677_v50 = vpack.c.bf16 %v651_v63, %v651_v63 }
 0x108   : > { %v1221_v57 = vld [vmem:[#allocation2 + $0x1c] sm:$0xf]  ;;  %2380 = vrot.lane.b32.xlu1 %v2335_v51, %s6340_s9  ;;  %v1822_v60 = vrot.slane %v6644_v47, 1  ;;  %v1266_v61 = vld [vmem:[#allocation2 + $0x18] sm:$0xe]  ;;  %v2071_v62 = vshrl.u32 %v5593_v20, 16  ;;  %v2844_v7 = vsel %vm1817_vm4, %v2842_v52, %v2843_v53 }
 0x109   : > { %v1821_v0 = vrot.slane %v5577_v54, 1  ;;  %v6657_v2 = vcombine.low %v1220_v56, %v1221_v57  ;;  %v6177_v3 = vld [vmem:[#allocation2 + $0x20] ss:$0 sps:$4 sm:$0x11]   ;;  %v5578_v4 = vcombine.low %v1266_v61, %v1221_v57  ;;  %v2075_v5 = vrot.slane %v2073_v35, 1  ;;  %v6685_v32 = vpop.f32.mrb[15].mxu0 }
 0x10a   : > { %v2078_v8 = vshll.u32 %v6169_v23, 16  ;;  %v6662_v9 = vld [vmem:[#allocation2 + $0x14] ss:$0 sps:$4 sm:$0x11]   ;;  %v1825_v15 = vrot.slane %v6177_v3, 1  ;;  %v6681_v23 = vadd.f32 %v6559_v38, %v6612_v55  ;;  %v2330_v24 = vrot.slane %v5624_v58, 1 }
 0x10b   : > { %2890 = vrot.lane.b32.xlu0 %v2844_v7, %s6341_s10  ;;  %v1823_v12 = vsel %vm1817_vm4, %v1821_v0, %v1822_v60  ;;  %v1824_v13 = vrot.slane %v5578_v4, 1  ;;  %v2076_v16 = vor.u32 %v2075_v5, %v2071_v62  ;;  %v1218_v18 = vld [vmem:[#allocation2 + $0xc] sm:$0xf]  ;;  %v5422_v20 = vld [vmem:[#allocation2 + $0x30] sm:$0xf]  ;;  %v2331_v27 = vrot.slane %v6662_v9, 1 }
 0x10c   : > { %1868 = vrot.lane.b32.xlu1 %v1823_v12, %s6337_s29  ;;  %v2080_v19 = vrot.slane %v2078_v8, 1  ;;  %v1572_v30 = vshll.u32 %v6657_v2, 16  ;;  %v1577_v31 = vshll.u32 %v6177_v3, 16  ;;  %v6687_v45 = vcombine.low %v1218_v18, %v1219_v34  ;;  %v5467_v55 = vld [vmem:[#allocation2 + $0x30] sm:$0xe]  ;;  %v6702_v53 = vpop.f32.mrb[16].mxu0 }
 0x10d   : > { %v1826_v59 = vsel %vm1817_vm4, %v1824_v13, %v1825_v15  ;;  %v2575_v49 = vrot.slane %v2573_v28, 1  ;;  %v2578_v63 = vshll.u32 %v6630_v29, 16  ;;  %v5423_v33 = vld [vmem:[#allocation2 + $0x34] sm:$0xf]  ;;  %v1570_v36 = vshrl.u32 %v6657_v2, 16 }
 0x10e   : > { %v2081_v35 = vsel %vm1544_vm5, %v2076_v16, %v2080_v19  ;;  %v1574_v37 = vrot.slane %v1572_v30, 1  ;;  %v6696_v39 = vcombine.low %v5422_v20, %v5423_v33  ;;  %v2061_v34 = vshll.u32 %v6634_v40, 16  ;;  %v1135_v51 = vld [vmem:[#allocation2 + $0x48] sm:$0xf]  ;;  %v5482_v52 = vld [vmem:[#allocation2 + $0x24] sm:$0xf] }
 0x10f   : > { %1870 = vrot.lane.b32.xlu0 %v1826_v59, %s6337_s29  ;;  %v2571_v28 = vshrl.u32 %v6621_v14, 16  ;;  %v860_v41 = vshrl.u32 %v5914_v22, 16  ;;  %v863_v29 = vshll.u32 %v5914_v22, 16  ;;  %v2332_v42 = vsel %vm1817_vm4, %v2330_v24, %v2331_v27  ;;  %v6706_v58 = vld [vmem:[#allocation2 + $0x28] sm:$0xf]  ;;  %v6709_v14 = vpop.f32.mrb[17].mxu0 }
 0x110   : > { %2252 = vrot.lane.b32.xlu1 %v2081_v35, %s6342_s11  ;;  %v1575_v43 = vor.u32 %v1574_v37, %v1570_v36  ;;  %v1579_v44 = vrot.slane %v1577_v31, 1  ;;  %v5627_v46 = vcombine.low %v5467_v55, %v5423_v33  ;;  %v2580_v56 = vrot.slane %v2578_v63, 1  ;;  %v6716_v4 = vld [vmem:[#allocation2 + $0x38] ss:$0 sps:$4 sm:$0x11]   ;;  %v6722_v13 = vpop.f32.mrb[18].mxu0 }
 0x111   : > { %v2576_v54 = vor.u32 %v2575_v49, %v2571_v28  ;;  %v6704_v57 = vrot.slane %v860_v41, 7  ;;  %v1560_v60 = vshll.u32 %v6687_v45, 16  ;;  %v2097_v62 = vshll.u32 %v6696_v39, 16  ;;  %v6737_v59 = vld [vmem:[#allocation2 + $0x2c] ss:$0 sps:$4 sm:$0x11]  }
 0x112   : > { %v1580_v61 = vsel %vm1544_vm5, %v1575_v43, %v1579_v44  ;;  %v1565_v0 = vshll.u32 %v6644_v47, 16  ;;  %v843_v3 = vshrl.u32 %v6677_v50, 16  ;;  %v1558_v7 = vshrl.u32 %v6687_v45, 16  ;;  %v1267_v35 = vld [vmem:[#allocation2 + $0x24] sm:$0xe] }
 0x113   : > { %2378 = vrot.lane.b32.xlu0 %v2332_v42, %s6340_s9  ;;  %v865_v5 = vor.u32 %v863_v29, %v6704_v57  ;;  %v1562_v8 = vrot.slane %v1560_v60, 1  ;;  %v846_v12 = vshll.u32 %v6677_v50, 16  ;;  %v6725_v15 = vcombine.low %v5482_v52, %v6706_v58  ;;  %v1128_v50 = vld [vmem:[#allocation2 + $0x3c] sm:$0xf]  ;;  %v1139_v43 = vld [vmem:[#allocation2 + $0x50] sm:$0x1] }
 0x114   : > { %1741 = vrot.lane.b32.xlu1 %v1580_v61, %s6338_s30  ;;  %v6727_v16 = vrot.slane %v843_v3, 7  ;;  %v654_v47 = vmax.f32 %v6666_v10, 0.0  ;;  %v652_v18 = vmax.f32 %v6681_v23, 0.0  ;;  %v2581_v19 = vsel %vm1544_vm5, %v2576_v54, %v2580_v56  ;;  %v6739_v23 = vpop.f32.mrb[19].mxu0 }
 0x115   : > { %v866_v20 = vrot.slane %v6704_v57, 4  ;;  %v1136_v22 = vsel %vm6568_vm9, %v865_v5, %v1135_v51  ;;  %v1563_v24 = vor.u32 %v1562_v8, %v1558_v7  ;;  %v1567_v27 = vrot.slane %v1565_v0, 1  ;;  %v6747_v29 = vpop.f32.mrb[20].mxu0  ;;  %v1222_v5 = vld [vmem:[#allocation2 + $0x24] sm:$0xf] }
 0x116   : > { %1137 = vst [vmem:[#allocation2 + $0x48] sm:$0xf] %v1136_v22  ;;  %v848_v30 = vor.u32 %v846_v12, %v6727_v16  ;;  %v5915_v31 = vpack.c.bf16 %v654_v47, %v654_v47  ;;  %v5913_v10 = vpack.c.bf16 %v652_v18, %v652_v18  ;;  %v2339_v49 = vrot.slane %v5627_v46, 1  ;;  %v1132_v46 = vld [vmem:[#allocation2 + $0x44] sm:$0x1] }
 0x117   : > { %2762 = vrot.lane.b32.xlu0 %v2581_v19, %s6343_s12  ;;  %v2340_v63 = vrot.slane %v6716_v4, 1  ;;  %v2059_v33 = vshrl.u32 %v6634_v40, 16  ;;  %v2063_v55 = vrot.slane %v2061_v34, 1  ;;  %v1568_v42 = vsel %vm1544_vm5, %v1563_v24, %v1567_v27  ;;  %v1223_v40 = vld [vmem:[#allocation2 + $0x28] sm:$0xf]  ;;  %v6751_v34 = vpop.f32.mrb[21].mxu0 }
 0x118   : > { %1984 = vrot.lane.b32.xlu1 %v6696_v39, %s6339_s8  ;;  %v1129_v36 = vsel %vm6568_vm9, %v848_v30, %v1128_v50  ;;  %v868_v37 = vshrl.u32 %v5915_v31, 16  ;;  %v871_v28 = vshll.u32 %v5915_v31, 16  ;;  %v851_v41 = vshrl.u32 %v5913_v10, 16  ;;  %v6755_v61 = vpop.f32.mrb[22].mxu0  ;;  %v5484_v8 = vld [vmem:[#allocation2 + $0x30] sm:$0xf] }
 0x119   : > { %1130 = vst [vmem:[#allocation2 + $0x3c] sm:$0xf] %v1129_v36  ;;  %v854_v44 = vshll.u32 %v5913_v10, 16  ;;  %v2064_v51 = vor.u32 %v2063_v55, %v2059_v33  ;;  %v2066_v52 = vshll.u32 %v6662_v9, 16  ;;  %v849_v54 = vrot.slane %v6727_v16, 4  ;;  %v6762_v18 = vpop.f32.mrb[23].mxu0 }
 0x11a   : > { %v870_v56 = vrot.slane %v868_v37, 7  ;;  %v853_v57 = vrot.slane %v851_v41, 7  ;;  %v5579_v60 = vcombine.low %v1267_v35, %v1223_v40  ;;  %v2585_v0 = vshll.u32 %v6725_v15, 16  ;;  %v5485_v12 = vld [vmem:[#allocation2 + $0x34] sm:$0xf] }
 0x11b   : > { %1739 = vrot.lane.b32.xlu0 %v1568_v42, %s6338_s30  ;;  %v2341_v3 = vsel %vm1817_vm4, %v2339_v49, %v2340_v63  ;;  %v2068_v9 = vrot.slane %v2066_v52, 1  ;;  %v1828_v7 = vrot.slane %v6737_v59, 1  ;;  %v5530_v47 = vld [vmem:[#allocation2 + $0x30] sm:$0xe]  ;;  %v1225_v27 = vld [vmem:[#allocation2 + $0x34] sm:$0xf]  ;;  %v6787_v41 = vcombine.low %v5484_v8, %v5485_v12 }
 0x11c   : > { %2492 = vrot.lane.b32.xlu1 %v6725_v15, %s6336_s28  ;;  %v1224_v16 = vld [vmem:[#allocation2 + $0x30] sm:$0xf]  ;;  %v873_v19 = vor.u32 %v871_v28, %v870_v56  ;;  %v875_v22 = vrot.slane %v870_v56, 4  ;;  %v856_v24 = vor.u32 %v854_v44, %v853_v57  ;;  %v858_v50 = vrot.slane %v853_v57, 4  ;;  %v5529_v33 = vld [vmem:[#allocation2 + $0x24] sm:$0xe] }
 0x11d   : > { %v2069_v30 = vsel %vm1544_vm5, %v2064_v51, %v2068_v9  ;;  %v1827_v31 = vrot.slane %v5579_v60, 1  ;;  %v2095_v10 = vshrl.u32 %v6696_v39, 16  ;;  %v2099_v49 = vrot.slane %v2097_v62, 1  ;;  %v6768_v63 = vld [vmem:[#allocation2 + $0x38] ss:$0 sps:$4 sm:$0x11]  }
 0x11e   : > { %v874_v55 = vsel %vm6575_vm10, %v866_v20, %v873_v19  ;;  %v1140_v35 = vsel %vm6581_vm11, %v875_v22, %v1139_v43  ;;  %v857_v36 = vsel %vm6575_vm10, %v849_v54, %v856_v24  ;;  %v1133_v37 = vsel %vm6581_vm11, %v858_v50, %v1132_v46  ;;  %v5420_v62 = vld [vmem:[#allocation2 + $0x24] sm:$0xf]  ;;  %v6783_v20 = vld [vmem:[#allocation2 + $0x2c] ss:$0 sps:$4 sm:$0x11]  }
 0x11f   : > { %2250 = vrot.lane.b32.xlu0 %v2069_v30, %s6342_s11  ;;  %1138 = vst.msk [vmem:[#allocation2 + $0x4c] sm:$0xf] %vm253_vm1, %v874_v55  ;;  %1141 = vst [vmem:[#allocation2 + $0x50] sm:$0x1] %v1140_v35  ;;  %v2102_v39 = vshll.u32 %v6716_v4, 16  ;;  %v6785_v28 = vcombine.low %v1222_v5, %v1223_v40  ;;  %v5674_v42 = vcombine.low %v5530_v47, %v5485_v12  ;;  %v1601_v57 = vshll.u32 %v6768_v63, 16 }
 0x120   : > { %1131 = vst.msk [vmem:[#allocation2 + $0x40] sm:$0xf] %vm253_vm1, %v857_v36  ;;  %1134 = vst [vmem:[#allocation2 + $0x44] sm:$0x1] %v1133_v37  ;;  %2384 = vrot.lane.b32.xlu1 %v2341_v3, %s6340_s9  ;;  %v5421_v43 = vld [vmem:[#allocation2 + $0x28] sm:$0xf]  ;;  %v6789_v46 = vcombine.low %v1224_v16, %v1225_v27  ;;  %v1829_v52 = vsel %vm1817_vm4, %v1827_v31, %v1828_v7  ;;  %v2100_v54 = vor.u32 %v2099_v49, %v2095_v10 }
 0x121   : > { %8118 = vst [vmem:[#allocation4_spill] sm:$0xff] %v6785_v28  ;;  %v5466_v44 = vld [vmem:[#allocation2 + $0x24] sm:$0xe]  ;;  %v1268_v51 = vld [vmem:[#allocation2 + $0x30] sm:$0xe]  ;;  %v2104_v56 = vrot.slane %v2102_v39, 1  ;;  %v5673_v5 = vcombine.low %v5529_v33, %v6706_v58  ;;  %v573_v12 = vadd.f32 %v6625_v25, %v6559_v38  ;;  %v6807_v16 = vcombine.low %v5420_v62, %v5421_v43 }
 0x122   : > { %8119 = vst [vmem:[#allocation5_spill] sm:$0xff] %v6789_v46  ;;  %v6793_v4 = vld [vmem:[#allocation2 + $0x38] ss:$0 sps:$4 sm:$0x11]   ;;  %v1594_v40 = vshrl.u32 %v6789_v46, 16  ;;  %v1596_v60 = vshll.u32 %v6789_v46, 16  ;;  %v5580_v8 = vcombine.low %v1268_v51, %v1225_v27  ;;  %v5626_v19 = vcombine.low %v5466_v44, %v5421_v43 }
 0x123   : > { %2494 = vrot.lane.b32.xlu0 %v6787_v41, %s6336_s28  ;;  %v2583_v3 = vshrl.u32 %v6725_v15, 16  ;;  %v2587_v9 = vrot.slane %v2585_v0, 1  ;;  %v2590_v7 = vshll.u32 %v6783_v20, 16  ;;  %v6805_v47 = vpop.f32.mrb[24].mxu0  ;;  %v2848_v24 = vrot.slane %v5674_v42, 1  ;;  %v6254_v15 = vld [vmem:[%s8098_s3] sm:$0xff]  }
 0x124   : > { %1872 = vrot.lane.b32.xlu1 %v1829_v52, %s6337_s29  ;;  %v1598_v22 = vrot.slane %v1596_v60, 1  ;;  %v2105_v58 = vsel %vm1544_vm5, %v2100_v54, %v2104_v56  ;;  %v1603_v0 = vrot.slane %v1601_v57, 1  ;;  %v2849_v50 = vrot.slane %v6793_v4, 1  ;;  %6070 = vmatprep.subr.bf16.mxu1 %v6254_v15  ;;  %v6818_v49 = vpop.f32.mrb[25].mxu0  ;;  %v5426_v37 = vld [vmem:[#allocation2 + $0x48] sm:$0xf] }
 0x125   : > { %v1584_v27 = vshll.u32 %v6785_v28, 16  ;;  %v2588_v30 = vor.u32 %v2587_v9, %v2583_v3  ;;  %v2592_v31 = vrot.slane %v2590_v7, 1  ;;  %v1831_v10 = vrot.slane %v6768_v63, 1  ;;  %6071 = vmatpush3.bf16.msra.mxu1 %v6254_v15  ;;  %v6824_v42 = vld [vmem:[#allocation2 + $0x2c] ss:$0 sps:$4 sm:$0x11]  }
 0x126   : > { %v1599_v25 = vor.u32 %v1598_v22, %v1594_v40  ;;  %v1830_v33 = vrot.slane %v5580_v8, 1  ;;  %v1589_v55 = vshll.u32 %v6737_v59, 16  ;;  %v2845_v35 = vrot.slane %v5673_v5, 1  ;;  %v6830_v44 = vpop.f32.mrb[26].mxu0  ;;  %v6843_v3 = vld [vmem:[#allocation2 + $0x48] sm:$0xe] }
 0x127   : > { %1982 = vrot.lane.b32.xlu0 %v6807_v16, %s6339_s8  ;;  %v2846_v36 = vrot.slane %v6783_v20, 1  ;;  %v1582_v39 = vshrl.u32 %v6785_v28, 16  ;;  %v1586_v62 = vrot.slane %v1584_v27, 1  ;;  %v565_v63 = vadd.f32 %v6559_v38, %v6646_v48  ;;  %v6834_v20 = vld [vmem:[#allocation2 + $0x4c] sm:$0xf]  ;;  %v6845_v5 = vpop.f32.mrb[27].mxu0 }
 0x128   : > { %2256 = vrot.lane.b32.xlu1 %v2105_v58, %s6342_s11  ;;  %v576_v43 = vadd.f32 %v6659_v6, %v6559_v38  ;;  %v2597_v59 = vshll.u32 %v6787_v41, 16  ;;  %v2850_v51 = vsel %vm1817_vm4, %v2848_v24, %v2849_v50  ;;  %v657_v52 = vmax.f32 %v573_v12, 0.0  ;;  %v1188_v28 = vld [vmem:[#allocation2 + $0xa4] sm:$0x1] }
 0x129   : > { %v2085_v54 = vshll.u32 %v6807_v16, 16  ;;  %v1604_v56 = vsel %vm1544_vm5, %v1599_v25, %v1603_v0  ;;  %v2593_v48 = vsel %vm1544_vm5, %v2588_v30, %v2592_v31  ;;  %v2336_v57 = vrot.slane %v5626_v19, 1  ;;  %v6257_v19 = vld [vmem:[%s8098_s3 + $0x8] sm:$0xff]  }
 0x12a   : > { %v1832_v6 = vsel %vm1817_vm4, %v1830_v33, %v1831_v10  ;;  %v1591_v40 = vrot.slane %v1589_v55, 1  ;;  %v2847_v60 = vsel %vm1817_vm4, %v2845_v35, %v2846_v36  ;;  %v5918_v9 = vpack.c.bf16 %v657_v52, %v657_v52  ;;  %6072 = vmatprep.subr.bf16.mxu1 %v6257_v19 }
 0x12b   : > { %2894 = vrot.lane.b32.xlu0 %v2850_v51, %s6341_s10  ;;  %v1587_v7 = vor.u32 %v1586_v62, %v1582_v39  ;;  %v6848_v8 = vcombine.low %v5426_v37, %v6834_v20  ;;  %v655_v12 = vmax.f32 %v565_v63, 0.0  ;;  %v658_v22 = vmax.f32 %v576_v43, 0.0  ;;  %6073 = vmatpush3.bf16.msra.mxu1 %v6257_v19  ;;  %v5486_v62 = vld [vmem:[#allocation2 + $0x3c] sm:$0xf]  ;;  %v1142_v63 = vld [vmem:[#allocation2 + $0x54] sm:$0xf] }
 0x12c   : > { %1745 = vrot.lane.b32.xlu1 %v1604_v56, %s6338_s30  ;;  %v2337_v24 = vrot.slane %v6824_v42, 1  ;;  %v894_v15 = vshrl.u32 %v5918_v9, 16  ;;  %v897_v58 = vshll.u32 %v5918_v9, 16  ;;  %v568_v0 = vadd.f32 %v6559_v38, %v6685_v32  ;;  %v1149_v32 = vld [vmem:[#allocation2 + $0x60] sm:$0xf] }
 0x12d   : > { %v2595_v50 = vshrl.u32 %v6787_v41, 16  ;;  %v2599_v27 = vrot.slane %v2597_v59, 1  ;;  %v5916_v25 = vpack.c.bf16 %v655_v12, %v655_v12  ;;  %v5919_v30 = vpack.c.bf16 %v658_v22, %v658_v22  ;;  %v1153_v59 = vld [vmem:[#allocation2 + $0x68] sm:$0x1] }
 0x12e   : > { %v5629_v31 = vcombine.low %v6843_v3, %v6834_v20  ;;  %v896_v10 = vrot.slane %v894_v15, 7  ;;  %v2602_v33 = vshll.u32 %v6793_v4, 16  ;;  %v656_v55 = vmax.f32 %v568_v0, 0.0  ;;  %v6870_v22 = vld [vmem:[#allocation2 + $0x50] ss:$0 sps:$4 sm:$0x11]  }
 0x12f   : > { %1874 = vrot.lane.b32.xlu0 %v1832_v6, %s6337_s29  ;;  %v1592_v38 = vsel %vm1544_vm5, %v1587_v7, %v1591_v40  ;;  %v877_v35 = vshrl.u32 %v5916_v25, 16  ;;  %v880_v36 = vshll.u32 %v5916_v25, 16  ;;  %v902_v41 = vshrl.u32 %v5919_v30, 16  ;;  %v6868_v6 = vld [vmem:[#allocation2 + $0x40] sm:$0xf] }
 0x130   : > { %2764 = vrot.lane.b32.xlu1 %v2593_v48, %s6343_s12  ;;  %v2338_v37 = vsel %vm1817_vm4, %v2336_v57, %v2337_v24  ;;  %v899_v39 = vor.u32 %v897_v58, %v896_v10  ;;  %v905_v43 = vshll.u32 %v5919_v30, 16  ;;  %v5917_v51 = vpack.c.bf16 %v656_v55, %v656_v55  ;;  %v1146_v30 = vld [vmem:[#allocation2 + $0x5c] sm:$0x1] }
 0x131   : > { %v900_v20 = vrot.slane %v896_v10, 4  ;;  %v2600_v4 = vor.u32 %v2599_v27, %v2595_v50  ;;  %v879_v52 = vrot.slane %v877_v35, 7  ;;  %v904_v56 = vrot.slane %v902_v41, 7  ;;  %v1269_v10 = vld [vmem:[#allocation2 + $0x3c] sm:$0xe] }
 0x132   : > { %v1150_v48 = vsel %vm6568_vm9, %v899_v39, %v1149_v32  ;;  %v2604_v57 = vrot.slane %v2602_v33, 1  ;;  %v885_v40 = vshrl.u32 %v5917_v51, 16  ;;  %v888_v3 = vshll.u32 %v5917_v51, 16  ;;  %v1228_v32 = vld [vmem:[#allocation2 + $0x48] sm:$0xf] }
 0x133   : > { %2892 = vrot.lane.b32.xlu0 %v2847_v60, %s6341_s10  ;;  %1151 = vst [vmem:[#allocation2 + $0x60] sm:$0xf] %v1150_v48  ;;  %v882_v9 = vor.u32 %v880_v36, %v879_v52  ;;  %v907_v7 = vor.u32 %v905_v43, %v904_v56  ;;  %v909_v12 = vrot.slane %v904_v56, 4  ;;  %v2083_v60 = vshrl.u32 %v6807_v16, 16  ;;  %v6892_v35 = vld [vmem:[#allocation2 + $0x4c] sm:$0xf] }
 0x134   : > { %1743 = vrot.lane.b32.xlu1 %v1592_v38, %s6338_s30  ;;  %v883_v19 = vrot.slane %v879_v52, 4  ;;  %v887_v24 = vrot.slane %v885_v40, 7  ;;  %v2087_v15 = vrot.slane %v2085_v54, 1  ;;  %v2090_v58 = vshll.u32 %v6824_v42, 16  ;;  %v5532_v43 = vld [vmem:[#allocation2 + $0x48] sm:$0xe] }
 0x135   : > { %v6878_v0 = vcombine.low %v5486_v62, %v6868_v6  ;;  %v1143_v50 = vsel %vm6568_vm9, %v882_v9, %v1142_v63  ;;  %v908_v27 = vsel %vm6575_vm10, %v900_v20, %v907_v7  ;;  %v1154_v25 = vsel %vm6581_vm11, %v909_v12, %v1153_v59  ;;  %v1227_v62 = vld [vmem:[#allocation2 + $0x40] sm:$0xf]  ;;  %v5488_v63 = vld [vmem:[#allocation2 + $0x48] sm:$0xf]  ;;  %v6898_v59 = vpop.f32.mrb[28].mxu0 }
 0x136   : > { %v2121_v16 = vshll.u32 %v6848_v8, 16  ;;  %1144 = vst [vmem:[#allocation2 + $0x54] sm:$0xf] %v1143_v50  ;;  %1152 = vst.msk [vmem:[#allocation2 + $0x64] sm:$0xf] %vm253_vm1, %v908_v27  ;;  %v890_v42 = vor.u32 %v888_v3, %v887_v24  ;;  %v892_v54 = vrot.slane %v887_v24, 4  ;;  %v2605_v33 = vsel %vm1544_vm5, %v2600_v4, %v2604_v57 }
 0x137   : > { %2382 = vrot.lane.b32.xlu0 %v2338_v37, %s6340_s9  ;;  %1155 = vst [vmem:[#allocation2 + $0x68] sm:$0x1] %v1154_v25  ;;  %v2345_v55 = vrot.slane %v5629_v31, 1  ;;  %v2346_v38 = vrot.slane %v6870_v22, 1  ;;  %v2088_v37 = vor.u32 %v2087_v15, %v2083_v60  ;;  %v2092_v39 = vrot.slane %v2090_v58, 1  ;;  %v6914_v7 = vpop.f32.mrb[29].mxu0 }
 0x138   : > { %1988 = vrot.lane.b32.xlu1 %v6848_v8, %s6339_s8  ;;  %v891_v36 = vsel %vm6575_vm10, %v883_v19, %v890_v42  ;;  %v1147_v41 = vsel %vm6581_vm11, %v892_v54, %v1146_v30  ;;  %v2609_v31 = vshll.u32 %v6878_v0, 16  ;;  %v1226_v51 = vld [vmem:[#allocation2 + $0x3c] sm:$0xf]  ;;  %v6903_v20 = vld [vmem:[#allocation2 + $0x44] ss:$0 sps:$4 sm:$0x11]   ;;  %v5581_v4 = vcombine.low %v1269_v10, %v1227_v62 }
 0x139   : > { %1145 = vst.msk [vmem:[#allocation2 + $0x58] sm:$0xf] %vm253_vm1, %v891_v36  ;;  %1148 = vst [vmem:[#allocation2 + $0x5c] sm:$0x1] %v1147_v41  ;;  %v5489_v52 = vld [vmem:[#allocation2 + $0x4c] sm:$0xf]  ;;  %v6912_v9 = vcombine.low %v1228_v32, %v6892_v35  ;;  %v2347_v24 = vsel %vm1817_vm4, %v2345_v55, %v2346_v38  ;;  %v2093_v15 = vsel %vm1544_vm5, %v2088_v37, %v2092_v39 }
 0x13a   : > { %v5424_v56 = vld [vmem:[#allocation2 + $0x3c] sm:$0xf]  ;;  %v2119_v48 = vshrl.u32 %v6848_v8, 16  ;;  %v2123_v57 = vrot.slane %v2121_v16, 1  ;;  %v2126_v40 = vshll.u32 %v6870_v22, 16  ;;  %v5676_v8 = vcombine.low %v5532_v43, %v5489_v52  ;;  %v6924_v22 = vpop.f32.mrb[30].mxu0 }
 0x13b   : > { %2766 = vrot.lane.b32.xlu0 %v2605_v33, %s6343_s12  ;;  %v6909_v3 = vld [vmem:[#allocation2 + $0x40] sm:$0xf]  ;;  %8120 = vst [vmem:[#allocation6_spill] sm:$0xff] %v6912_v9  ;;  %v6916_v12 = vld [vmem:[#allocation2 + $0x50] ss:$0 sps:$4 sm:$0x11]   ;;  %v6928_v25 = vcombine.low %v5488_v63, %v5489_v52  ;;  %v6934_v54 = vcombine.low %v1226_v51, %v1227_v62 }
 0x13c   : > { %2496 = vrot.lane.b32.xlu1 %v6878_v0, %s6336_s28  ;;  %v6918_v60 = vld [vmem:[#allocation2 + $0x44] ss:$0 sps:$4 sm:$0x11]   ;;  %v5531_v19 = vld [vmem:[#allocation2 + $0x3c] sm:$0xe]  ;;  %v1833_v50 = vrot.slane %v5581_v4, 1  ;;  %v2124_v10 = vor.u32 %v2123_v57, %v2119_v48  ;;  %v6939_v38 = vcombine.low %v5424_v56, %v6909_v3 }
 0x13d   : > { %v6922_v58 = vld [vmem:[#allocation2 + $0x50] ss:$0 sps:$4 sm:$0x11]   ;;  %v1834_v27 = vrot.slane %v6903_v20, 1  ;;  %v1620_v30 = vshll.u32 %v6912_v9, 16  ;;  %v6931_v42 = vpop.f32.mrb[31].mxu0  ;;  %v5675_v39 = vcombine.low %v5531_v19, %v6868_v6 }
 0x13e   : > { %v1270_v16 = vld [vmem:[#allocation2 + $0x48] sm:$0xe]  ;;  %8121 = vst [vmem:[#allocation7_spill] sm:$0xff] %v6934_v54  ;;  %v2128_v33 = vrot.slane %v2126_v40, 1  ;;  %v6936_v55 = vld [vmem:[#allocation2 + $0x3c] sm:$0xe] }
 0x13f   : > { %2254 = vrot.lane.b32.xlu0 %v2093_v15, %s6342_s11  ;;  %v1625_v32 = vshll.u32 %v6916_v12, 16  ;;  %v2607_v36 = vshrl.u32 %v6878_v0, 16  ;;  %v2611_v41 = vrot.slane %v2609_v31, 1  ;;  %v2614_v37 = vshll.u32 %v6918_v60, 16  ;;  %v5430_v19 = vld [vmem:[#allocation2 + $0x60] sm:$0xf] }
 0x140   : > { %2388 = vrot.lane.b32.xlu1 %v2347_v24, %s6340_s9  ;;  %v2854_v63 = vrot.slane %v5676_v8, 1  ;;  %v2855_v62 = vrot.slane %v6922_v58, 1  ;;  %v5582_v43 = vcombine.low %v1270_v16, %v6892_v35  ;;  %v1835_v51 = vsel %vm1817_vm4, %v1833_v50, %v1834_v27  ;;  %v6961_v24 = vld [vmem:[%s8097_s2] ss:$0 sm:$0xff] }
 0x141   : > { %v2621_v4 = vshll.u32 %v6928_v25, 16  ;;  %v1618_v52 = vshrl.u32 %v6912_v9, 16  ;;  %v1622_v0 = vrot.slane %v1620_v30, 1  ;;  %v2129_v31 = vsel %vm1544_vm5, %v2124_v10, %v2128_v33  ;;  %v6968_v30 = vld [vmem:[#allocation2 + $0x64] sm:$0xf] }
 0x142   : > { %v2109_v6 = vshll.u32 %v6939_v38, 16  ;;  %v5628_v56 = vcombine.low %v6936_v55, %v6909_v3  ;;  %v1608_v35 = vshll.u32 %v6934_v54, 16  ;;  %v1627_v48 = vrot.slane %v1625_v32, 1 }
 0x143   : > { %2498 = vrot.lane.b32.xlu0 %v6928_v25, %s6336_s28  ;;  %v2612_v57 = vor.u32 %v2611_v41, %v2607_v36  ;;  %v2616_v40 = vrot.slane %v2614_v37, 1  ;;  %v589_v15 = vadd.f32 %v6961_v24, %v6702_v53  ;;  %v2856_v8 = vsel %vm1817_vm4, %v2854_v63, %v2855_v62 }
 0x144   : > { %1876 = vrot.lane.b32.xlu1 %v1835_v51, %s6337_s29  ;;  %v1836_v50 = vrot.slane %v5582_v43, 1  ;;  %v1837_v27 = vrot.slane %v6916_v12, 1  ;;  %v1606_v3 = vshrl.u32 %v6934_v54, 16  ;;  %v1623_v16 = vor.u32 %v1622_v0, %v1618_v52 }
 0x145   : > { %v1613_v10 = vshll.u32 %v6903_v20, 16  ;;  %v2851_v33 = vrot.slane %v5675_v39, 1  ;;  %v661_v55 = vmax.f32 %v589_v15, 0.0  ;;  %v1610_v53 = vrot.slane %v1608_v35, 1 }
 0x146   : > { %v581_v32 = vadd.f32 %v6961_v24, %v6709_v14  ;;  %v592_v12 = vadd.f32 %v6961_v24, %v6722_v13  ;;  %v584_v36 = vadd.f32 %v6961_v24, %v6739_v23  ;;  %v2617_v41 = vsel %vm1544_vm5, %v2612_v57, %v2616_v40 }
 0x147   : > { %1986 = vrot.lane.b32.xlu0 %v6939_v38, %s6339_s8  ;;  %v2852_v37 = vrot.slane %v6918_v60, 1  ;;  %v6983_v20 = vcombine.low %v5430_v19, %v6968_v30  ;;  %v5922_v39 = vpack.c.bf16 %v661_v55, %v661_v55  ;;  %v1838_v63 = vsel %vm1817_vm4, %v1836_v50, %v1837_v27  ;;  %v6989_v60 = vld [vmem:[#allocation2 + $0x44] ss:$0 sps:$4 sm:$0x11]  }
 0x148   : > { %2260 = vrot.lane.b32.xlu1 %v2129_v31, %s6342_s11  ;;  %v659_v62 = vmax.f32 %v581_v32, 0.0  ;;  %v662_v43 = vmax.f32 %v592_v12, 0.0  ;;  %v660_v51 = vmax.f32 %v584_v36, 0.0  ;;  %v1628_v14 = vsel %vm1544_vm5, %v1623_v16, %v1627_v48  ;;  %v1163_v31 = vld [vmem:[#allocation2 + $0x78] sm:$0xf] }
 0x149   : > { %v1615_v13 = vrot.slane %v1613_v10, 1  ;;  %v928_v52 = vshrl.u32 %v5922_v39, 16  ;;  %v931_v23 = vshll.u32 %v5922_v39, 16  ;;  %v1611_v0 = vor.u32 %v1610_v53, %v1606_v3 }
 0x14a   : > { %v5920_v35 = vpack.c.bf16 %v659_v62, %v659_v62  ;;  %v5923_v57 = vpack.c.bf16 %v662_v43, %v662_v43  ;;  %v5921_v40 = vpack.c.bf16 %v660_v51, %v660_v51  ;;  %v2853_v19 = vsel %vm1817_vm4, %v2851_v33, %v2852_v37  ;;  %v1156_v62 = vld [vmem:[#allocation2 + $0x6c] sm:$0xf] }
 0x14b   : > { %2898 = vrot.lane.b32.xlu0 %v2856_v8, %s6341_s10  ;;  %v930_v15 = vrot.slane %v928_v52, 7  ;;  %v2619_v50 = vshrl.u32 %v6928_v25, 16  ;;  %v2623_v48 = vrot.slane %v2621_v4, 1  ;;  %v2626_v3 = vshll.u32 %v6922_v58, 16 }
 0x14c   : > { %1749 = vrot.lane.b32.xlu1 %v1628_v14, %s6338_s30  ;;  %v911_v27 = vshrl.u32 %v5920_v35, 16  ;;  %v914_v8 = vshll.u32 %v5920_v35, 16  ;;  %v936_v16 = vshrl.u32 %v5923_v57, 16  ;;  %v939_v10 = vshll.u32 %v5923_v57, 16 }
 0x14d   : > { %v933_v55 = vor.u32 %v931_v23, %v930_v15  ;;  %v919_v53 = vshrl.u32 %v5921_v40, 16  ;;  %v922_v32 = vshll.u32 %v5921_v40, 16  ;;  %v2342_v12 = vrot.slane %v5628_v56, 1 }
 0x14e   : > { %v934_v36 = vrot.slane %v930_v15, 4  ;;  %v913_v33 = vrot.slane %v911_v27, 7  ;;  %v938_v37 = vrot.slane %v936_v16, 7  ;;  %v1616_v25 = vsel %vm1544_vm5, %v1611_v0, %v1615_v13  ;;  %v5471_v0 = vld [vmem:[#allocation2 + $0x60] sm:$0xe] }
 0x14f   : > { %1878 = vrot.lane.b32.xlu0 %v1838_v63, %s6337_s29  ;;  %v2343_v4 = vrot.slane %v6989_v60, 1  ;;  %v1164_v39 = vsel %vm6568_vm9, %v933_v55, %v1163_v31  ;;  %v1167_v63 = vld [vmem:[#allocation2 + $0x80] sm:$0x1]  ;;  %v921_v43 = vrot.slane %v919_v53, 7  ;;  %v2624_v56 = vor.u32 %v2623_v48, %v2619_v50  ;;  %v7019_v53 = vld [vmem:[#allocation2 + $0x58] sm:$0xf] }
 0x150   : > { %2768 = vrot.lane.b32.xlu1 %v2617_v41, %s6343_s12  ;;  %1165 = vst [vmem:[#allocation2 + $0x78] sm:$0xf] %v1164_v39  ;;  %v916_v58 = vor.u32 %v914_v8, %v913_v33  ;;  %v917_v51 = vrot.slane %v913_v33, 4  ;;  %v941_v14 = vor.u32 %v939_v10, %v938_v37  ;;  %v943_v52 = vrot.slane %v938_v37, 4  ;;  %v1160_v41 = vld [vmem:[#allocation2 + $0x74] sm:$0x1] }
 0x151   : > { %v2628_v23 = vrot.slane %v2626_v3, 1  ;;  %v924_v35 = vor.u32 %v922_v32, %v921_v43  ;;  %v926_v13 = vrot.slane %v921_v43, 4  ;;  %v6220_v15 = vld [vmem:[#allocation2 + $0x68] ss:$0 sps:$4 sm:$0x11]   ;;  %v2107_v27 = vshrl.u32 %v6939_v38, 16 }
 0x152   : > { %v1157_v31 = vsel %vm6568_vm9, %v916_v58, %v1156_v62  ;;  %v942_v57 = vsel %vm6575_vm10, %v934_v36, %v941_v14  ;;  %v1168_v40 = vsel %vm6581_vm11, %v943_v52, %v1167_v63  ;;  %v2111_v8 = vrot.slane %v2109_v6, 1  ;;  %v1271_v10 = vld [vmem:[#allocation2 + $0x54] sm:$0xe]  ;;  %v7022_v32 = vld [vmem:[#allocation2 + $0x5c] ss:$0 sps:$4 sm:$0x11]  }
 0x153   : > { %2896 = vrot.lane.b32.xlu0 %v2853_v19, %s6341_s10  ;;  %v5490_v19 = vld [vmem:[#allocation2 + $0x54] sm:$0xf]  ;;  %1158 = vst [vmem:[#allocation2 + $0x6c] sm:$0xf] %v1157_v31  ;;  %1166 = vst.msk [vmem:[#allocation2 + $0x7c] sm:$0xf] %vm253_vm1, %v942_v57  ;;  %v925_v50 = vsel %vm6575_vm10, %v917_v51, %v924_v35  ;;  %v1161_v48 = vsel %vm6581_vm11, %v926_v13, %v1160_v41  ;;  %v2344_v3 = vsel %vm1817_vm4, %v2342_v12, %v2343_v4 }
 0x154   : > { %1747 = vrot.lane.b32.xlu1 %v1616_v25, %s6338_s30  ;;  %1169 = vst [vmem:[#allocation2 + $0x80] sm:$0x1] %v1168_v40  ;;  %v2114_v16 = vshll.u32 %v6989_v60, 16  ;;  %v2145_v55 = vshll.u32 %v6983_v20, 16  ;;  %1159 = vst.msk [vmem:[#allocation2 + $0x70] sm:$0xf] %vm253_vm1, %v925_v50  ;;  %v5631_v36 = vcombine.low %v5471_v0, %v6968_v30  ;;  %v7031_v39 = vcombine.low %v5490_v19, %v7019_v53 }
 0x155   : > { %1162 = vst [vmem:[#allocation2 + $0x74] sm:$0x1] %v1161_v48  ;;  %v1231_v38 = vld [vmem:[#allocation2 + $0x58] sm:$0xf]  ;;  %v5492_v6 = vld [vmem:[#allocation2 + $0x60] sm:$0xf]  ;;  %v2629_v62 = vsel %vm1544_vm5, %v2624_v56, %v2628_v23  ;;  %v2112_v30 = vor.u32 %v2111_v8, %v2107_v27 }
 0x156   : > { %v1232_v33 = vld [vmem:[#allocation2 + $0x60] sm:$0xf]  ;;  %v7026_v60 = vld [vmem:[#allocation2 + $0x64] sm:$0xf]  ;;  %v5583_v12 = vcombine.low %v1271_v10, %v1231_v38  ;;  %v5428_v4 = vld [vmem:[#allocation2 + $0x54] sm:$0xf] }
 0x157   : > { %2386 = vrot.lane.b32.xlu0 %v2344_v3, %s6340_s9  ;;  %v5493_v37 = vld [vmem:[#allocation2 + $0x64] sm:$0xf]  ;;  %v5534_v25 = vld [vmem:[#allocation2 + $0x60] sm:$0xe]  ;;  %v2116_v63 = vrot.slane %v2114_v16, 1  ;;  %v2143_v14 = vshrl.u32 %v6983_v20, 16  ;;  %v7042_v35 = vcombine.low %v1232_v33, %v7026_v60 }
 0x158   : > { %1992 = vrot.lane.b32.xlu1 %v6983_v20, %s6339_s8  ;;  %v7034_v43 = vld [vmem:[#allocation2 + $0x58] sm:$0xf]  ;;  %v7036_v58 = vld [vmem:[#allocation2 + $0x68] ss:$0 sps:$4 sm:$0x11]   ;;  %v2147_v52 = vrot.slane %v2145_v55, 1  ;;  %v5678_v56 = vcombine.low %v5534_v25, %v5493_v37  ;;  %v7050_v20 = vcombine.low %v5492_v6, %v5493_v37 }
 0x159   : > { %v7038_v51 = vld [vmem:[#allocation2 + $0x54] sm:$0xe]  ;;  %v2150_v41 = vshll.u32 %v6220_v15, 16  ;;  %8122 = vst [vmem:[#allocation8_spill] sm:$0xff] %v7042_v35  ;;  %v2351_v13 = vrot.slane %v5631_v36, 1  ;;  %v2352_v0 = vrot.slane %v6220_v15, 1  ;;  %v7053_v27 = vcombine.low %v5428_v4, %v7034_v43 }
 0x15a   : > { %v7045_v23 = vld [vmem:[#allocation2 + $0x68] ss:$0 sps:$4 sm:$0x11]   ;;  %v1230_v31 = vld [vmem:[#allocation2 + $0x54] sm:$0xf]  ;;  %v1839_v57 = vrot.slane %v5583_v12, 1  ;;  %v5677_v15 = vcombine.low %v7038_v51, %v7019_v53  ;;  %v2117_v8 = vsel %vm1544_vm5, %v2112_v30, %v2116_v63  ;;  %v2148_v16 = vor.u32 %v2147_v52, %v2143_v14 }
 0x15b   : > { %2770 = vrot.lane.b32.xlu0 %v2629_v62, %s6343_s12  ;;  %v1840_v40 = vrot.slane %v7022_v32, 1  ;;  %v2633_v19 = vshll.u32 %v7031_v39, 16  ;;  %v7058_v50 = vld [vmem:[#allocation2 + $0x54] sm:$0xe]  ;;  %v1649_v48 = vshll.u32 %v7036_v58, 16  ;;  %v2152_v10 = vrot.slane %v2150_v41, 1 }
 0x15c   : > { %2500 = vrot.lane.b32.xlu1 %v7031_v39, %s6336_s28  ;;  %v1644_v55 = vshll.u32 %v7042_v35, 16  ;;  %v7063_v3 = vld [vmem:[#allocation2 + $0x5c] ss:$0 sps:$4 sm:$0x11]   ;;  %v2353_v36 = vsel %vm1817_vm4, %v2351_v13, %v2352_v0  ;;  %v7067_v6 = vcombine.low %v1230_v31, %v1231_v38  ;;  %v2860_v33 = vrot.slane %v5678_v56, 1 }
 0x15d   : > { %v2861_v12 = vrot.slane %v7045_v23, 1  ;;  %v1841_v37 = vsel %vm1817_vm4, %v1839_v57, %v1840_v40  ;;  %v5630_v62 = vcombine.low %v7058_v50, %v7034_v43  ;;  %v1272_v30 = vld [vmem:[#allocation2 + $0x60] sm:$0xe]  ;;  %v1642_v63 = vshrl.u32 %v7042_v35, 16  ;;  %v1181_v25 = vld [vmem:[#allocation2 + $0x98] sm:$0x1] }
 0x15e   : > { %8123 = vst [vmem:[#allocation9_spill] sm:$0xff] %v7067_v6  ;;  %v1651_v14 = vrot.slane %v1649_v48, 1  ;;  %v2631_v38 = vshrl.u32 %v7031_v39, 16  ;;  %v605_v52 = vadd.f32 %v6961_v24, %v6747_v29  ;;  %v2153_v41 = vsel %vm1544_vm5, %v2148_v16, %v2152_v10 }
 0x15f   : > { %2258 = vrot.lane.b32.xlu0 %v2117_v8, %s6342_s11  ;;  %v1646_v13 = vrot.slane %v1644_v55, 1  ;;  %v2635_v0 = vrot.slane %v2633_v19, 1  ;;  %v2638_v56 = vshll.u32 %v7063_v3, 16  ;;  %v2862_v31 = vsel %vm1817_vm4, %v2860_v33, %v2861_v12 }
 0x160   : > { %2392 = vrot.lane.b32.xlu1 %v2353_v36, %s6340_s9  ;;  %v665_v57 = vmax.f32 %v605_v52, 0.0  ;;  %v597_v40 = vadd.f32 %v6961_v24, %v6751_v34  ;;  %v608_v39 = vadd.f32 %v6961_v24, %v6755_v61  ;;  %v5584_v29 = vcombine.low %v1272_v30, %v7026_v60 }
 0x161   : > { %v1843_v19 = vrot.slane %v7036_v58, 1  ;;  %v1632_v48 = vshll.u32 %v7067_v6, 16  ;;  %v600_v8 = vadd.f32 %v6961_v24, %v6762_v18  ;;  %v1630_v16 = vshrl.u32 %v7067_v6, 16 }
 0x162   : > { %v5926_v10 = vpack.c.bf16 %v665_v57, %v665_v57  ;;  %v663_v55 = vmax.f32 %v597_v40, 0.0  ;;  %v666_v36 = vmax.f32 %v608_v39, 0.0  ;;  %v1647_v34 = vor.u32 %v1646_v13, %v1642_v63  ;;  %v1177_v57 = vld [vmem:[#allocation2 + $0x90] sm:$0xf] }
 0x163   : > { %2502 = vrot.lane.b32.xlu0 %v7050_v20, %s6336_s28  ;;  %v2636_v33 = vor.u32 %v2635_v0, %v2631_v38  ;;  %v2640_v12 = vrot.slane %v2638_v56, 1  ;;  %v664_v61 = vmax.f32 %v600_v8, 0.0  ;;  %v1842_v52 = vrot.slane %v5584_v29, 1  ;;  %v7101_v56 = vpop.permute.xlu1 %2520  ;;  %v1170_v8 = vld [vmem:[#allocation2 + $0x84] sm:$0xf] }
 0x164   : > { %1880 = vrot.lane.b32.xlu1 %v1841_v37, %s6337_s29  ;;  %v962_v60 = vshrl.u32 %v5926_v10, 16  ;;  %v965_v37 = vshll.u32 %v5926_v10, 16  ;;  %v5924_v58 = vpack.c.bf16 %v663_v55, %v663_v55  ;;  %v5927_v30 = vpack.c.bf16 %v666_v36, %v666_v36  ;;  %8124 = vst [vmem:[#allocation10_spill] sm:$0xff] %v7101_v56 }
 0x165   : > { %v1634_v18 = vrot.slane %v1632_v48, 1  ;;  %v1637_v4 = vshll.u32 %v7022_v32, 16  ;;  %v5925_v40 = vpack.c.bf16 %v664_v61, %v664_v61  ;;  %v1652_v0 = vsel %vm1544_vm5, %v1647_v34, %v1651_v14 }
 0x166   : > { %v964_v39 = vrot.slane %v962_v60, 7  ;;  %v945_v63 = vshrl.u32 %v5924_v58, 16  ;;  %v948_v38 = vshll.u32 %v5924_v58, 16  ;;  %v970_v13 = vshrl.u32 %v5927_v30, 16 }
 0x167   : > { %1990 = vrot.lane.b32.xlu0 %v7053_v27, %s6339_s8  ;;  %v973_v10 = vshll.u32 %v5927_v30, 16  ;;  %v953_v55 = vshrl.u32 %v5925_v40, 16  ;;  %v956_v36 = vshll.u32 %v5925_v40, 16  ;;  %v2641_v61 = vsel %vm1544_vm5, %v2636_v33, %v2640_v12  ;;  %v7110_v58 = vld [vmem:[#allocation2 + $0x5c] ss:$0 sps:$4 sm:$0x11]  }
 0x168   : > { %2264 = vrot.lane.b32.xlu1 %v2153_v41, %s6342_s11  ;;  %v967_v41 = vor.u32 %v965_v37, %v964_v39  ;;  %v968_v29 = vrot.slane %v964_v39, 4  ;;  %v947_v48 = vrot.slane %v945_v63, 7  ;;  %v972_v32 = vrot.slane %v970_v13, 7  ;;  %v1174_v39 = vld [vmem:[#allocation2 + $0x8c] sm:$0x1] }
 0x169   : > { %v2857_v14 = vrot.slane %v5677_v15, 1  ;;  %v2858_v34 = vrot.slane %v7063_v3, 1  ;;  %v955_v60 = vrot.slane %v953_v55, 7  ;;  %v1844_v63 = vsel %vm1817_vm4, %v1842_v52, %v1843_v19  ;;  %v5434_v13 = vld [vmem:[#allocation2 + $0x78] sm:$0xf]  ;;  %v1738_v15 = vpop.permute.xlu0 %1737  ;;  %v7121_v19 = vpop.permute.xlu1 %1866 }
 0x16a   : > { %v950_v37 = vor.u32 %v948_v38, %v947_v48  ;;  %v951_v30 = vrot.slane %v947_v48, 4  ;;  %v975_v40 = vor.u32 %v973_v10, %v972_v32  ;;  %v5435_v33 = vld [vmem:[#allocation2 + $0x7c] sm:$0xf]  ;;  %v977_v12 = vrot.slane %v972_v32, 4  ;;  %v5473_v52 = vld [vmem:[#allocation2 + $0x78] sm:$0xe] }
 0x16b   : > { %2902 = vrot.lane.b32.xlu0 %v2862_v31, %s6341_s10  ;;  %v1178_v31 = vsel %vm6568_vm9, %v967_v41, %v1177_v57  ;;  %v958_v53 = vor.u32 %v956_v36, %v955_v60  ;;  %v960_v51 = vrot.slane %v955_v60, 4  ;;  %v1635_v3 = vor.u32 %v1634_v18, %v1630_v16  ;;  %v7137_v36 = vld [vmem:[#allocation2 + $0x80] ss:$0 sps:$4 sm:$0x11]  }
 0x16c   : > { %1753 = vrot.lane.b32.xlu1 %v1652_v0, %s6338_s30  ;;  %1179 = vst [vmem:[#allocation2 + $0x90] sm:$0xf] %v1178_v31  ;;  %v1639_v0 = vrot.slane %v1637_v4, 1  ;;  %v1171_v57 = vsel %vm6568_vm9, %v950_v37, %v1170_v8  ;;  %v976_v38 = vsel %vm6575_vm10, %v968_v29, %v975_v40  ;;  %v1182_v10 = vsel %vm6581_vm11, %v977_v12, %v1181_v25  ;;  %v1273_v25 = vld [vmem:[#allocation2 + $0x6c] sm:$0xe] }
 0x16d   : > { %1172 = vst [vmem:[#allocation2 + $0x84] sm:$0xf] %v1171_v57  ;;  %1180 = vst.msk [vmem:[#allocation2 + $0x94] sm:$0xf] %vm253_vm1, %v976_v38  ;;  %v959_v4 = vsel %vm6575_vm10, %v951_v30, %v958_v53  ;;  %v1175_v16 = vsel %vm6581_vm11, %v960_v51, %v1174_v39  ;;  %v2859_v18 = vsel %vm1817_vm4, %v2857_v14, %v2858_v34  ;;  %v2348_v55 = vrot.slane %v5630_v62, 1 }
 0x16e   : > { %v7131_v8 = vcombine.low %v5434_v13, %v5435_v33  ;;  %1183 = vst [vmem:[#allocation2 + $0x98] sm:$0x1] %v1182_v10  ;;  %1173 = vst.msk [vmem:[#allocation2 + $0x88] sm:$0xf] %vm253_vm1, %v959_v4  ;;  %v2349_v41 = vrot.slane %v7110_v58, 1  ;;  %v2643_v48 = vshrl.u32 %v7050_v20, 16  ;;  %v1640_v43 = vsel %vm1544_vm5, %v1635_v3, %v1639_v0 }
 0x16f   : > { %1882 = vrot.lane.b32.xlu0 %v1844_v63, %s6337_s29  ;;  %1176 = vst [vmem:[#allocation2 + $0x8c] sm:$0x1] %v1175_v16  ;;  %v5494_v29 = vld [vmem:[#allocation2 + $0x6c] sm:$0xf]  ;;  %v8125_v32 = vshll.u32 %v7050_v20, 16  ;;  %v2650_v14 = vshll.u32 %v7045_v23, 16  ;;  %v5633_v50 = vcombine.low %v5473_v52, %v5435_v33  ;;  %v2924_v38 = vsel %vm2922_vm12, %v6544_v21, %v1738_v15 }
 0x170   : > { %2772 = vrot.lane.b32.xlu1 %v2641_v61, %s6343_s12  ;;  %v7146_v62 = vld [vmem:[#allocation2 + $0x70] sm:$0xf]  ;;  %v2131_v34 = vshrl.u32 %v7053_v27, 16  ;;  %v8126_v60 = vshll.u32 %v7053_v27, 16  ;;  %v2138_v20 = vshll.u32 %v7110_v58, 16  ;;  %v2169_v13 = vshll.u32 %v7131_v8, 16 }
 0x171   : > { %v2647_v61 = vrot.slane %v8125_v32, 1  ;;  %v1235_v37 = vld [vmem:[#allocation2 + $0x70] sm:$0xf]  ;;  %v7153_v30 = vld [vmem:[#allocation2 + $0x74] ss:$0 sps:$4 sm:$0x11]   ;;  %v2350_v27 = vsel %vm1817_vm4, %v2348_v55, %v2349_v41  ;;  %v7166_v58 = vcombine.low %v5494_v29, %v7146_v62  ;;  %v621_v56 = vadd.f32 %v6961_v24, %v6805_v47 }
 0x172   : > { %v2135_v31 = vrot.slane %v8126_v60, 1  ;;  %v5585_v23 = vcombine.low %v1273_v25, %v1235_v37  ;;  %v5496_v40 = vld [vmem:[#allocation2 + $0x78] sm:$0xf]  ;;  %v7158_v12 = vld [vmem:[#allocation2 + $0x7c] sm:$0xf]  ;;  %v2652_v0 = vrot.slane %v2650_v14, 1  ;;  %v613_v47 = vadd.f32 %v6961_v24, %v6818_v49 }
 0x173   : > { %2900 = vrot.lane.b32.xlu0 %v2859_v18, %s6341_s10  ;;  %v5536_v39 = vld [vmem:[#allocation2 + $0x78] sm:$0xe]  ;;  %v7163_v51 = vld [vmem:[#allocation2 + $0x6c] sm:$0xe]  ;;  %v2648_v3 = vor.u32 %v2647_v61, %v2643_v48  ;;  %v5497_v57 = vld [vmem:[#allocation2 + $0x7c] sm:$0xf] }
 0x174   : > { %1751 = vrot.lane.b32.xlu1 %v1640_v43, %s6338_s30  ;;  %v1236_v33 = vld [vmem:[#allocation2 + $0x78] sm:$0xf]  ;;  %v2357_v52 = vrot.slane %v5633_v50, 1  ;;  %v2358_v10 = vrot.slane %v7137_v36, 1  ;;  %v2136_v4 = vor.u32 %v2135_v31, %v2131_v34  ;;  %v2140_v18 = vrot.slane %v2138_v20, 1 }
 0x175   : > { %v7155_v63 = vpop.permute.xlu0 %2490  ;;  %v7172_v16 = vld [vmem:[#allocation2 + $0x80] ss:$0 sps:$4 sm:$0x11]   ;;  %v1845_v55 = vrot.slane %v5585_v23, 1  ;;  %v5680_v25 = vcombine.low %v5536_v39, %v5497_v57  ;;  %v7177_v41 = vcombine.low %v1236_v33, %v7158_v12  ;;  %v1846_v15 = vrot.slane %v7153_v30, 1 }
 0x176   : > { %v7160_v53 = vpop.permute.xlu1 %1980  ;;  %v7179_v29 = vld [vmem:[#allocation2 + $0x80] ss:$0 sps:$4 sm:$0x11]   ;;  %v7184_v48 = vcombine.low %v5496_v40, %v5497_v57  ;;  %v2167_v32 = vshrl.u32 %v7131_v8, 16  ;;  %v2171_v61 = vrot.slane %v2169_v13, 1  ;;  %v2657_v43 = vshll.u32 %v7166_v58, 16 }
 0x177   : > { %2390 = vrot.lane.b32.xlu0 %v2350_v27, %s6340_s9  ;;  %8127 = vst [vmem:[#allocation11_spill] sm:$0xff] %v7177_v41  ;;  %v2653_v50 = vsel %vm1544_vm5, %v2648_v3, %v2652_v0  ;;  %v1234_v34 = vld [vmem:[#allocation2 + $0x6c] sm:$0xf]  ;;  %v2174_v60 = vshll.u32 %v7137_v36, 16  ;;  %v7194_v31 = vsel %vm429_vm2, %v2924_v38, %v7121_v19  ;;  %v7200_v40 = vld [vmem:[#allocation2 + $0x70] sm:$0xf]  ;;  %v2141_v36 = vsel %vm1544_vm5, %v2136_v4, %v2140_v18 }
 0x178   : > { %1996 = vrot.lane.b32.xlu1 %v7131_v8, %s6339_s8  ;;  %v2359_v8 = vsel %vm1817_vm4, %v2357_v52, %v2358_v10  ;;  %v5432_v23 = vld [vmem:[#allocation2 + $0x6c] sm:$0xf]  ;;  %v1673_v39 = vshll.u32 %v7172_v16, 16  ;;  %v1668_v19 = vshll.u32 %v7177_v41, 16  ;;  %v2866_v33 = vrot.slane %v5680_v25, 1 }
 0x179   : > { %v7181_v21 = vpop.permute.xlu0 %1978  ;;  %v7206_v13 = vld [vmem:[#allocation2 + $0x6c] sm:$0xe]  ;;  %v2867_v27 = vrot.slane %v7179_v29, 1  ;;  %v7212_v0 = vcombine.low %v1234_v34, %v1235_v37  ;;  %v1847_v57 = vsel %vm1817_vm4, %v1845_v55, %v1846_v15  ;;  %v2172_v52 = vor.u32 %v2171_v61, %v2167_v32  ;;  %v7216_v10 = vld [vmem:[#allocation2 + $0x74] ss:$0 sps:$4 sm:$0x11]  }
 0x17a   : > { %v7187_v14 = vpop.permute.xlu1 %2380  ;;  %v2176_v4 = vrot.slane %v2174_v60, 1  ;;  %v2655_v18 = vshrl.u32 %v7166_v58, 16  ;;  %v2659_v20 = vrot.slane %v2657_v43, 1  ;;  %v1274_v25 = vld [vmem:[#allocation2 + $0x78] sm:$0xe]  ;;  %v7225_v37 = vcombine.low %v5432_v23, %v7200_v40 }
 0x17b   : > { %2774 = vrot.lane.b32.xlu0 %v2653_v50, %s6343_s12  ;;  %8128 = vst [vmem:[#allocation12_spill] sm:$0xff] %v7212_v0  ;;  %v1666_v15 = vshrl.u32 %v7177_v41, 16  ;;  %v1675_v32 = vrot.slane %v1673_v39, 1  ;;  %v1670_v61 = vrot.slane %v1668_v19, 1  ;;  %v669_v43 = vmax.f32 %v621_v56, 0.0 }
 0x17c   : > { %2504 = vrot.lane.b32.xlu1 %v7166_v58, %s6336_s28  ;;  %v2868_v58 = vsel %vm1817_vm4, %v2866_v33, %v2867_v27  ;;  %v2662_v60 = vshll.u32 %v7216_v10, 16  ;;  %v5586_v23 = vcombine.low %v1274_v25, %v7158_v12  ;;  %v616_v39 = vadd.f32 %v6961_v24, %v6845_v5  ;;  %v7259_v55 = vld [vmem:[%s8098_s3 + $0x10] ss:$0 sps:$4 sm:$0x33]  }
 0x17d   : > { %v7210_v3 = vpop.permute.xlu0 %2890  ;;  %v2177_v19 = vsel %vm1544_vm5, %v2172_v52, %v2176_v4  ;;  %v7245_v56 = vor.u32 %v2659_v20, %v2655_v18  ;;  %v5930_v33 = vpack.c.bf16 %v669_v43, %v669_v43  ;;  %v667_v49 = vmax.f32 %v613_v47, 0.0  ;;  %6109 = vmatprep.subr.msk.bf16.mxu1 %vm3246_vm14, %v7259_v55 }
 0x17e   : > { %v7218_v50 = vpop.permute.xlu1 %1868  ;;  %v1656_v27 = vshll.u32 %v7212_v0, 16  ;;  %v668_v25 = vmax.f32 %v616_v39, 0.0  ;;  %v1671_v5 = vor.u32 %v1670_v61, %v1666_v15  ;;  %v7254_v4 = vrot.slane %v2662_v60, 1 }
 0x17f   : > { %2262 = vrot.lane.b32.xlu0 %v2141_v36, %s6342_s11  ;;  %v624_v36 = vadd.f32 %v6961_v24, %v6830_v44  ;;  %v996_v24 = vshrl.u32 %v5930_v33, 16  ;;  %v999_v38 = vshll.u32 %v5930_v33, 16  ;;  %v5928_v52 = vpack.c.bf16 %v667_v49, %v667_v49 }
 0x180   : > { %2396 = vrot.lane.b32.xlu1 %v2359_v8, %s6340_s9  ;;  %v1848_v18 = vrot.slane %v5586_v23, 1  ;;  %v5929_v47 = vpack.c.bf16 %v668_v25, %v668_v25  ;;  %v1661_v60 = vshll.u32 %v7153_v30, 16  ;;  %v1191_v23 = vld [vmem:[#allocation2 + $0xa8] sm:$0xf]  ;;  %v1676_v25 = vsel %vm1544_vm5, %v1671_v5, %v1675_v32 }
 0x181   : > { %v7234_v34 = vpop.permute.xlu0 %1870  ;;  %v670_v44 = vmax.f32 %v624_v36, 0.0  ;;  %v998_v15 = vrot.slane %v996_v24, 7  ;;  %v979_v61 = vshrl.u32 %v5928_v52, 16  ;;  %v982_v39 = vshll.u32 %v5928_v52, 16  ;;  %v1184_v52 = vld [vmem:[#allocation2 + $0x9c] sm:$0xf] }
 0x182   : > { %v7242_v8 = vpop.permute.xlu1 %2252  ;;  %v1658_v12 = vrot.slane %v1656_v27, 1  ;;  %v990_v26 = vshll.u32 %v5929_v47, 16 }
 0x183   : > { %2506 = vrot.lane.b32.xlu0 %v7184_v48, %s6336_s28  ;;  %v5931_v43 = vpack.c.bf16 %v670_v44, %v670_v44  ;;  %v987_v44 = vshrl.u32 %v5929_v47, 16  ;;  %v1001_v41 = vor.u32 %v999_v38, %v998_v15  ;;  %v981_v35 = vrot.slane %v979_v61, 7  ;;  %v7284_v61 = vld [vmem:[#allocation2 + $0x94] sm:$0xf] }
 0x184   : > { %1884 = vrot.lane.b32.xlu1 %v1847_v57, %s6337_s29  ;;  %v1654_v57 = vshrl.u32 %v7212_v0, 16  ;;  %v1002_v24 = vrot.slane %v998_v15, 4  ;;  %v2157_v47 = vshll.u32 %v7225_v37, 16  ;;  %v5438_v15 = vld [vmem:[#allocation2 + $0x90] sm:$0xf] }
 0x185   : > { %v7252_v20 = vpop.permute.xlu0 %2378  ;;  %v1004_v33 = vshrl.u32 %v5931_v43, 16  ;;  %v1007_v49 = vshll.u32 %v5931_v43, 16  ;;  %v989_v9 = vrot.slane %v987_v44, 7  ;;  %v1192_v30 = vsel %vm6568_vm9, %v1001_v41, %v1191_v23 }
 0x186   : > { %v7261_v36 = vpop.permute.xlu1 %1741  ;;  %v984_v43 = vor.u32 %v982_v39, %v981_v35  ;;  %v985_v46 = vrot.slane %v981_v35, 4  ;;  %1193 = vst [vmem:[#allocation2 + $0xa8] sm:$0xf] %v1192_v30  ;;  %v7280_v35 = vld [vmem:[#allocation2 + $0x74] ss:$0 sps:$4 sm:$0x11]   ;;  %v2990_v23 = vsel %vm2988_vm13, %v7194_v31, %v7181_v21  ;;  %v7318_v31 = vcombine.low %v5438_v15, %v7284_v61 }
 0x187   : > { %1994 = vrot.lane.b32.xlu0 %v7225_v37, %s6339_s8  ;;  %v1006_v6 = vrot.slane %v1004_v33, 7  ;;  %v992_v27 = vor.u32 %v990_v26, %v989_v9  ;;  %v994_v5 = vrot.slane %v989_v9, 4  ;;  %v5475_v21 = vld [vmem:[#allocation2 + $0x90] sm:$0xe] }
 0x188   : > { %2268 = vrot.lane.b32.xlu1 %v2177_v19, %s6342_s11  ;;  %v1195_v19 = vld [vmem:[#allocation2 + $0xb0] sm:$0x1]  ;;  %v1185_v41 = vsel %vm6568_vm9, %v984_v43, %v1184_v52  ;;  %v2864_v52 = vrot.slane %v7216_v10, 1  ;;  %v8131_v10 = vcombine.low %v7206_v13, %v7200_v40  ;;  %v5635_v40 = vcombine.low %v5475_v21, %v7284_v61  ;;  %v5498_v13 = vld [vmem:[#allocation2 + $0x84] sm:$0xf] }
 0x189   : > { %v7269_v0 = vpop.permute.xlu0 %2762  ;;  %v1009_v38 = vor.u32 %v1007_v49, %v1006_v6  ;;  %v1011_v32 = vrot.slane %v1006_v6, 4  ;;  %1186 = vst [vmem:[#allocation2 + $0x9c] sm:$0xf] %v1185_v41  ;;  %v993_v6 = vsel %vm6575_vm10, %v985_v46, %v992_v27  ;;  %v1189_v39 = vsel %vm6581_vm11, %v994_v5, %v1188_v28  ;;  %v7346_v41 = vld [vmem:[#allocation2 + $0x88] sm:$0xf] }
 0x18a   : > { %v7271_v54 = vpop.permute.xlu1 %1984  ;;  %v8129_v49 = vrot.slane %v7172_v16, 1  ;;  %1187 = vst.msk [vmem:[#allocation2 + $0xa0] sm:$0xf] %vm253_vm1, %v993_v6  ;;  %1190 = vst [vmem:[#allocation2 + $0xa4] sm:$0x1] %v1189_v39  ;;  %v2665_v28 = vsel %vm1544_vm5, %v7245_v56, %v7254_v4  ;;  %v1659_v46 = vor.u32 %v1658_v12, %v1654_v57  ;;  %v1663_v16 = vrot.slane %v1661_v60, 1 }
 0x18b   : > { %2906 = vrot.lane.b32.xlu0 %v2868_v58, %s6341_s10  ;;  %v1010_v26 = vsel %vm6575_vm10, %v1002_v24, %v1009_v38  ;;  %v1196_v9 = vsel %vm6581_vm11, %v1011_v32, %v1195_v19  ;;  %v2354_v56 = vrot.slane %v8131_v10, 1  ;;  %v2355_v4 = vrot.slane %v7280_v35, 1  ;;  %v6258_v32 = vld [vmem:[#allocation2 + $0x98] ss:$0 sps:$4 sm:$0x11]  }
 0x18c   : > { %1757 = vrot.lane.b32.xlu1 %v1676_v25, %s6338_s30  ;;  %v1850_v44 = vsel %vm1817_vm4, %v1848_v18, %v8129_v49  ;;  %v8130_v25 = vcombine.low %v7163_v51, %v7146_v62  ;;  %1194 = vst.msk [vmem:[#allocation2 + $0xac] sm:$0xf] %vm253_vm1, %v1010_v26  ;;  %1197 = vst [vmem:[#allocation2 + $0xb0] sm:$0x1] %v1196_v9  ;;  %v3248_v62 = vsel %vm3246_vm14, %v7259_v55, 0  ;;  %v2667_v18 = vshrl.u32 %v7184_v48, 16 }
 0x18d   : > { %v1740_v58 = vpop.permute.xlu0 %1739  ;;  %6075 = vmatpush3.bf16.msra.mxu1 %v3248_v62  ;;  %v8132_v55 = vshll.u32 %v7184_v48, 16  ;;  %v1664_v48 = vsel %vm1544_vm5, %v1659_v46, %v1663_v16  ;;  %v2193_v27 = vshll.u32 %v7318_v31, 16  ;;  %v2356_v5 = vsel %vm1817_vm4, %v2354_v56, %v2355_v4  ;;  %v7353_v6 = vld [vmem:[#allocation2 + $0x8c] ss:$0 sps:$4 sm:$0x11]  }
 0x18e   : > { %v7297_v33 = vpop.permute.xlu1 %2492  ;;  %v2863_v24 = vrot.slane %v8130_v25, 1  ;;  %v2926_v51 = vsel %vm2922_vm12, %v6687_v45, %v1740_v58  ;;  %v2674_v45 = vshll.u32 %v7179_v29, 16  ;;  %v7339_v29 = vld [vmem:[#allocation2 + $0x88] sm:$0xf]  ;;  %v2155_v9 = vshrl.u32 %v7225_v37, 16 }
 0x18f   : > { %1886 = vrot.lane.b32.xlu0 %v1850_v44, %s6337_s29  ;;  %v2671_v57 = vrot.slane %v8132_v55, 1  ;;  %v2959_v19 = vsel %vm429_vm2, %v2926_v51, %v7218_v50  ;;  %v2159_v49 = vrot.slane %v2157_v47, 1  ;;  %v2162_v44 = vshll.u32 %v7280_v35, 16  ;;  %v1240_v25 = vld [vmem:[#allocation2 + $0x90] sm:$0xf] }
 0x190   : > { %2776 = vrot.lane.b32.xlu1 %v2665_v28, %s6343_s12  ;;  %v2865_v43 = vsel %vm1817_vm4, %v2863_v24, %v2864_v52  ;;  %v2676_v26 = vrot.slane %v2674_v45, 1  ;;  %v2992_v39 = vsel %vm2988_vm13, %v2959_v19, %v7160_v53  ;;  %v7364_v24 = vld [vmem:[#allocation2 + $0x94] sm:$0xf]  ;;  %v7368_v52 = vld [vmem:[#allocation2 + $0x84] sm:$0xe]  ;;  %v7371_v53 = vcombine.low %v5498_v13, %v7339_v29 }
 0x191   : > { %v2251_v12 = vpop.permute.xlu0 %2250  ;;  %v2672_v61 = vor.u32 %v2671_v57, %v2667_v18  ;;  %v5538_v28 = vld [vmem:[#allocation2 + $0x90] sm:$0xe]  ;;  %v2928_v37 = vsel %vm2922_vm12, %v6657_v2, %v7261_v36  ;;  %v2363_v47 = vrot.slane %v5635_v40, 1  ;;  %v2364_v35 = vrot.slane %v6258_v32, 1  ;;  %v5501_v46 = vld [vmem:[#allocation2 + $0x94] sm:$0xf] }
 0x192   : > { %v7328_v60 = vpop.permute.xlu1 %2384  ;;  %v3023_v30 = vsel %vm3021_vm15, %v2990_v23, %v2251_v12  ;;  %v2191_v16 = vshrl.u32 %v7318_v31, 16  ;;  %v3025_v62 = vsel %vm3021_vm15, %v2992_v39, %v7242_v8  ;;  %v2195_v51 = vrot.slane %v2193_v27, 1  ;;  %v7387_v4 = vld [vmem:[#allocation2 + $0x98] ss:$0 sps:$4 sm:$0x11]  }
 0x193   : > { %v3056_v38 = vsel %vm3054_vm0, %v3023_v30, %v7252_v20  ;;  %2904 = vrot.lane.b32.xlu0 %v2865_v43, %s6341_s10  ;;  %v1275_v20 = vld [vmem:[#allocation2 + $0x84] sm:$0xe]  ;;  %v2198_v10 = vshll.u32 %v6258_v32, 16  ;;  %v7385_v56 = vcombine.low %v1240_v25, %v7364_v24  ;;  %v2677_v36 = vsel %vm1544_vm5, %v2672_v61, %v2676_v26  ;;  %v7432_v25 = vld [vmem:[#allocation2 + $0x8c] ss:$0 sps:$4 sm:$0x11]  }
 0x194   : > { %1755 = vrot.lane.b32.xlu1 %v1664_v48, %s6338_s30  ;;  %v3089_v50 = vsel %vm3087_vm3, %v3056_v38, %v7155_v63  ;;  %v2160_v12 = vor.u32 %v2159_v49, %v2155_v9  ;;  %v2164_v18 = vrot.slane %v2162_v44, 1  ;;  %v5682_v55 = vcombine.low %v5538_v28, %v5501_v46  ;;  %v1238_v38 = vld [vmem:[#allocation2 + $0x84] sm:$0xf] }
 0x195   : > { %v7348_v58 = vpop.permute.xlu0 %2494  ;;  %v3122_v15 = vsel %vm3120_vm6, %v3089_v50, %v7269_v0  ;;  %v5500_v0 = vld [vmem:[#allocation2 + $0x90] sm:$0xf]  ;;  %v5681_v57 = vcombine.low %v7368_v52, %v7339_v29  ;;  %v1852_v45 = vrot.slane %v7353_v6, 1  ;;  %v7402_v43 = vsel %vm429_vm2, %v2928_v37, %v7234_v34  ;;  %v5436_v48 = vld [vmem:[#allocation2 + $0x84] sm:$0xf] }
 0x196   : > { %v7357_v23 = vpop.permute.xlu1 %1872  ;;  %v3155_v63 = vsel %vm3153_vm7, %v3122_v15, %v7210_v3  ;;  %v5587_v3 = vcombine.low %v1275_v20, %v7346_v41  ;;  %v7398_v30 = vcombine.low %v5500_v0, %v5501_v46  ;;  %v2681_v40 = vshll.u32 %v7371_v53, 16  ;;  %v7412_v50 = vld [vmem:[#allocation2 + $0x88] sm:$0xf]  ;;  %v7414_v34 = vld [vmem:[#allocation2 + $0x84] sm:$0xe] }
 0x197   : > { %2394 = vrot.lane.b32.xlu0 %v2356_v5, %s6340_s9  ;;  %6076 = vmatprep.mubr.msk.bf16.mxu1 %vm3213_vm8, %v3155_v63  ;;  %v2365_v13 = vsel %vm1817_vm4, %v2363_v47, %v2364_v35  ;;  %v3058_v19 = vsel %vm3054_vm0, %v3025_v62, %v7187_v14  ;;  %v2196_v27 = vor.u32 %v2195_v51, %v2191_v16  ;;  %v2200_v5 = vrot.slane %v2198_v10, 1  ;;  %v6308_v15 = vld [vmem:[%s8097_s2] ss:$0 sm:$0xff]  ;;  %v1276_v16 = vld [vmem:[#allocation2 + $0x90] sm:$0xe] }
 0x198   : > { %2000 = vrot.lane.b32.xlu1 %v7318_v31, %s6339_s8  ;;  %v7392_v31 = vld [vmem:[#allocation2 + $0x98] ss:$0 sps:$4 sm:$0x11]   ;;  %v1851_v8 = vrot.slane %v5587_v3, 1  ;;  %v1692_v20 = vshll.u32 %v7385_v56, 16  ;;  %v637_v61 = vadd.f32 %v6308_v15, %v6898_v59  ;;  %v2165_v14 = vsel %vm1544_vm5, %v2160_v12, %v2164_v18 }
 0x199   : > { %v7380_v21 = vpop.permute.xlu0 %1982  ;;  %v1697_v9 = vshll.u32 %v7387_v4, 16  ;;  %v2872_v39 = vrot.slane %v5682_v55, 1  ;;  %v2873_v63 = vrot.slane %v7392_v31, 1  ;;  %v7428_v49 = vcombine.low %v1238_v38, %v7346_v41 }
 0x19a   : > { %v7389_v2 = vpop.permute.xlu1 %2256  ;;  %v1853_v44 = vsel %vm1817_vm4, %v1851_v8, %v1852_v45  ;;  %v2693_v0 = vshll.u32 %v7398_v30, 16  ;;  %v673_v59 = vmax.f32 %v637_v61, 0.0  ;;  %v3091_v3 = vsel %vm3087_vm3, %v3058_v19, %v7297_v33 }
 0x19b   : > { %2778 = vrot.lane.b32.xlu0 %v2677_v36, %s6343_s12  ;;  %v7438_v28 = vcombine.low %v5436_v48, %v7412_v50  ;;  %v5634_v37 = vcombine.low %v7414_v34, %v7412_v50  ;;  %v1690_v41 = vshrl.u32 %v7385_v56, 16  ;;  %v2201_v35 = vsel %vm1544_vm5, %v2196_v27, %v2200_v5 }
 0x19c   : > { %2508 = vrot.lane.b32.xlu1 %v7371_v53, %s6336_s28  ;;  %v1694_v46 = vrot.slane %v1692_v20, 1  ;;  %v5934_v62 = vpack.c.bf16 %v673_v59, %v673_v59  ;;  %v629_v51 = vadd.f32 %v6308_v15, %v6914_v7  ;;  %v1699_v36 = vrot.slane %v1697_v9, 1  ;;  %v1205_v9 = vld [vmem:[#allocation2 + $0xc0] sm:$0xf] }
 0x19d   : > { %v7410_v32 = vpop.permute.xlu0 %2894  ;;  %v2874_v33 = vsel %vm1817_vm4, %v2872_v39, %v2873_v63  ;;  %v2679_v12 = vshrl.u32 %v7371_v53, 16  ;;  %v640_v18 = vadd.f32 %v6308_v15, %v6924_v22  ;;  %v2683_v55 = vrot.slane %v2681_v40, 1 }
 0x19e   : > { %v7421_v26 = vpop.permute.xlu1 %1745  ;;  %v2686_v8 = vshll.u32 %v7432_v25, 16  ;;  %v1030_v45 = vshrl.u32 %v5934_v62, 16  ;;  %v5588_v7 = vcombine.low %v1276_v16, %v7364_v24  ;;  %v671_v19 = vmax.f32 %v629_v51, 0.0 }
 0x19f   : > { %2266 = vrot.lane.b32.xlu0 %v2165_v14, %s6342_s11  ;;  %v674_v38 = vmax.f32 %v640_v18, 0.0  ;;  %v632_v48 = vadd.f32 %v6308_v15, %v6931_v42  ;;  %v1695_v22 = vor.u32 %v1694_v46, %v1690_v41  ;;  %v1855_v5 = vrot.slane %v7387_v4, 1 }
 0x1a0   : > { %2400 = vrot.lane.b32.xlu1 %v2365_v13, %s6340_s9  ;;  %v1033_v13 = vshll.u32 %v5934_v62, 16  ;;  %v1032_v20 = vrot.slane %v1030_v45, 7  ;;  %v1678_v14 = vshrl.u32 %v7428_v49, 16  ;;  %v5932_v39 = vpack.c.bf16 %v671_v19, %v671_v19 }
 0x1a1   : > { %v7443_v47 = vpop.permute.xlu0 %1874  ;;  %v5935_v24 = vpack.c.bf16 %v674_v38, %v674_v38  ;;  %v2684_v42 = vor.u32 %v2683_v55, %v2679_v12  ;;  %v1680_v15 = vshll.u32 %v7428_v49, 16  ;;  %v672_v4 = vmax.f32 %v632_v48, 0.0 }
 0x1a2   : > { %v2765_v10 = vpop.permute.xlu1 %2764  ;;  %v1035_v63 = vor.u32 %v1033_v13, %v1032_v20  ;;  %v1013_v59 = vshrl.u32 %v5932_v39, 16  ;;  %v1854_v16 = vrot.slane %v5588_v7, 1  ;;  %v1685_v12 = vshll.u32 %v7353_v6, 16  ;;  %v1209_v7 = vld [vmem:[#allocation2 + $0xc8] sm:$0x1] }
 0x1a3   : > { %2510 = vrot.lane.b32.xlu0 %v7398_v30, %s6336_s28  ;;  %v3124_v53 = vsel %vm3120_vm6, %v3091_v3, %v2765_v10  ;;  %v1016_v3 = vshll.u32 %v5932_v39, 16  ;;  %v1038_v41 = vshrl.u32 %v5935_v24, 16  ;;  %v1041_v51 = vshll.u32 %v5935_v24, 16  ;;  %v7480_v6 = vld [vmem:[#allocation2 + $0x8c] ss:$0 sps:$4 sm:$0x11]  }
 0x1a4   : > { %1888 = vrot.lane.b32.xlu1 %v1853_v44, %s6337_s29  ;;  %v2688_v44 = vrot.slane %v2686_v8, 1  ;;  %v1206_v62 = vsel %vm6568_vm9, %v1035_v63, %v1205_v9  ;;  %v5933_v10 = vpack.c.bf16 %v672_v4, %v672_v4  ;;  %v1036_v55 = vrot.slane %v1032_v20, 4  ;;  %v1202_v63 = vld [vmem:[#allocation2 + $0xbc] sm:$0x1] }
 0x1a5   : > { %v2893_v27 = vpop.permute.xlu0 %2892  ;;  %1207 = vst [vmem:[#allocation2 + $0xc0] sm:$0xf] %v1206_v62  ;;  %v1015_v45 = vrot.slane %v1013_v59, 7  ;;  %v1040_v8 = vrot.slane %v1038_v41, 7  ;;  %v1700_v13 = vsel %vm1544_vm5, %v1695_v22, %v1699_v36  ;;  %v1682_v19 = vrot.slane %v1680_v15, 1 }
 0x1a6   : > { %v7458_v40 = vpop.permute.xlu1 %1743  ;;  %v3157_v61 = vsel %vm3153_vm7, %v3124_v53, %v2893_v27  ;;  %v1021_v38 = vshrl.u32 %v5933_v10, 16  ;;  %v1024_v48 = vshll.u32 %v5933_v10, 16  ;;  %v2869_v53 = vrot.slane %v5681_v57, 1  ;;  %v5477_v62 = vld [vmem:[#allocation2 + $0xa8] sm:$0xe] }
 0x1a7   : > { %1998 = vrot.lane.b32.xlu0 %v7438_v28, %s6339_s8  ;;  %6077 = vmatmul.mubr.msk.bf16.vlgmr.msra.gmra.mrb[0].mxu1 %vm3213_vm8, %v3157_v61  ;;  %v1018_v27 = vor.u32 %v1016_v3, %v1015_v45  ;;  %v1043_v20 = vor.u32 %v1041_v51, %v1040_v8  ;;  %v1045_v61 = vrot.slane %v1040_v8, 4  ;;  %v2689_v36 = vsel %vm1544_vm5, %v2684_v42, %v2688_v44  ;;  %v5442_v44 = vld [vmem:[#allocation2 + $0xa8] sm:$0xf] }
 0x1a8   : > { %2272 = vrot.lane.b32.xlu1 %v2201_v35, %s6342_s11  ;;  %v1198_v35 = vld [vmem:[#allocation2 + $0xb4] sm:$0xf]  ;;  %v1019_v22 = vrot.slane %v1015_v45, 4  ;;  %v1023_v39 = vrot.slane %v1021_v38, 7  ;;  %v2870_v15 = vrot.slane %v7432_v25, 1  ;;  %v1683_v42 = vor.u32 %v1682_v19, %v1678_v14  ;;  %v8133_v45 = vld [vmem:[#allocation4_spill] sm:$0xff] }
 0x1a9   : > { %v7467_v46 = vpop.permute.xlu0 %2382  ;;  %v1199_v29 = vsel %vm6568_vm9, %v1018_v27, %v1198_v35  ;;  %v1044_v52 = vsel %vm6575_vm10, %v1036_v55, %v1043_v20  ;;  %v1210_v57 = vsel %vm6581_vm11, %v1045_v61, %v1209_v7  ;;  %v2994_v1 = vsel %vm2988_vm13, %v7402_v43, %v7380_v21 }
 0x1aa   : > { %v7471_v18 = vpop.permute.xlu1 %1988  ;;  %1200 = vst [vmem:[#allocation2 + $0xb4] sm:$0xf] %v1199_v29  ;;  %1208 = vst.msk [vmem:[#allocation2 + $0xc4] sm:$0xf] %vm253_vm1, %v1044_v52  ;;  %v1026_v4 = vor.u32 %v1024_v48, %v1023_v39  ;;  %v1028_v25 = vrot.slane %v1023_v39, 4  ;;  %v2360_v59 = vrot.slane %v5634_v37, 1  ;;  %v2930_v35 = vsel %vm2922_vm12, %v8133_v45, %v7458_v40 }
 0x1ab   : > { %2910 = vrot.lane.b32.xlu0 %v2874_v33, %s6341_s10  ;;  %v1856_v33 = vsel %vm1817_vm4, %v1854_v16, %v1855_v5  ;;  %v1687_v5 = vrot.slane %v1685_v12, 1  ;;  %1211 = vst [vmem:[#allocation2 + $0xc8] sm:$0x1] %v1210_v57  ;;  %v2361_v14 = vrot.slane %v7480_v6, 1  ;;  %v2691_v3 = vshrl.u32 %v7398_v30, 16 }
 0x1ac   : > { %1761 = vrot.lane.b32.xlu1 %v1700_v13, %s6338_s30  ;;  %v5443_v16 = vld [vmem:[#allocation2 + $0xac] sm:$0xf]  ;;  %v2695_v51 = vrot.slane %v2693_v0, 1  ;;  %v2698_v10 = vshll.u32 %v7392_v31, 16  ;;  %v1027_v21 = vsel %vm6575_vm10, %v1019_v22, %v1026_v4  ;;  %v1203_v43 = vsel %vm6581_vm11, %v1028_v25, %v1202_v63  ;;  %v5502_v13 = vld [vmem:[#allocation2 + $0x9c] sm:$0xf] }
 0x1ad   : > { %v2767_v9 = vpop.permute.xlu0 %2766  ;;  %v2181_v50 = vshll.u32 %v7438_v28, 16  ;;  %v2871_v12 = vsel %vm1817_vm4, %v2869_v53, %v2870_v15  ;;  %1201 = vst.msk [vmem:[#allocation2 + $0xb8] sm:$0xf] %vm253_vm1, %v1027_v21  ;;  %1204 = vst [vmem:[#allocation2 + $0xbc] sm:$0x1] %v1203_v43  ;;  %v1688_v11 = vsel %vm1544_vm5, %v1683_v42, %v1687_v5  ;;  %v7524_v30 = vcombine.low %v5442_v44, %v5443_v16 }
 0x1ae   : > { %v7484_v24 = vpop.permute.xlu1 %2496  ;;  %v5637_v0 = vcombine.low %v5477_v62, %v5443_v16  ;;  %v2362_v55 = vsel %vm1817_vm4, %v2360_v59, %v2361_v14  ;;  %v2696_v19 = vor.u32 %v2695_v51, %v2691_v3  ;;  %v2700_v7 = vrot.slane %v2698_v10, 1  ;;  %v7537_v48 = vld [vmem:[#allocation2 + $0xa0] sm:$0xf]  ;;  %v6277_v40 = vld [vmem:[#allocation2 + $0xb0] ss:$0 sps:$4 sm:$0x11]  }
 0x1af   : > { %1890 = vrot.lane.b32.xlu0 %v1856_v33, %s6337_s29  ;;  %v2179_v53 = vshrl.u32 %v7438_v28, 16  ;;  %v2183_v27 = vrot.slane %v2181_v50, 1  ;;  %v2186_v20 = vshll.u32 %v7480_v6, 16  ;;  %v2963_v61 = vsel %vm429_vm2, %v2930_v35, %v7357_v23  ;;  %v1243_v52 = vld [vmem:[#allocation2 + $0xa0] sm:$0xf] }
 0x1b0   : > { %2780 = vrot.lane.b32.xlu1 %v2689_v36, %s6343_s12  ;;  %v7547_v36 = vld [vmem:[#allocation2 + $0xac] sm:$0xf]  ;;  %v2217_v28 = vshll.u32 %v7524_v30, 16  ;;  %v7553_v6 = vcombine.low %v5502_v13, %v7537_v48  ;;  %v2369_v22 = vrot.slane %v5637_v0, 1  ;;  %v2701_v15 = vsel %vm1544_vm5, %v2696_v19, %v2700_v7  ;;  %v5504_v25 = vld [vmem:[#allocation2 + $0xa8] sm:$0xf] }
 0x1b1   : > { %v2255_v41 = vpop.permute.xlu0 %2254  ;;  %v2184_v23 = vor.u32 %v2183_v27, %v2179_v53  ;;  %v2188_v29 = vrot.slane %v2186_v20, 1  ;;  %v2996_v57 = vsel %vm2988_vm13, %v2963_v61, %v7271_v54  ;;  %v2370_v63 = vrot.slane %v6277_v40, 1  ;;  %v7561_v42 = vld [vmem:[#allocation2 + $0xa4] ss:$0 sps:$4 sm:$0x11]  }
 0x1b2   : > { %v7512_v34 = vpop.permute.xlu1 %2388  ;;  %v3027_v37 = vsel %vm3021_vm15, %v2994_v1, %v2255_v41  ;;  %v2215_v1 = vshrl.u32 %v7524_v30, 16  ;;  %v1242_v59 = vld [vmem:[#allocation2 + $0x9c] sm:$0xf]  ;;  %v5540_v14 = vld [vmem:[#allocation2 + $0xa8] sm:$0xe]  ;;  %v3029_v54 = vsel %vm3021_vm15, %v2996_v57, %v7389_v2  ;;  %v2219_v3 = vrot.slane %v2217_v28, 1 }
 0x1b3   : > { %v3060_v31 = vsel %vm3054_vm0, %v3027_v37, %v7467_v46  ;;  %2908 = vrot.lane.b32.xlu0 %v2871_v12, %s6341_s10  ;;  %v2189_v16 = vsel %vm1544_vm5, %v2184_v23, %v2188_v29  ;;  %v5505_v62 = vld [vmem:[#allocation2 + $0xac] sm:$0xf]  ;;  %v2222_v51 = vshll.u32 %v6277_v40, 16  ;;  %v2371_v10 = vsel %vm1817_vm4, %v2369_v22, %v2370_v63  ;;  %v7579_v50 = vld [vmem:[#allocation2 + $0xb0] ss:$0 sps:$4 sm:$0x11]  }
 0x1b4   : > { %v3093_v17 = vsel %vm3087_vm3, %v3060_v31, %v7348_v58  ;;  %1759 = vrot.lane.b32.xlu1 %v1688_v11, %s6338_s30  ;;  %v1858_v43 = vrot.slane %v7561_v42, 1  ;;  %v5440_v2 = vld [vmem:[#allocation2 + $0x9c] sm:$0xf]  ;;  %v3062_v12 = vsel %vm3054_vm0, %v3029_v54, %v7328_v60  ;;  %v2705_v31 = vshll.u32 %v7553_v6, 16  ;;  %v1278_v19 = vld [vmem:[#allocation2 + $0xa8] sm:$0xe] }
 0x1b5   : > { %v7530_v8 = vpop.permute.xlu0 %2498  ;;  %v3126_v46 = vsel %vm3120_vm6, %v3093_v17, %v2767_v9  ;;  %v1277_v9 = vld [vmem:[#allocation2 + $0x9c] sm:$0xe]  ;;  %v7588_v17 = vcombine.low %v5504_v25, %v5505_v62  ;;  %v2220_v45 = vor.u32 %v2219_v3, %v2215_v1  ;;  %v2224_v35 = vrot.slane %v2222_v51, 1  ;;  %v6287_v27 = vld [vmem:[#allocation2 + $0xa4] ss:$0 sps:$4 sm:$0x11]  }
 0x1b6   : > { %v7533_v38 = vpop.permute.xlu1 %1876  ;;  %v3159_v58 = vsel %vm3153_vm7, %v3126_v46, %v7410_v32  ;;  %v1244_v32 = vld [vmem:[#allocation2 + $0xa8] sm:$0xf]  ;;  %v5589_v5 = vcombine.low %v1277_v9, %v1243_v52  ;;  %v7594_v46 = vld [vmem:[#allocation2 + $0xa0] sm:$0xf]  ;;  %v5684_v13 = vcombine.low %v5540_v14, %v5505_v62  ;;  %v1721_v53 = vshll.u32 %v7579_v50, 16 }
 0x1b7   : > { %2398 = vrot.lane.b32.xlu0 %v2362_v55, %s6340_s9  ;;  %6080 = vmatprep.mubr.msk.bf16.mxu1 %vm3213_vm8, %v3159_v58  ;;  %v7564_v4 = vcombine.low %v1244_v32, %v7547_v36  ;;  %v7592_v55 = vcombine.low %v1242_v59, %v1243_v52  ;;  %v3095_v20 = vsel %vm3087_vm3, %v3062_v12, %v7484_v24  ;;  %v2703_v40 = vshrl.u32 %v7553_v6, 16  ;;  %v5476_v51 = vld [vmem:[#allocation2 + $0x9c] sm:$0xe] }
 0x1b8   : > { %2004 = vrot.lane.b32.xlu1 %v7524_v30, %s6339_s8  ;;  %v1857_v21 = vrot.slane %v5589_v5, 1  ;;  %v7590_v30 = vld [vmem:[#allocation2 + $0xb0] ss:$0 sps:$4 sm:$0x11]   ;;  %v2707_v61 = vrot.slane %v2705_v31, 1  ;;  %v7607_v28 = vcombine.low %v5440_v2, %v7594_v46  ;;  %v2225_v24 = vsel %vm1544_vm5, %v2220_v45, %v2224_v35 }
 0x1b9   : > { %v7550_v33 = vpop.permute.xlu0 %1986  ;;  %v1716_v37 = vshll.u32 %v7564_v4, 16  ;;  %v1714_v60 = vshrl.u32 %v7564_v4, 16  ;;  %v2879_v22 = vrot.slane %v7590_v30, 1  ;;  %v2878_v52 = vrot.slane %v5684_v13, 1 }
 0x1ba   : > { %v7555_v39 = vpop.permute.xlu1 %2260  ;;  %v1859_v7 = vsel %vm1817_vm4, %v1857_v21, %v1858_v43  ;;  %v1723_v63 = vrot.slane %v1721_v53, 1  ;;  %v2710_v5 = vshll.u32 %v6287_v27, 16  ;;  %v1704_v25 = vshll.u32 %v7592_v55, 16  ;;  %v6290_v31 = vld [vmem:[#allocation2 + $0xa4] ss:$0 sps:$4 sm:$0x11]  }
 0x1bb   : > { %2782 = vrot.lane.b32.xlu0 %v2701_v15, %s6343_s12  ;;  %v1718_v58 = vrot.slane %v1716_v37, 1  ;;  %v5539_v15 = vld [vmem:[#allocation2 + $0x9c] sm:$0xe]  ;;  %v2708_v14 = vor.u32 %v2707_v61, %v2703_v40  ;;  %v1702_v62 = vshrl.u32 %v7592_v55, 16  ;;  %v2876_v12 = vrot.slane %v6287_v27, 1 }
 0x1bc   : > { %2512 = vrot.lane.b32.xlu1 %v7553_v6, %s6336_s28  ;;  %v5590_v6 = vcombine.low %v1278_v19, %v7547_v36  ;;  %v5683_v1 = vcombine.low %v5539_v15, %v7537_v48  ;;  %v2880_v36 = vsel %vm1817_vm4, %v2878_v52, %v2879_v22  ;;  %v2712_v21 = vrot.slane %v2710_v5, 1  ;;  %v5506_v5 = vld [vmem:[#allocation2 + $0xb4] sm:$0xf] }
 0x1bd   : > { %v7569_v44 = vpop.permute.xlu0 %2898  ;;  %v1719_v57 = vor.u32 %v1718_v58, %v1714_v60  ;;  %v1706_v43 = vrot.slane %v1704_v25, 1  ;;  %v1709_v48 = vshll.u32 %v7561_v42, 16  ;;  %v2717_v19 = vshll.u32 %v7588_v17, 16 }
 0x1be   : > { %v7573_v41 = vpop.permute.xlu1 %1749  ;;  %v1860_v3 = vrot.slane %v5590_v6, 1  ;;  %v2875_v37 = vrot.slane %v5683_v1, 1  ;;  %v2367_v61 = vrot.slane %v6290_v31, 1  ;;  %v2715_v22 = vshrl.u32 %v7588_v17, 16  ;;  %v5479_v6 = vld [vmem:[#allocation2 + $0xc0] sm:$0xe] }
 0x1bf   : > { %2270 = vrot.lane.b32.xlu0 %v2189_v16, %s6342_s11  ;;  %v1861_v16 = vrot.slane %v7579_v50, 1  ;;  %v8134_v50 = vld [vmem:[#allocation5_spill] sm:$0xff]  ;;  %v1707_v60 = vor.u32 %v1706_v43, %v1702_v62  ;;  %v1711_v58 = vrot.slane %v1709_v48, 1  ;;  %v2719_v15 = vrot.slane %v2717_v19, 1  ;;  %v1279_v62 = vld [vmem:[#allocation2 + $0xb4] sm:$0xe] }
 0x1c0   : > { %2404 = vrot.lane.b32.xlu1 %v2371_v10, %s6340_s9  ;;  %v1724_v10 = vsel %vm1544_vm5, %v1719_v57, %v1723_v63  ;;  %v2932_v45 = vsel %vm2922_vm12, %v8134_v50, %v7421_v26  ;;  %v5446_v26 = vld [vmem:[#allocation2 + $0xc0] sm:$0xf]  ;;  %v2877_v27 = vsel %vm1817_vm4, %v2875_v37, %v2876_v12  ;;  %v2203_v1 = vshrl.u32 %v7607_v28, 16  ;;  %v1246_v50 = vld [vmem:[#allocation2 + $0xb4] sm:$0xf] }
 0x1c1   : > { %v7586_v11 = vpop.permute.xlu0 %1878  ;;  %v1862_v13 = vsel %vm1817_vm4, %v1860_v3, %v1861_v16  ;;  %v2965_v42 = vsel %vm429_vm2, %v2932_v45, %v7443_v47  ;;  %v2722_v47 = vshll.u32 %v7590_v30, 16  ;;  %v2210_v16 = vshll.u32 %v6290_v31, 16  ;;  %v7688_v45 = vld [vmem:[#allocation2 + $0xbc] ss:$0 sps:$4 sm:$0x11]  }
 0x1c2   : > { %v2769_v0 = vpop.permute.xlu1 %2768  ;;  %vm5117_vm9 = vcmask 1044484   ;;  %vm5120_vm10 = vcmask 1045509   ;;  %vm5123_vm11 = vcmask 1046534  }
 0x1c3   : > { %2514 = vrot.lane.b32.xlu0 %v7588_v17, %s6336_s28  ;;  %v3128_v9 = vsel %vm3120_vm6, %v3095_v20, %v2769_v0  ;;  %v5636_v0 = vcombine.low %v5476_v51, %v7594_v46  ;;  %v2998_v46 = vsel %vm2988_vm13, %v2965_v42, %v7550_v33  ;;  %v5447_v20 = vld [vmem:[#allocation2 + $0xc4] sm:$0xf]  ;;  %v2205_v33 = vshll.u32 %v7607_v28, 16  ;;  %v8135_v51 = vld [vmem:[#allocation7_spill] sm:$0xff] }
 0x1c4   : > { %1892 = vrot.lane.b32.xlu1 %v1859_v7, %s6337_s29  ;;  %v2713_v7 = vsel %vm1544_vm5, %v2708_v14, %v2712_v21  ;;  %v7658_v30 = vcombine.low %v5446_v26, %v5447_v20  ;;  %v2724_v25 = vrot.slane %v2722_v47, 1  ;;  %v7669_v14 = vld [vmem:[#allocation2 + $0xb8] sm:$0xf]  ;;  %v5639_v21 = vcombine.low %v5479_v6, %v5447_v20  ;;  %v6300_v26 = vld [vmem:[#allocation2 + $0xbc] ss:$0 sps:$4 sm:$0x11]  }
 0x1c5   : > { %v2897_v32 = vpop.permute.xlu0 %2896  ;;  %v2366_v40 = vrot.slane %v5636_v0, 1  ;;  %v2207_v3 = vrot.slane %v2205_v33, 1  ;;  %v7681_v48 = vcombine.low %v5506_v5, %v7669_v14  ;;  %v2212_v0 = vrot.slane %v2210_v16, 1  ;;  %v5541_v47 = vld [vmem:[#allocation2 + $0xb4] sm:$0xe] }
 0x1c6   : > { %v7610_v23 = vpop.permute.xlu1 %1747  ;;  %v3161_v29 = vsel %vm3153_vm7, %v3128_v9, %v2897_v32  ;;  %v2241_v42 = vshll.u32 %v7658_v30, 16  ;;  %v5445_v6 = vld [vmem:[#allocation2 + $0xb8] sm:$0xf] }
 0x1c7   : > { %2002 = vrot.lane.b32.xlu0 %v7607_v28, %s6339_s8  ;;  %6081 = vmatmul.mubr.msk.bf16.gmra.mrb[4].mxu1 %vm3213_vm8, %v3161_v29  ;;  %v2368_v17 = vsel %vm1817_vm4, %v2366_v40, %v2367_v61  ;;  %v6293_v28 = vld [vmem:[#allocation2 + $0xc8] ss:$0 sps:$4 sm:$0x11]   ;;  %v2208_v31 = vor.u32 %v2207_v3, %v2203_v1  ;;  %v1864_v40 = vrot.slane %v7688_v45, 1  ;;  %v2734_v1 = vshll.u32 %v6300_v26, 16 }
 0x1c8   : > { %2276 = vrot.lane.b32.xlu1 %v2225_v24, %s6342_s11  ;;  %v1712_v24 = vsel %vm1544_vm5, %v1707_v60, %v1711_v58  ;;  %v2376_v19 = vrot.slane %v6293_v28, 1  ;;  %v2246_v61 = vshll.u32 %v6293_v28, 16  ;;  %v7732_v28 = vld [vmem:[#allocation2 + $0xd4] ss:$0 sps:$4 sm:$0x11]  }
 0x1c9   : > { %v2387_v59 = vpop.permute.xlu0 %2386 }
 0x1ca   : > { %v7621_v54 = vpop.permute.xlu1 %1992  ;;  %v2248_v5 = vrot.slane %v2246_v61, 1 }
 0x1cb   : > { %2914 = vrot.lane.b32.xlu0 %v2880_v36, %s6341_s10  ;;  %v2720_v36 = vor.u32 %v2719_v15, %v2715_v22  ;;  %v2243_v22 = vrot.slane %v2241_v42, 1  ;;  %v2729_v15 = vshll.u32 %v7681_v48, 16 }
 0x1cc   : > { %1765 = vrot.lane.b32.xlu1 %v1724_v10, %s6338_s30  ;;  %v2934_v10 = vsel %vm2922_vm12, %v8135_v51, %v7610_v23 }
 0x1cd   : > { %v2771_v2 = vpop.permute.xlu0 %2770  ;;  %v2725_v12 = vsel %vm1544_vm5, %v2720_v36, %v2724_v25  ;;  %v2727_v25 = vshrl.u32 %v7681_v48, 16  ;;  %v2731_v3 = vrot.slane %v2729_v15, 1 }
 0x1ce   : > { %v7634_v35 = vpop.permute.xlu1 %2500 }
 0x1cf   : > { %1894 = vrot.lane.b32.xlu0 %v1862_v13, %s6337_s29  ;;  %v2375_v13 = vrot.slane %v5639_v21, 1  ;;  %v2732_v42 = vor.u32 %v2731_v3, %v2727_v25 }
 0x1d0   : > { %2784 = vrot.lane.b32.xlu1 %v2713_v7, %s6343_s12  ;;  %v5508_v7 = vld [vmem:[#allocation2 + $0xc0] sm:$0xf] }
 0x1d1   : > { %v2259_v53 = vpop.permute.xlu0 %2258 }
 0x1d2   : > { %v7647_v9 = vpop.permute.xlu1 %2392  ;;  %v3031_v32 = vsel %vm3021_vm15, %v2998_v46, %v2259_v53  ;;  %v7700_v46 = vld [vmem:[#allocation2 + $0xc4] sm:$0xf] }
 0x1d3   : > { %v3064_v29 = vsel %vm3054_vm0, %v3031_v32, %v2387_v59  ;;  %2912 = vrot.lane.b32.xlu0 %v2877_v27, %s6341_s10  ;;  %v2213_v27 = vsel %vm1544_vm5, %v2208_v31, %v2212_v0  ;;  %v2377_v32 = vsel %vm1817_vm4, %v2375_v13, %v2376_v19  ;;  %v2736_v0 = vrot.slane %v2734_v1, 1 }
 0x1d4   : > { %v3097_v52 = vsel %vm3087_vm3, %v3064_v29, %v7530_v8  ;;  %1763 = vrot.lane.b32.xlu1 %v1712_v24, %s6338_s30  ;;  %v7716_v24 = vcombine.low %v5508_v7, %v7700_v46 }
 0x1d5   : > { %v7660_v57 = vpop.permute.xlu0 %2502  ;;  %v3130_v63 = vsel %vm3120_vm6, %v3097_v52, %v2771_v2  ;;  %v2967_v2 = vsel %vm429_vm2, %v2934_v10, %v7533_v38  ;;  %v5444_v52 = vld [vmem:[#allocation2 + $0xb4] sm:$0xf] }
 0x1d6   : > { %v7665_v59 = vpop.permute.xlu1 %1880  ;;  %v3163_v8 = vsel %vm3153_vm7, %v3130_v63, %v7569_v44  ;;  %v1247_v44 = vld [vmem:[#allocation2 + $0xb8] sm:$0xf]  ;;  %v3000_v38 = vsel %vm2988_vm13, %v2967_v2, %v7471_v18  ;;  %v2239_v18 = vshrl.u32 %v7658_v30, 16  ;;  %v7730_v10 = vcombine.low %v5444_v52, %v5445_v6 }
 0x1d7   : > { %2402 = vrot.lane.b32.xlu0 %v2368_v17, %s6340_s9  ;;  %6084 = vmatprep.mubr.msk.bf16.mxu1 %vm3213_vm8, %v3163_v8  ;;  %v5591_v37 = vcombine.low %v1279_v62, %v1247_v44  ;;  %v7698_v58 = vcombine.low %v1246_v50, %v1247_v44  ;;  %v3033_v33 = vsel %vm3021_vm15, %v3000_v38, %v7555_v39  ;;  %v5478_v8 = vld [vmem:[#allocation2 + $0xb4] sm:$0xe]  ;;  %v8136_v62 = vld [vmem:[#allocation3_spill] sm:$0xff]  ;;  %v7739_v50 = vld [vmem:[#allocation2 + $0xc8] ss:$0 sps:$4 sm:$0x11]  }
 0x1d8   : > { %2008 = vrot.lane.b32.xlu1 %v7658_v30, %s6339_s8  ;;  %v5685_v17 = vcombine.low %v5541_v47, %v7669_v14  ;;  %v3066_v39 = vsel %vm3054_vm0, %v3033_v33, %v7512_v34  ;;  %v2244_v36 = vor.u32 %v2243_v22, %v2239_v18  ;;  %v2753_v14 = vshll.u32 %v8136_v62, 16 }
 0x1d9   : > { %v7678_v43 = vpop.permute.xlu0 %1990  ;;  %v1863_v20 = vrot.slane %v5591_v37, 1  ;;  %v1728_v16 = vshll.u32 %v7698_v58, 16  ;;  %v3099_v51 = vsel %vm3087_vm3, %v3066_v39, %v7634_v35  ;;  %v6302_v37 = vld [vmem:[#allocation2 + $0xbc] ss:$0 sps:$4 sm:$0x11]   ;;  %v5638_v2 = vcombine.low %v5478_v8, %v5445_v6 }
 0x1da   : > { %v7685_v23 = vpop.permute.xlu1 %2264  ;;  %v2881_v44 = vrot.slane %v5685_v17, 1  ;;  %v1726_v35 = vshrl.u32 %v7698_v58, 16  ;;  %v2741_v13 = vshll.u32 %v7716_v24, 16  ;;  %v2249_v19 = vsel %vm1544_vm5, %v2244_v36, %v2248_v5 }
 0x1db   : > { %2786 = vrot.lane.b32.xlu0 %v2725_v12, %s6343_s12  ;;  %v1865_v30 = vsel %vm1817_vm4, %v1863_v20, %v1864_v40  ;;  %v1730_v7 = vrot.slane %v1728_v16, 1  ;;  %v1733_v38 = vshll.u32 %v7688_v45, 16  ;;  %v5543_v20 = vld [vmem:[#allocation2 + $0xcc] sm:$0xe]  ;;  %v2372_v47 = vrot.slane %v5638_v2, 1 }
 0x1dc   : > { %2516 = vrot.lane.b32.xlu1 %v7681_v48, %s6336_s28  ;;  %v2882_v48 = vrot.slane %v6300_v26, 1  ;;  %v2751_v26 = vshrl.u32 %v8136_v62, 16  ;;  %v2758_v18 = vshll.u32 %v7732_v28, 16  ;;  %v2739_v15 = vshrl.u32 %v7716_v24, 16 }
 0x1dd   : > { %v7696_v60 = vpop.permute.xlu0 %2902  ;;  %v2743_v33 = vrot.slane %v2741_v13, 1  ;;  %v2746_v45 = vshll.u32 %v7739_v50, 16  ;;  %v2229_v52 = vshll.u32 %v7730_v10, 16  ;;  %v2737_v6 = vsel %vm1544_vm5, %v2732_v42, %v2736_v0 }
 0x1de   : > { %v7702_v53 = vpop.permute.xlu1 %1753  ;;  %v2883_v61 = vsel %vm1817_vm4, %v2881_v44, %v2882_v48  ;;  %v1731_v17 = vor.u32 %v1730_v7, %v1726_v35  ;;  %v2227_v39 = vshrl.u32 %v7730_v10, 16  ;;  %v2888_v0 = vrot.slane %v7732_v28, 1 }
 0x1df   : > { %2274 = vrot.lane.b32.xlu0 %v2213_v27, %s6342_s11  ;;  %v2755_v27 = vrot.slane %v2753_v14, 1  ;;  %v2744_v3 = vor.u32 %v2743_v33, %v2739_v15  ;;  %v2748_v16 = vrot.slane %v2746_v45, 1  ;;  %v2231_v62 = vrot.slane %v2229_v52, 1 }
 0x1e0   : > { %2408 = vrot.lane.b32.xlu1 %v2377_v32, %s6340_s9  ;;  %v2373_v32 = vrot.slane %v6302_v37, 1  ;;  %v2234_v14 = vshll.u32 %v6302_v37, 16 }
 0x1e1   : > { %v7713_v29 = vpop.permute.xlu0 %1882  ;;  %v2756_v8 = vor.u32 %v2755_v27, %v2751_v26  ;;  %v2232_v42 = vor.u32 %v2231_v62, %v2227_v39 }
 0x1e2   : > { %v2773_v63 = vpop.permute.xlu1 %2772  ;;  %v2374_v1 = vsel %vm1817_vm4, %v2372_v47, %v2373_v32  ;;  %v8138_v47 = vld [vmem:[#allocation9_spill] sm:$0xff] }
 0x1e3   : > { %2518 = vrot.lane.b32.xlu0 %v7716_v24, %s6336_s28  ;;  %v3132_v34 = vsel %vm3120_vm6, %v3099_v51, %v2773_v63  ;;  %v1735_v63 = vrot.slane %v1733_v38, 1  ;;  %v2760_v24 = vrot.slane %v2758_v18, 1  ;;  %v5542_v51 = vld [vmem:[#allocation2 + $0xc0] sm:$0xe] }
 0x1e4   : > { %1896 = vrot.lane.b32.xlu1 %v1865_v30, %s6337_s29  ;;  %v6309_v30 = vld [vmem:[#allocation2 + $0xd0] sm:$0xf]  ;;  %s5903_s29 = sshll.u32 %s8148_s18, 5 }
 0x1e5   : > { %v2901_v21 = vpop.permute.xlu0 %2900  ;;  %v5687_v5 = vcombine.low %v5543_v20, %v6309_v30  ;;  %v1736_v44 = vsel %vm1544_vm5, %v1731_v17, %v1735_v63  ;;  %v2761_v37 = vsel %vm1544_vm5, %v2756_v8, %v2760_v24  ;;  %s7927_s18 = scalar_lea.vmem %s8100_s5, %s5903_s29 }
 0x1e6   : > { %v7735_v12 = vpop.permute.xlu1 %1751  ;;  %v3165_v31 = vsel %vm3153_vm7, %v3132_v34, %v2901_v21  ;;  %v8137_v34 = vld [vmem:[#allocation6_spill] sm:$0xff] }
 0x1e7   : > { %2006 = vrot.lane.b32.xlu0 %v7730_v10, %s6339_s8  ;;  %6085 = vmatmul.mubr.msk.bf16.gmra.mrb[8].mxu1 %vm3213_vm8, %v3165_v31  ;;  %v2936_v21 = vsel %vm2922_vm12, %v8137_v34, %v7573_v41  ;;  %v2887_v48 = vrot.slane %v5687_v5, 1  ;;  %v5686_v41 = vcombine.low %v5542_v51, %v7700_v46 }
 0x1e8   : > { %2280 = vrot.lane.b32.xlu1 %v2249_v19, %s6342_s11  ;;  %v2969_v2 = vsel %vm429_vm2, %v2936_v21, %v7586_v11  ;;  %v2749_v19 = vsel %vm1544_vm5, %v2744_v3, %v2748_v16  ;;  %v2236_v11 = vrot.slane %v2234_v14, 1 }
 0x1e9   : > { %v2391_v40 = vpop.permute.xlu0 %2390  ;;  %v3002_v10 = vsel %vm2988_vm13, %v2969_v2, %v7678_v43  ;;  %v2889_v46 = vsel %vm1817_vm4, %v2887_v48, %v2888_v0 }
 0x1ea   : > { %v7751_v22 = vpop.permute.xlu1 %1996  ;;  %v2237_v27 = vsel %vm1544_vm5, %v2232_v42, %v2236_v11  ;;  %vm5114_vm5 = vcmask 1043459  }
 0x1eb   : > { %2916 = vrot.lane.b32.xlu0 %v2883_v61, %s6341_s10  ;;  %v2884_v61 = vrot.slane %v5686_v41, 1 }
 0x1ec   : > { %2788 = vrot.lane.b32.xlu1 %v2737_v6, %s6343_s12 }
 0x1ed   : > { %v2775_v25 = vpop.permute.xlu0 %2774 }
 0x1ee   : > { %v2505_v36 = vpop.permute.xlu1 %2504 }
 0x1ef   : > { %2406 = vrot.lane.b32.xlu0 %v2374_v1, %s6340_s9 }
 0x1f0   : > { %1767 = vrot.lane.b32.xlu1 %v1736_v44, %s6338_s30 }
 0x1f1   : > { %v2263_v31 = vpop.permute.xlu0 %2262 }
 0x1f2   : > { %v7774_v35 = vpop.permute.xlu1 %2396  ;;  %v3035_v13 = vsel %vm3021_vm15, %v3002_v10, %v2263_v31 }
 0x1f3   : > { %v3068_v7 = vsel %vm3054_vm0, %v3035_v13, %v2391_v40  ;;  %2790 = vrot.lane.b32.xlu0 %v2749_v19, %s6343_s12  ;;  %v2885_v40 = vrot.slane %v7739_v50, 1 }
 0x1f4   : > { %v3101_v43 = vsel %vm3087_vm3, %v3068_v7, %v7660_v57  ;;  %2792 = vrot.lane.b32.xlu1 %v2761_v37, %s6343_s12  ;;  %v2938_v57 = vsel %vm2922_vm12, %v8138_v47, %v7735_v12 }
 0x1f5   : > { %v2507_v28 = vpop.permute.xlu0 %2506  ;;  %v3134_v38 = vsel %vm3120_vm6, %v3101_v43, %v2775_v25  ;;  %v2971_v18 = vsel %vm429_vm2, %v2938_v57, %v7665_v59 }
 0x1f6   : > { %v1885_v26 = vpop.permute.xlu1 %1884  ;;  %v3167_v20 = vsel %vm3153_vm7, %v3134_v38, %v7696_v60  ;;  %v2886_v60 = vsel %vm1817_vm4, %v2884_v61, %v2885_v40  ;;  %v3004_v50 = vsel %vm2988_vm13, %v2971_v18, %v7621_v54  ;;  %v8141_v61 = vld [vmem:[#allocation11_spill] sm:$0xff]  ;;  %vm5111_vm4 = vcmask 1042434  }
 0x1f7   : > { %2278 = vrot.lane.b32.xlu0 %v2237_v27, %s6342_s11  ;;  %6088 = vmatprep.mubr.msk.bf16.mxu1 %vm3213_vm8, %v3167_v20  ;;  %v3037_v45 = vsel %vm3021_vm15, %v3004_v50, %v7685_v23  ;;  %v8139_v23 = vld [vmem:[#allocation8_spill] sm:$0xff] }
 0x1f8   : > { %2920 = vrot.lane.b32.xlu1 %v2889_v46, %s6341_s10  ;;  %v3070_v17 = vsel %vm3054_vm0, %v3037_v45, %v7647_v9  ;;  %v2940_v39 = vsel %vm2922_vm12, %v8139_v23, %v7702_v53  ;;  %v8140_v53 = vld [vmem:[#allocation12_spill] sm:$0xff] }
 0x1f9   : > { %v1995_v32 = vpop.permute.xlu0 %1994  ;;  %v3103_v59 = vsel %vm3087_vm3, %v3070_v17, %v2505_v36  ;;  %v2973_v9 = vsel %vm429_vm2, %v2940_v39, %v7713_v29 }
 0x1fa   : > { %v2269_v15 = vpop.permute.xlu1 %2268  ;;  %v3006_v36 = vsel %vm2988_vm13, %v2973_v9, %v1995_v32 }
 0x1fb   : > { %2918 = vrot.lane.b32.xlu0 %v2886_v60, %s6341_s10 }
 0x1fd   : > { %v2907_v33 = vpop.permute.xlu0 %2906 }
 0x1fe   : > { %v1758_v12 = vpop.permute.xlu1 %1757 }
 0x1ff   : > { %v2944_v40 = vsel %vm2922_vm12, %v8141_v61, %v1758_v12 }
 0x201   : > { %v1887_v52 = vpop.permute.xlu0 %1886 }
 0x202   : > { %v2777_v6 = vpop.permute.xlu1 %2776  ;;  %v2977_v47 = vsel %vm429_vm2, %v2944_v40, %v1887_v52 }
 0x203   : > { %v3136_v63 = vsel %vm3120_vm6, %v3103_v59, %v2777_v6 }
 0x205   : > { %v2905_v30 = vpop.permute.xlu0 %2904 }
 0x206   : > { %v1756_v5 = vpop.permute.xlu1 %1755  ;;  %v3169_v25 = vsel %vm3153_vm7, %v3136_v63, %v2905_v30 }
 0x207   : > { %6089 = vmatmul.mubr.msk.bf16.gmra.mrb[12].mxu1 %vm3213_vm8, %v3169_v25  ;;  %v2942_v2 = vsel %vm2922_vm12, %v8140_v53, %v1756_v5 }
 0x208   : > { %v2975_v10 = vsel %vm429_vm2, %v2942_v2, %v1885_v26 }
 0x209   : > { %v2395_v54 = vpop.permute.xlu0 %2394  ;;  %v3008_v37 = vsel %vm2988_vm13, %v2975_v10, %v7751_v22 }
 0x20a   : > { %v2001_v1 = vpop.permute.xlu1 %2000  ;;  %v3041_v13 = vsel %vm3021_vm15, %v3008_v37, %v2269_v15 }
 0x20b   : > { %v3074_v11 = vsel %vm3054_vm0, %v3041_v13, %v7774_v35 }
 0x20d   : > { %v2779_v8 = vpop.permute.xlu0 %2778 }
 0x20e   : > { %v2509_v24 = vpop.permute.xlu1 %2508 }
 0x20f   : > { %v3107_v7 = vsel %vm3087_vm3, %v3074_v11, %v2509_v24 }
 0x211   : > { %v2267_v3 = vpop.permute.xlu0 %2266 }
 0x212   : > { %v2401_v16 = vpop.permute.xlu1 %2400  ;;  %v3039_v62 = vsel %vm3021_vm15, %v3006_v36, %v2267_v3 }
 0x213   : > { %v3072_v14 = vsel %vm3054_vm0, %v3039_v62, %v2395_v54 }
 0x214   : > { %v3105_v51 = vsel %vm3087_vm3, %v3072_v14, %v2507_v28 }
 0x215   : > { %v2511_v34 = vpop.permute.xlu0 %2510  ;;  %v3138_v21 = vsel %vm3120_vm6, %v3105_v51, %v2779_v8 }
 0x216   : > { %v1889_v44 = vpop.permute.xlu1 %1888  ;;  %v3171_v48 = vsel %vm3153_vm7, %v3138_v21, %v2907_v33 }
 0x217   : > { %6092 = vmatprep.mubr.msk.bf16.mxu1 %vm3213_vm8, %v3171_v48 }
 0x219   : > { %v1999_v29 = vpop.permute.xlu0 %1998 }
 0x21a   : > { %v2273_v31 = vpop.permute.xlu1 %2272  ;;  %v3010_v35 = vsel %vm2988_vm13, %v2977_v47, %v1999_v29 }
 0x21d   : > { %v2911_v0 = vpop.permute.xlu0 %2910 }
 0x21e   : > { %v1762_v41 = vpop.permute.xlu1 %1761 }
 0x21f   : > { %v2948_v51 = vsel %vm2922_vm12, %v7385_v56, %v1762_v41 }
 0x221   : > { %v1891_v19 = vpop.permute.xlu0 %1890 }
 0x222   : > { %v2781_v42 = vpop.permute.xlu1 %2780 }
 0x223   : > { %v3140_v43 = vsel %vm3120_vm6, %v3107_v7, %v2781_v42 }
 0x225   : > { %v2909_v28 = vpop.permute.xlu0 %2908 }
 0x226   : > { %v1760_v46 = vpop.permute.xlu1 %1759  ;;  %v3173_v38 = vsel %vm3153_vm7, %v3140_v43, %v2909_v28 }
 0x227   : > { %6093 = vmatmul.mubr.msk.bf16.gmra.mrb[16].mxu1 %vm3213_vm8, %v3173_v38  ;;  %v2946_v12 = vsel %vm2922_vm12, %v7428_v49, %v1760_v46 }
 0x228   : > { %v2979_v17 = vsel %vm429_vm2, %v2946_v12, %v1889_v44 }
 0x229   : > { %v2399_v22 = vpop.permute.xlu0 %2398  ;;  %v3012_v63 = vsel %vm2988_vm13, %v2979_v17, %v2001_v1 }
 0x22a   : > { %v2005_v26 = vpop.permute.xlu1 %2004  ;;  %v3045_v25 = vsel %vm3021_vm15, %v3012_v63, %v2273_v31  ;;  %v6344_v63 = vmov 1983009808  }
 0x22b   : > { %v3078_v24 = vsel %vm3054_vm0, %v3045_v25, %v2401_v16 }
 0x22d   : > { %v2783_v27 = vpop.permute.xlu0 %2782 }
 0x22e   : > { %v2513_v20 = vpop.permute.xlu1 %2512 }
 0x22f   : > { %v3111_v23 = vsel %vm3087_vm3, %v3078_v24, %v2513_v20 }
 0x231   : > { %v2271_v57 = vpop.permute.xlu0 %2270 }
 0x232   : > { %v2405_v32 = vpop.permute.xlu1 %2404  ;;  %v3043_v18 = vsel %vm3021_vm15, %v3010_v35, %v2271_v57 }
 0x233   : > { %v3076_v15 = vsel %vm3054_vm0, %v3043_v18, %v2399_v22 }
 0x234   : > { %v3109_v60 = vsel %vm3087_vm3, %v3076_v15, %v2511_v34  ;;  %v2981_v34 = vsel %vm429_vm2, %v2948_v51, %v1891_v19  ;;  %v8142_v15 = vld [vmem:[#allocation10_spill] sm:$0xff] }
 0x235   : > { %v2515_v50 = vpop.permute.xlu0 %2514  ;;  %v3142_v33 = vsel %vm3120_vm6, %v3109_v60, %v2783_v27 }
 0x236   : > { %v1893_v45 = vpop.permute.xlu1 %1892  ;;  %v3175_v6 = vsel %vm3153_vm7, %v3142_v33, %v2911_v0 }
 0x237   : > { %6096 = vmatprep.mubr.msk.bf16.mxu1 %vm3213_vm8, %v3175_v6 }
 0x239   : > { %v2003_v52 = vpop.permute.xlu0 %2002 }
 0x23a   : > { %v2277_v59 = vpop.permute.xlu1 %2276  ;;  %v3014_v16 = vsel %vm2988_vm13, %v2981_v34, %v2003_v52 }
 0x23d   : > { %v2915_v30 = vpop.permute.xlu0 %2914 }
 0x23e   : > { %v1766_v5 = vpop.permute.xlu1 %1765 }
 0x23f   : > { %v2952_v35 = vsel %vm2922_vm12, %v7564_v4, %v1766_v5  ;;  %v3479_v5 = vlaneseq }
 0x241   : > { %v1895_v54 = vpop.permute.xlu0 %1894 }
 0x242   : > { %v2785_v8 = vpop.permute.xlu1 %2784 }
 0x243   : > { %v3144_v49 = vsel %vm3120_vm6, %v3111_v23, %v2785_v8  ;;  %v7897_v8 = vld [vmem:[%s8099_s4] ss:$0 sm:$0xff] }
 0x245   : > { %v2913_v39 = vpop.permute.xlu0 %2912 }
 0x246   : > { %v1764_v9 = vpop.permute.xlu1 %1763  ;;  %v3177_v36 = vsel %vm3153_vm7, %v3144_v49, %v2913_v39 }
 0x247   : > { %6097 = vmatmul.mubr.msk.bf16.gmra.mrb[20].mxu1 %vm3213_vm8, %v3177_v36  ;;  %v2950_v21 = vsel %vm2922_vm12, %v7592_v55, %v1764_v9 }
 0x248   : > { %v2983_v29 = vsel %vm429_vm2, %v2950_v21, %v1893_v45 }
 0x249   : > { %v2403_v3 = vpop.permute.xlu0 %2402  ;;  %v3016_v41 = vsel %vm2988_vm13, %v2983_v29, %v2005_v26 }
 0x24a   : > { %v2009_v1 = vpop.permute.xlu1 %2008  ;;  %v3049_v13 = vsel %vm3021_vm15, %v3016_v41, %v2277_v59 }
 0x24b   : > { %v3082_v42 = vsel %vm3054_vm0, %v3049_v13, %v2405_v32  ;;  %v2985_v32 = vsel %vm429_vm2, %v2952_v35, %v1895_v54  ;;  %v3480_v54 = vshrl.u32 %v3479_v5, 7 }
 0x24d   : > { %v2787_v62 = vpop.permute.xlu0 %2786 }
 0x24e   : > { %v2517_v14 = vpop.permute.xlu1 %2516 }
 0x24f   : > { %v3115_v7 = vsel %vm3087_vm3, %v3082_v42, %v2517_v14 }
 0x251   : > { %v2275_v44 = vpop.permute.xlu0 %2274 }
 0x252   : > { %v2409_v48 = vpop.permute.xlu1 %2408  ;;  %v3047_v53 = vsel %vm3021_vm15, %v3014_v16, %v2275_v44 }
 0x253   : > { %v3080_v2 = vsel %vm3054_vm0, %v3047_v53, %v2403_v3 }
 0x254   : > { %v3113_v10 = vsel %vm3087_vm3, %v3080_v2, %v2515_v50 }
 0x255   : > { %v2519_v31 = vpop.permute.xlu0 %2518  ;;  %v3146_v56 = vsel %vm3120_vm6, %v3113_v10, %v2787_v62 }
 0x256   : > { %v1897_v37 = vpop.permute.xlu1 %1896  ;;  %v3179_v0 = vsel %vm3153_vm7, %v3146_v56, %v2915_v30  ;;  %v3477_v30 = vunpack.c.l.s4 %v6344_v63 }
 0x257   : > { %6100 = vmatprep.mubr.msk.bf16.mxu1 %vm3213_vm8, %v3179_v0 }
 0x258   : > { %v3478_v25 = vunpack.c.0.s8 %v3477_v30 }
 0x259   : > { %v2007_v55 = vpop.permute.xlu0 %2006 }
 0x25a   : > { %v2281_v19 = vpop.permute.xlu1 %2280  ;;  %v3018_v18 = vsel %vm2988_vm13, %v2985_v32, %v2007_v55  ;;  %v7900_v49 = vsub.s32 %v3478_v25, %v3480_v54 }
 0x25d   : > { %v2917_v11 = vpop.permute.xlu0 %2916 }
 0x25e   : > { %v2789_v43 = vpop.permute.xlu1 %2788 }
 0x25f   : > { %v3148_v28 = vsel %vm3120_vm6, %v3115_v7, %v2789_v43 }
 0x260   : > { %v3181_v46 = vsel %vm3153_vm7, %v3148_v28, %v2917_v11 }
 0x261   : > { %6101 = vmatmul.mubr.msk.bf16.gmra.mrb[24].mxu1 %vm3213_vm8, %v3181_v46  ;;  %v2407_v38 = vpop.permute.xlu0 %2406 }
 0x262   : > { %v1768_v22 = vpop.permute.xlu1 %1767 }
 0x263   : > { %v2954_v26 = vsel %vm2922_vm12, %v7698_v58, %v1768_v22  ;;  %vm5126_vm12 = vcmask 1047559  }
 0x264   : > { %v2987_v27 = vsel %vm429_vm2, %v2954_v26, %v1897_v37  ;;  %vm5108_vm2 = vcmask 1041409  }
 0x265   : > { %v3020_v20 = vsel %vm2988_vm13, %v2987_v27, %v2009_v1  ;;  %v2791_v61 = vpop.permute.xlu0 %2790 }
 0x266   : > { %v3053_v40 = vsel %vm3021_vm15, %v3020_v20, %v2281_v19  ;;  %v2793_v47 = vpop.permute.xlu1 %2792 }
 0x267   : > { %v3086_v57 = vsel %vm3054_vm0, %v3053_v40, %v2409_v48 }
 0x268   : > { %v3119_v58 = vsel %vm3087_vm3, %v3086_v57, %v8142_v15 }
 0x269   : > { %v2279_v60 = vpop.permute.xlu0 %2278  ;;  %v3152_v45 = vsel %vm3120_vm6, %v3119_v58, %v2793_v47 }
 0x26a   : > { %v3051_v50 = vsel %vm3021_vm15, %v3018_v18, %v2279_v60  ;;  %v2921_v6 = vpop.permute.xlu1 %2920 }
 0x26b   : > { %v3084_v33 = vsel %vm3054_vm0, %v3051_v50, %v2407_v38  ;;  %v3185_v59 = vsel %vm3153_vm7, %v3152_v45, %v2921_v6 }
 0x26c   : > { %v3117_v12 = vsel %vm3087_vm3, %v3084_v33, %v2519_v31 }
 0x26d   : > { %v3150_v4 = vsel %vm3120_vm6, %v3117_v12, %v2791_v61  ;;  %v2919_v52 = vpop.permute.xlu0 %2918 }
 0x26e   : > { %v3183_v17 = vsel %vm3153_vm7, %v3150_v4, %v2919_v52 }
 0x26f   : > { %6104 = vmatprep.mubr.msk.bf16.mxu1 %vm3213_vm8, %v3183_v17 }
 0x270   : > { %6105 = vmatmul.mubr.msk.bf16.gmra.mrb[28].mxu1 %vm3213_vm8, %v3185_v59 }
 0x27a   : > { %v6078_v24 = vpop.f32.mrb[0].mxu1 }
 0x27b   : > { %v3293_v23 = vadd.f32 %v6078_v24, %v7897_v8  ;;  %v3284_v39 = vpop.f32.mrb[1].mxu1 }
 0x27c   : > { %v3285_v9 = vadd.f32 %v7897_v8, %v3284_v39  ;;  %v6079_v36 = vpop.f32.mrb[2].mxu1 }
 0x27d   : > { %v3413_v3 = vmax.f32 %v3293_v23, 0.0  ;;  %v3296_v1 = vadd.f32 %v6079_v36, %v7897_v8  ;;  %v3287_v62 = vpop.f32.mrb[3].mxu1 }
 0x27e   : > { %v3411_v14 = vmax.f32 %v3285_v9, 0.0  ;;  %v3288_v21 = vadd.f32 %v7897_v8, %v3287_v62 }
 0x27f   : > { %v3509_v51 = vcombine.high %v3413_v3, %v3413_v3  ;;  %v3516_v34 = vrot.slane %v3413_v3, %v7900_v49  ;;  %v3414_v16 = vmax.f32 %v3296_v1, 0.0 }
 0x280   : > { %v3475_v44 = vcombine.high %v3411_v14, %v3411_v14  ;;  %v3482_v48 = vrot.slane %v3411_v14, %v7900_v49  ;;  %v3412_v55 = vmax.f32 %v3288_v21, 0.0 }
 0x281   : > { %v3523_v53 = vrot.slane %v3509_v51, %v7900_v49  ;;  %v3524_v2 = vcombine.high %v3516_v34, %v3516_v34  ;;  %v3526_v29 = vcombine.high %v3414_v16, %v3414_v16  ;;  %v3533_v37 = vrot.slane %v3414_v16, %v7900_v49 }
 0x282   : > { %v3489_v10 = vrot.slane %v3475_v44, %v7900_v49  ;;  %v3490_v31 = vcombine.high %v3482_v48, %v3482_v48  ;;  %v5708_v56 = vrot.slane %v3482_v48, 9  ;;  %v5772_v7 = vrot.slane %v3516_v34, 9 }
 0x283   : > { %v3525_v0 = vcombine.high %v3523_v53, %v3523_v53  ;;  %v3540_v41 = vrot.slane %v3526_v29, %v7900_v49  ;;  %v5773_v43 = vrot.slane %v3524_v2, 9  ;;  %v3541_v28 = vcombine.high %v3533_v37, %v3533_v37 }
 0x284   : > { %v3491_v13 = vcombine.high %v3489_v10, %v3489_v10  ;;  %v5709_v19 = vrot.slane %v3490_v31, 9  ;;  %v5710_v42 = vrot.slane %v3489_v10, 9  ;;  %v4339_v11 = vadd.f32 %v5708_v56, %v3482_v48 }
 0x285   : > { %v5774_v27 = vrot.slane %v3523_v53, 9  ;;  %v5775_v20 = vrot.slane %v3525_v0, 9  ;;  %v3542_v61 = vcombine.high %v3540_v41, %v3540_v41  ;;  %v3492_v40 = vcombine.high %v3412_v55, %v3412_v55 }
 0x286   : > { %v5711_v46 = vrot.slane %v3491_v13, 9  ;;  %v4340_v38 = vadd.f32 %v5709_v19, %v3490_v31  ;;  %v4341_v22 = vadd.f32 %v5710_v42, %v3489_v10  ;;  %v4403_v26 = vadd.f32 %v4339_v11, %v3516_v34 }
 0x287   : > { %v5776_v18 = vrot.slane %v3533_v37, 9  ;;  %v5777_v15 = vrot.slane %v3541_v28, 9  ;;  %v3499_v58 = vrot.slane %v3412_v55, %v7900_v49  ;;  %v3506_v60 = vrot.slane %v3492_v40, %v7900_v49 }
 0x288   : > { %v4342_v47 = vadd.f32 %v5711_v46, %v3491_v13  ;;  %v4404_v35 = vadd.f32 %v4340_v38, %v3524_v2  ;;  %v4405_v57 = vadd.f32 %v4341_v22, %v3523_v53  ;;  %v4659_v32 = vadd.f32 %v5772_v7, %v4403_v26 }
 0x289   : > { %v3507_v12 = vcombine.high %v3499_v58, %v3499_v58  ;;  %v3508_v4 = vcombine.high %v3506_v60, %v3506_v60  ;;  %v5712_v52 = vrot.slane %v3499_v58, 9  ;;  %v5714_v17 = vrot.slane %v3506_v60, 9 }
 0x28a   : > { %v4406_v50 = vadd.f32 %v4342_v47, %v3525_v0  ;;  %v4660_v33 = vadd.f32 %v5773_v43, %v4404_v35  ;;  %v4661_v45 = vadd.f32 %v5774_v27, %v4405_v57  ;;  %v4723_v6 = vmul.f32 0.25, %v4659_v32 }
 0x28b   : > { %v5778_v5 = vrot.slane %v3540_v41, 9  ;;  %v5713_v25 = vrot.slane %v3507_v12, 9  ;;  %v5715_v54 = vrot.slane %v3508_v4, 9  ;;  %v4343_v24 = vadd.f32 %v5712_v52, %v3499_v58 }
 0x28c   : > { %v4662_v59 = vadd.f32 %v5775_v20, %v4406_v50  ;;  %v4724_v63 = vmul.f32 0.25, %v4660_v33  ;;  %v4725_v30 = vmul.f32 0.25, %v4661_v45  ;;  %v4345_v23 = vadd.f32 %v5714_v17, %v3506_v60 }
 0x28d   : > { %v5936_v9 = vpack.c.bf16 %v4723_v6, %v4723_v6  ;;  %v4344_v1 = vadd.f32 %v5713_v25, %v3507_v12  ;;  %v4346_v62 = vadd.f32 %v5715_v54, %v3508_v4  ;;  %v4407_v14 = vadd.f32 %v4343_v24, %v3533_v37 }
 0x28e   : > { %v4726_v39 = vmul.f32 0.25, %v4662_v59  ;;  %v5937_v36 = vpack.c.bf16 %v4724_v63, %v4724_v63  ;;  %v5938_v3 = vpack.c.bf16 %v4725_v30, %v4725_v30  ;;  %v4409_v51 = vadd.f32 %v4345_v23, %v3540_v41 }
 0x28f   : > { %v5779_v44 = vrot.slane %v3542_v61, 9  ;;  %v4408_v48 = vadd.f32 %v4344_v1, %v3541_v28  ;;  %v4410_v53 = vadd.f32 %v4346_v62, %v3542_v61  ;;  %v4663_v2 = vadd.f32 %v5776_v18, %v4407_v14 }
 0x290   : > { %v5939_v34 = vpack.c.bf16 %v4726_v39, %v4726_v39  ;;  %v5044_v16 = vunpack.c.l.b16 %v5937_v36  ;;  %v5045_v21 = vunpack.c.l.b16 %v5938_v3  ;;  %v4665_v29 = vadd.f32 %v5778_v5, %v4409_v51 }
 0x291   : > { %v5043_v10 = vunpack.c.l.b16 %v5936_v9  ;;  %v4664_v55 = vadd.f32 %v5777_v15, %v4408_v48  ;;  %v4666_v13 = vadd.f32 %v5779_v44, %v4410_v53  ;;  %v4727_v19 = vmul.f32 0.25, %v4663_v2 }
 0x292   : > { %v5046_v31 = vunpack.c.l.b16 %v5939_v34  ;;  %v5107_v56 = vrot.slane %v5044_v16, 7  ;;  %v5110_v0 = vrot.slane %v5045_v21, 6  ;;  %v4729_v42 = vmul.f32 0.25, %v4665_v29 }
 0x293   : > { %v4728_v7 = vmul.f32 0.25, %v4664_v55  ;;  %v4730_v43 = vmul.f32 0.25, %v4666_v13  ;;  %v5940_v46 = vpack.c.bf16 %v4727_v19, %v4727_v19 }
 0x294   : > { %v5109_v11 = vsel %vm5108_vm2, %v5107_v56, %v5043_v10  ;;  %v5113_v37 = vrot.slane %v5046_v31, 5  ;;  %v5942_v28 = vpack.c.bf16 %v4729_v42, %v4729_v42 }
 0x295   : > { %v5112_v41 = vsel %vm5111_vm4, %v5110_v0, %v5109_v11  ;;  %v5941_v22 = vpack.c.bf16 %v4728_v7, %v4728_v7  ;;  %v5943_v26 = vpack.c.bf16 %v4730_v43, %v4730_v43  ;;  %v5047_v27 = vunpack.c.l.b16 %v5940_v46 }
 0x296   : > { %v5115_v38 = vsel %vm5114_vm5, %v5113_v37, %v5112_v41  ;;  %v5049_v20 = vunpack.c.l.b16 %v5942_v28 }
 0x297   : > { %v5048_v61 = vunpack.c.l.b16 %v5941_v22  ;;  %v5050_v40 = vunpack.c.l.b16 %v5943_v26  ;;  %v5116_v47 = vrot.slane %v5047_v27, 4 }
 0x298   : > { %v5122_v58 = vrot.slane %v5049_v20, 2 }
 0x299   : > { %v5118_v57 = vsel %vm5117_vm9, %v5116_v47, %v5115_v38  ;;  %v5119_v32 = vrot.slane %v5048_v61, 3  ;;  %v5125_v45 = vrot.slane %v5050_v40, 1 }
 0x29a   : > { %v6082_v35 = vpop.f32.mrb[4].mxu1 }
 0x29b   : > { %v3309_v18 = vadd.f32 %v6082_v35, %v7897_v8  ;;  %v3300_v15 = vpop.f32.mrb[5].mxu1  ;;  %v5121_v33 = vsel %vm5120_vm10, %v5119_v32, %v5118_v57 }
 0x29c   : > { %v3301_v60 = vadd.f32 %v7897_v8, %v3300_v15  ;;  %v6083_v50 = vpop.f32.mrb[6].mxu1  ;;  %v5124_v52 = vsel %vm5123_vm11, %v5122_v58, %v5121_v33 }
 0x29d   : > { %v3417_v6 = vmax.f32 %v3309_v18, 0.0  ;;  %v3312_v12 = vadd.f32 %v6083_v50, %v7897_v8  ;;  %v3303_v4 = vpop.f32.mrb[7].mxu1  ;;  %v5127_v63 = vsel %vm5126_vm12, %v5125_v45, %v5124_v52 }
 0x29e   : > { %v3415_v17 = vmax.f32 %v3301_v60, 0.0  ;;  %v3304_v59 = vadd.f32 %v7897_v8, %v3303_v4  ;;  %v5226_v54 = vpack.c.b16 %v5127_v63, %v5127_v63 }
 0x29f   : > { %v3577_v30 = vcombine.high %v3417_v6, %v3417_v6  ;;  %v3584_v5 = vrot.slane %v3417_v6, %v7900_v49  ;;  %v3418_v25 = vmax.f32 %v3312_v12, 0.0 }
 0x2a0   : > { %v3543_v24 = vcombine.high %v3415_v17, %v3415_v17  ;;  %v3550_v23 = vrot.slane %v3415_v17, %v7900_v49  ;;  %5243 = vst.msk [vmem:[%s7927_s18] sm:$0xf] %vm253_vm1, %v5226_v54  ;;  %v3416_v16 = vmax.f32 %v3304_v59, 0.0 }
 0x2a1   : > { %v3591_v39 = vrot.slane %v3577_v30, %v7900_v49  ;;  %v3592_v9 = vcombine.high %v3584_v5, %v3584_v5  ;;  %v3594_v36 = vcombine.high %v3418_v25, %v3418_v25  ;;  %v3601_v14 = vrot.slane %v3418_v25, %v7900_v49 }
 0x2a2   : > { %v3557_v3 = vrot.slane %v3543_v24, %v7900_v49  ;;  %v3558_v1 = vcombine.high %v3550_v23, %v3550_v23  ;;  %v5716_v62 = vrot.slane %v3550_v23, 9  ;;  %v5780_v2 = vrot.slane %v3584_v5, 9 }
 0x2a3   : > { %v3593_v51 = vcombine.high %v3591_v39, %v3591_v39  ;;  %v3608_v34 = vrot.slane %v3594_v36, %v7900_v49  ;;  %v5781_v29 = vrot.slane %v3592_v9, 9  ;;  %v3609_v10 = vcombine.high %v3601_v14, %v3601_v14 }
 0x2a4   : > { %v3559_v21 = vcombine.high %v3557_v3, %v3557_v3  ;;  %v5717_v44 = vrot.slane %v3558_v1, 9  ;;  %v5718_v48 = vrot.slane %v3557_v3, 9  ;;  %v4347_v53 = vadd.f32 %v5716_v62, %v3550_v23 }
 0x2a5   : > { %v5782_v13 = vrot.slane %v3591_v39, 9  ;;  %v5783_v19 = vrot.slane %v3593_v51, 9  ;;  %v3610_v42 = vcombine.high %v3608_v34, %v3608_v34  ;;  %v3560_v11 = vcombine.high %v3416_v16, %v3416_v16 }
 0x2a6   : > { %v5719_v31 = vrot.slane %v3559_v21, 9  ;;  %v4348_v56 = vadd.f32 %v5717_v44, %v3558_v1  ;;  %v4349_v0 = vadd.f32 %v5718_v48, %v3557_v3  ;;  %v4411_v55 = vadd.f32 %v4347_v53, %v3584_v5 }
 0x2a7   : > { %v5784_v46 = vrot.slane %v3601_v14, 9  ;;  %v5785_v28 = vrot.slane %v3609_v10, 9  ;;  %v3567_v38 = vrot.slane %v3416_v16, %v7900_v49  ;;  %v3574_v22 = vrot.slane %v3560_v11, %v7900_v49 }
 0x2a8   : > { %v4350_v37 = vadd.f32 %v5719_v31, %v3559_v21  ;;  %v4412_v41 = vadd.f32 %v4348_v56, %v3592_v9  ;;  %v4413_v7 = vadd.f32 %v4349_v0, %v3591_v39  ;;  %v4667_v43 = vadd.f32 %v5780_v2, %v4411_v55 }
 0x2a9   : > { %v3575_v40 = vcombine.high %v3567_v38, %v3567_v38  ;;  %v3576_v47 = vcombine.high %v3574_v22, %v3574_v22  ;;  %v5720_v35 = vrot.slane %v3567_v38, 9  ;;  %v5722_v57 = vrot.slane %v3574_v22, 9 }
 0x2aa   : > { %v4414_v26 = vadd.f32 %v4350_v37, %v3593_v51  ;;  %v4668_v27 = vadd.f32 %v5781_v29, %v4412_v41  ;;  %v4669_v20 = vadd.f32 %v5782_v13, %v4413_v7  ;;  %v4731_v61 = vmul.f32 0.25, %v4667_v43 }
 0x2ab   : > { %v5786_v58 = vrot.slane %v3608_v34, 9  ;;  %v5721_v60 = vrot.slane %v3575_v40, 9  ;;  %v5723_v50 = vrot.slane %v3576_v47, 9  ;;  %v4351_v33 = vadd.f32 %v5720_v35, %v3567_v38 }
 0x2ac   : > { %v4670_v32 = vadd.f32 %v5783_v19, %v4414_v26  ;;  %v4732_v18 = vmul.f32 0.25, %v4668_v27  ;;  %v4733_v15 = vmul.f32 0.25, %v4669_v20  ;;  %v4353_v45 = vadd.f32 %v5722_v57, %v3574_v22 }
 0x2ad   : > { %v5944_v12 = vpack.c.bf16 %v4731_v61, %v4731_v61  ;;  %v4352_v17 = vadd.f32 %v5721_v60, %v3575_v40  ;;  %v4354_v59 = vadd.f32 %v5723_v50, %v3576_v47  ;;  %v4415_v63 = vadd.f32 %v4351_v33, %v3601_v14 }
 0x2ae   : > { %v4734_v6 = vmul.f32 0.25, %v4670_v32  ;;  %v5945_v4 = vpack.c.bf16 %v4732_v18, %v4732_v18  ;;  %v5946_v52 = vpack.c.bf16 %v4733_v15, %v4733_v15  ;;  %v4417_v30 = vadd.f32 %v4353_v45, %v3608_v34 }
 0x2af   : > { %v5787_v24 = vrot.slane %v3610_v42, 9  ;;  %v4416_v23 = vadd.f32 %v4352_v17, %v3609_v10  ;;  %v4418_v39 = vadd.f32 %v4354_v59, %v3610_v42  ;;  %v4671_v9 = vadd.f32 %v5784_v46, %v4415_v63 }
 0x2b0   : > { %v5947_v5 = vpack.c.bf16 %v4734_v6, %v4734_v6  ;;  %v5052_v25 = vunpack.c.l.b16 %v5945_v4  ;;  %v5053_v54 = vunpack.c.l.b16 %v5946_v52  ;;  %v4673_v36 = vadd.f32 %v5786_v58, %v4417_v30 }
 0x2b1   : > { %v5051_v3 = vunpack.c.l.b16 %v5944_v12  ;;  %v4672_v16 = vadd.f32 %v5785_v28, %v4416_v23  ;;  %v4674_v21 = vadd.f32 %v5787_v24, %v4418_v39  ;;  %v4735_v44 = vmul.f32 0.25, %v4671_v9 }
 0x2b2   : > { %v5054_v1 = vunpack.c.l.b16 %v5947_v5  ;;  %v5128_v62 = vrot.slane %v5052_v25, 7  ;;  %v5130_v51 = vrot.slane %v5053_v54, 6  ;;  %v4737_v48 = vmul.f32 0.25, %v4673_v36 }
 0x2b3   : > { %v4736_v2 = vmul.f32 0.25, %v4672_v16  ;;  %v4738_v29 = vmul.f32 0.25, %v4674_v21  ;;  %v5948_v31 = vpack.c.bf16 %v4735_v44, %v4735_v44 }
 0x2b4   : > { %v5129_v53 = vsel %vm5108_vm2, %v5128_v62, %v5051_v3  ;;  %v5132_v14 = vrot.slane %v5054_v1, 5  ;;  %v5950_v10 = vpack.c.bf16 %v4737_v48, %v4737_v48 }
 0x2b5   : > { %v5131_v34 = vsel %vm5111_vm4, %v5130_v51, %v5129_v53  ;;  %v5949_v0 = vpack.c.bf16 %v4736_v2, %v4736_v2  ;;  %v5951_v55 = vpack.c.bf16 %v4738_v29, %v4738_v29  ;;  %v5055_v13 = vunpack.c.l.b16 %v5948_v31 }
 0x2b6   : > { %v5133_v56 = vsel %vm5114_vm5, %v5132_v14, %v5131_v34  ;;  %v5057_v19 = vunpack.c.l.b16 %v5950_v10 }
 0x2b7   : > { %v5056_v42 = vunpack.c.l.b16 %v5949_v0  ;;  %v5058_v11 = vunpack.c.l.b16 %v5951_v55  ;;  %v5134_v37 = vrot.slane %v5055_v13, 4 }
 0x2b8   : > { %v5138_v38 = vrot.slane %v5057_v19, 2 }
 0x2b9   : > { %v5135_v7 = vsel %vm5117_vm9, %v5134_v37, %v5133_v56  ;;  %v5136_v43 = vrot.slane %v5056_v42, 3  ;;  %v5140_v20 = vrot.slane %v5058_v11, 1 }
 0x2ba   : > { %v6086_v41 = vpop.f32.mrb[8].mxu1 }
 0x2bb   : > { %v3325_v46 = vadd.f32 %v6086_v41, %v7897_v8  ;;  %v3316_v28 = vpop.f32.mrb[9].mxu1  ;;  %v5137_v27 = vsel %vm5120_vm10, %v5136_v43, %v5135_v7 }
 0x2bc   : > { %v3317_v22 = vadd.f32 %v7897_v8, %v3316_v28  ;;  %v6087_v26 = vpop.f32.mrb[10].mxu1  ;;  %v5139_v35 = vsel %vm5123_vm11, %v5138_v38, %v5137_v27 }
 0x2bd   : > { %v3421_v61 = vmax.f32 %v3325_v46, 0.0  ;;  %v3328_v40 = vadd.f32 %v6087_v26, %v7897_v8  ;;  %v3319_v47 = vpop.f32.mrb[11].mxu1  ;;  %v5141_v18 = vsel %vm5126_vm12, %v5140_v20, %v5139_v35 }
 0x2be   : > { %v3419_v57 = vmax.f32 %v3317_v22, 0.0  ;;  %v3320_v32 = vadd.f32 %v7897_v8, %v3319_v47  ;;  %v5227_v50 = vpack.c.b16 %v5141_v18, %v5141_v18 }
 0x2bf   : > { %v3645_v15 = vcombine.high %v3421_v61, %v3421_v61  ;;  %v3652_v58 = vrot.slane %v3421_v61, %v7900_v49  ;;  %v3422_v60 = vmax.f32 %v3328_v40, 0.0 }
 0x2c0   : > { %v3611_v33 = vcombine.high %v3419_v57, %v3419_v57  ;;  %v3618_v45 = vrot.slane %v3419_v57, %v7900_v49  ;;  %5244 = vst.msk [vmem:[%s7927_s18 + $0x4] sm:$0xf] %vm253_vm1, %v5227_v50  ;;  %v3420_v25 = vmax.f32 %v3320_v32, 0.0 }
 0x2c1   : > { %v3659_v6 = vrot.slane %v3645_v15, %v7900_v49  ;;  %v3660_v12 = vcombine.high %v3652_v58, %v3652_v58  ;;  %v3662_v4 = vcombine.high %v3422_v60, %v3422_v60  ;;  %v3669_v63 = vrot.slane %v3422_v60, %v7900_v49 }
 0x2c2   : > { %v3625_v52 = vrot.slane %v3611_v33, %v7900_v49  ;;  %v3626_v17 = vcombine.high %v3618_v45, %v3618_v45  ;;  %v5724_v59 = vrot.slane %v3618_v45, 9  ;;  %v5788_v9 = vrot.slane %v3652_v58, 9 }
 0x2c3   : > { %v3661_v30 = vcombine.high %v3659_v6, %v3659_v6  ;;  %v3676_v5 = vrot.slane %v3662_v4, %v7900_v49  ;;  %v5789_v36 = vrot.slane %v3660_v12, 9  ;;  %v3677_v3 = vcombine.high %v3669_v63, %v3669_v63 }
 0x2c4   : > { %v3627_v54 = vcombine.high %v3625_v52, %v3625_v52  ;;  %v5725_v24 = vrot.slane %v3626_v17, 9  ;;  %v5726_v23 = vrot.slane %v3625_v52, 9  ;;  %v4355_v39 = vadd.f32 %v5724_v59, %v3618_v45 }
 0x2c5   : > { %v5790_v21 = vrot.slane %v3659_v6, 9  ;;  %v5791_v44 = vrot.slane %v3661_v30, 9  ;;  %v3678_v48 = vcombine.high %v3676_v5, %v3676_v5  ;;  %v3628_v53 = vcombine.high %v3420_v25, %v3420_v25 }
 0x2c6   : > { %v5727_v1 = vrot.slane %v3627_v54, 9  ;;  %v4356_v62 = vadd.f32 %v5725_v24, %v3626_v17  ;;  %v4357_v51 = vadd.f32 %v5726_v23, %v3625_v52  ;;  %v4419_v16 = vadd.f32 %v4355_v39, %v3652_v58 }
 0x2c7   : > { %v5792_v31 = vrot.slane %v3669_v63, 9  ;;  %v5793_v10 = vrot.slane %v3677_v3, 9  ;;  %v3635_v56 = vrot.slane %v3420_v25, %v7900_v49  ;;  %v3642_v0 = vrot.slane %v3628_v53, %v7900_v49 }
 0x2c8   : > { %v4358_v14 = vadd.f32 %v5727_v1, %v3627_v54  ;;  %v4420_v34 = vadd.f32 %v4356_v62, %v3660_v12  ;;  %v4421_v2 = vadd.f32 %v4357_v51, %v3659_v6  ;;  %v4675_v29 = vadd.f32 %v5788_v9, %v4419_v16 }
 0x2c9   : > { %v3643_v11 = vcombine.high %v3635_v56, %v3635_v56  ;;  %v3644_v37 = vcombine.high %v3642_v0, %v3642_v0  ;;  %v5728_v41 = vrot.slane %v3635_v56, 9  ;;  %v5730_v7 = vrot.slane %v3642_v0, 9 }
 0x2ca   : > { %v4422_v55 = vadd.f32 %v4358_v14, %v3661_v30  ;;  %v4676_v13 = vadd.f32 %v5789_v36, %v4420_v34  ;;  %v4677_v19 = vadd.f32 %v5790_v21, %v4421_v2  ;;  %v4739_v42 = vmul.f32 0.25, %v4675_v29 }
 0x2cb   : > { %v5794_v38 = vrot.slane %v3676_v5, 9  ;;  %v5729_v22 = vrot.slane %v3643_v11, 9  ;;  %v5731_v26 = vrot.slane %v3644_v37, 9  ;;  %v4359_v27 = vadd.f32 %v5728_v41, %v3635_v56 }
 0x2cc   : > { %v4678_v43 = vadd.f32 %v5791_v44, %v4422_v55  ;;  %v4740_v46 = vmul.f32 0.25, %v4676_v13  ;;  %v4741_v28 = vmul.f32 0.25, %v4677_v19  ;;  %v4361_v20 = vadd.f32 %v5730_v7, %v3642_v0 }
 0x2cd   : > { %v5952_v40 = vpack.c.bf16 %v4739_v42, %v4739_v42  ;;  %v4360_v57 = vadd.f32 %v5729_v22, %v3643_v11  ;;  %v4362_v32 = vadd.f32 %v5731_v26, %v3644_v37  ;;  %v4423_v18 = vadd.f32 %v4359_v27, %v3669_v63 }
 0x2ce   : > { %v4742_v61 = vmul.f32 0.25, %v4678_v43  ;;  %v5953_v47 = vpack.c.bf16 %v4740_v46, %v4740_v46  ;;  %v5954_v35 = vpack.c.bf16 %v4741_v28, %v4741_v28  ;;  %v4425_v15 = vadd.f32 %v4361_v20, %v3676_v5 }
 0x2cf   : > { %v5795_v33 = vrot.slane %v3678_v48, 9  ;;  %v4424_v45 = vadd.f32 %v4360_v57, %v3677_v3  ;;  %v4426_v6 = vadd.f32 %v4362_v32, %v3678_v48  ;;  %v4679_v12 = vadd.f32 %v5792_v31, %v4423_v18 }
 0x2d0   : > { %v5955_v58 = vpack.c.bf16 %v4742_v61, %v4742_v61  ;;  %v5060_v60 = vunpack.c.l.b16 %v5953_v47  ;;  %v5061_v50 = vunpack.c.l.b16 %v5954_v35  ;;  %v4681_v4 = vadd.f32 %v5794_v38, %v4425_v15 }
 0x2d1   : > { %v5059_v52 = vunpack.c.l.b16 %v5952_v40  ;;  %v4680_v25 = vadd.f32 %v5793_v10, %v4424_v45  ;;  %v4682_v54 = vadd.f32 %v5795_v33, %v4426_v6  ;;  %v4743_v24 = vmul.f32 0.25, %v4679_v12 }
 0x2d2   : > { %v5062_v17 = vunpack.c.l.b16 %v5955_v58  ;;  %v5142_v59 = vrot.slane %v5060_v60, 7  ;;  %v5144_v30 = vrot.slane %v5061_v50, 6  ;;  %v4745_v23 = vmul.f32 0.25, %v4681_v4 }
 0x2d3   : > { %v4744_v9 = vmul.f32 0.25, %v4680_v25  ;;  %v4746_v36 = vmul.f32 0.25, %v4682_v54  ;;  %v5956_v1 = vpack.c.bf16 %v4743_v24, %v4743_v24 }
 0x2d4   : > { %v5143_v39 = vsel %vm5108_vm2, %v5142_v59, %v5059_v52  ;;  %v5146_v63 = vrot.slane %v5062_v17, 5  ;;  %v5958_v3 = vpack.c.bf16 %v4745_v23, %v4745_v23 }
 0x2d5   : > { %v5145_v5 = vsel %vm5111_vm4, %v5144_v30, %v5143_v39  ;;  %v5957_v51 = vpack.c.bf16 %v4744_v9, %v4744_v9  ;;  %v5959_v16 = vpack.c.bf16 %v4746_v36, %v4746_v36  ;;  %v5063_v21 = vunpack.c.l.b16 %v5956_v1 }
 0x2d6   : > { %v5147_v62 = vsel %vm5114_vm5, %v5146_v63, %v5145_v5  ;;  %v5065_v44 = vunpack.c.l.b16 %v5958_v3 }
 0x2d7   : > { %v5064_v48 = vunpack.c.l.b16 %v5957_v51  ;;  %v5066_v53 = vunpack.c.l.b16 %v5959_v16  ;;  %v5148_v14 = vrot.slane %v5063_v21, 4 }
 0x2d8   : > { %v5152_v56 = vrot.slane %v5065_v44, 2 }
 0x2d9   : > { %v5149_v2 = vsel %vm5117_vm9, %v5148_v14, %v5147_v62  ;;  %v5150_v29 = vrot.slane %v5064_v48, 3  ;;  %v5154_v19 = vrot.slane %v5066_v53, 1 }
 0x2da   : > { %v6090_v34 = vpop.f32.mrb[12].mxu1 }
 0x2db   : > { %v3341_v31 = vadd.f32 %v6090_v34, %v7897_v8  ;;  %v3332_v10 = vpop.f32.mrb[13].mxu1  ;;  %v5151_v13 = vsel %vm5120_vm10, %v5150_v29, %v5149_v2 }
 0x2dc   : > { %v3333_v0 = vadd.f32 %v7897_v8, %v3332_v10  ;;  %v6091_v55 = vpop.f32.mrb[14].mxu1  ;;  %v5153_v41 = vsel %vm5123_vm11, %v5152_v56, %v5151_v13 }
 0x2dd   : > { %v3425_v42 = vmax.f32 %v3341_v31, 0.0  ;;  %v3344_v11 = vadd.f32 %v6091_v55, %v7897_v8  ;;  %v3335_v37 = vpop.f32.mrb[15].mxu1  ;;  %v5155_v46 = vsel %vm5126_vm12, %v5154_v19, %v5153_v41 }
 0x2de   : > { %v3423_v7 = vmax.f32 %v3333_v0, 0.0  ;;  %v3336_v43 = vadd.f32 %v7897_v8, %v3335_v37  ;;  %v5228_v26 = vpack.c.b16 %v5155_v46, %v5155_v46 }
 0x2df   : > { %v3713_v28 = vcombine.high %v3425_v42, %v3425_v42  ;;  %v3720_v38 = vrot.slane %v3425_v42, %v7900_v49  ;;  %v3426_v22 = vmax.f32 %v3344_v11, 0.0 }
 0x2e0   : > { %v3679_v27 = vcombine.high %v3423_v7, %v3423_v7  ;;  %v3686_v20 = vrot.slane %v3423_v7, %v7900_v49  ;;  %5245 = vst.msk [vmem:[%s7927_s18 + $0x8] sm:$0xf] %vm253_vm1, %v5228_v26  ;;  %v3424_v60 = vmax.f32 %v3336_v43, 0.0 }
 0x2e1   : > { %v3727_v61 = vrot.slane %v3713_v28, %v7900_v49  ;;  %v3728_v40 = vcombine.high %v3720_v38, %v3720_v38  ;;  %v3730_v47 = vcombine.high %v3426_v22, %v3426_v22  ;;  %v3737_v18 = vrot.slane %v3426_v22, %v7900_v49 }
 0x2e2   : > { %v3693_v35 = vrot.slane %v3679_v27, %v7900_v49  ;;  %v3694_v57 = vcombine.high %v3686_v20, %v3686_v20  ;;  %v5732_v32 = vrot.slane %v3686_v20, 9  ;;  %v5796_v12 = vrot.slane %v3720_v38, 9 }
 0x2e3   : > { %v3729_v15 = vcombine.high %v3727_v61, %v3727_v61  ;;  %v3744_v58 = vrot.slane %v3730_v47, %v7900_v49  ;;  %v5797_v4 = vrot.slane %v3728_v40, 9  ;;  %v3745_v52 = vcombine.high %v3737_v18, %v3737_v18 }
 0x2e4   : > { %v3695_v50 = vcombine.high %v3693_v35, %v3693_v35  ;;  %v5733_v33 = vrot.slane %v3694_v57, 9  ;;  %v5734_v45 = vrot.slane %v3693_v35, 9  ;;  %v4363_v6 = vadd.f32 %v5732_v32, %v3686_v20 }
 0x2e5   : > { %v5798_v54 = vrot.slane %v3727_v61, 9  ;;  %v5799_v24 = vrot.slane %v3729_v15, 9  ;;  %v3746_v23 = vcombine.high %v3744_v58, %v3744_v58  ;;  %v3696_v39 = vcombine.high %v3424_v60, %v3424_v60 }
 0x2e6   : > { %v5735_v17 = vrot.slane %v3695_v50, 9  ;;  %v4364_v59 = vadd.f32 %v5733_v33, %v3694_v57  ;;  %v4365_v30 = vadd.f32 %v5734_v45, %v3693_v35  ;;  %v4427_v25 = vadd.f32 %v4363_v6, %v3720_v38 }
 0x2e7   : > { %v5800_v1 = vrot.slane %v3737_v18, 9  ;;  %v5801_v3 = vrot.slane %v3745_v52, 9  ;;  %v3703_v62 = vrot.slane %v3424_v60, %v7900_v49  ;;  %v3710_v51 = vrot.slane %v3696_v39, %v7900_v49 }
 0x2e8   : > { %v4366_v63 = vadd.f32 %v5735_v17, %v3695_v50  ;;  %v4428_v5 = vadd.f32 %v4364_v59, %v3728_v40  ;;  %v4429_v9 = vadd.f32 %v4365_v30, %v3727_v61  ;;  %v4683_v36 = vadd.f32 %v5796_v12, %v4427_v25 }
 0x2e9   : > { %v3711_v53 = vcombine.high %v3703_v62, %v3703_v62  ;;  %v3712_v14 = vcombine.high %v3710_v51, %v3710_v51  ;;  %v5736_v34 = vrot.slane %v3703_v62, 9  ;;  %v5738_v2 = vrot.slane %v3710_v51, 9 }
 0x2ea   : > { %v4430_v16 = vadd.f32 %v4366_v63, %v3729_v15  ;;  %v4684_v21 = vadd.f32 %v5797_v4, %v4428_v5  ;;  %v4685_v44 = vadd.f32 %v5798_v54, %v4429_v9  ;;  %v4747_v48 = vmul.f32 0.25, %v4683_v36 }
 0x2eb   : > { %v5802_v56 = vrot.slane %v3744_v58, 9  ;;  %v5737_v0 = vrot.slane %v3711_v53, 9  ;;  %v5739_v55 = vrot.slane %v3712_v14, 9  ;;  %v4367_v13 = vadd.f32 %v5736_v34, %v3703_v62 }
 0x2ec   : > { %v4686_v29 = vadd.f32 %v5799_v24, %v4430_v16  ;;  %v4748_v31 = vmul.f32 0.25, %v4684_v21  ;;  %v4749_v10 = vmul.f32 0.25, %v4685_v44  ;;  %v4369_v19 = vadd.f32 %v5738_v2, %v3710_v51 }
 0x2ed   : > { %v5960_v11 = vpack.c.bf16 %v4747_v48, %v4747_v48  ;;  %v4368_v7 = vadd.f32 %v5737_v0, %v3711_v53  ;;  %v4370_v43 = vadd.f32 %v5739_v55, %v3712_v14  ;;  %v4431_v46 = vadd.f32 %v4367_v13, %v3737_v18 }
 0x2ee   : > { %v4750_v42 = vmul.f32 0.25, %v4686_v29  ;;  %v5961_v37 = vpack.c.bf16 %v4748_v31, %v4748_v31  ;;  %v5962_v41 = vpack.c.bf16 %v4749_v10, %v4749_v10  ;;  %v4433_v28 = vadd.f32 %v4369_v19, %v3744_v58 }
 0x2ef   : > { %v5803_v27 = vrot.slane %v3746_v23, 9  ;;  %v4432_v20 = vadd.f32 %v4368_v7, %v3745_v52  ;;  %v4434_v61 = vadd.f32 %v4370_v43, %v3746_v23  ;;  %v4687_v40 = vadd.f32 %v5800_v1, %v4431_v46 }
 0x2f0   : > { %v5963_v38 = vpack.c.bf16 %v4750_v42, %v4750_v42  ;;  %v5068_v22 = vunpack.c.l.b16 %v5961_v37  ;;  %v5069_v26 = vunpack.c.l.b16 %v5962_v41  ;;  %v4689_v47 = vadd.f32 %v5802_v56, %v4433_v28 }
 0x2f1   : > { %v5067_v35 = vunpack.c.l.b16 %v5960_v11  ;;  %v4688_v60 = vadd.f32 %v5801_v3, %v4432_v20  ;;  %v4690_v50 = vadd.f32 %v5803_v27, %v4434_v61  ;;  %v4751_v33 = vmul.f32 0.25, %v4687_v40 }
 0x2f2   : > { %v5070_v57 = vunpack.c.l.b16 %v5963_v38  ;;  %v5156_v32 = vrot.slane %v5068_v22, 7  ;;  %v5158_v15 = vrot.slane %v5069_v26, 6  ;;  %v4753_v45 = vmul.f32 0.25, %v4689_v47 }
 0x2f3   : > { %v4752_v12 = vmul.f32 0.25, %v4688_v60  ;;  %v4754_v4 = vmul.f32 0.25, %v4690_v50  ;;  %v5964_v17 = vpack.c.bf16 %v4751_v33, %v4751_v33 }
 0x2f4   : > { %v5157_v6 = vsel %vm5108_vm2, %v5156_v32, %v5067_v35  ;;  %v5160_v18 = vrot.slane %v5070_v57, 5  ;;  %v5966_v52 = vpack.c.bf16 %v4753_v45, %v4753_v45 }
 0x2f5   : > { %v5159_v58 = vsel %vm5111_vm4, %v5158_v15, %v5157_v6  ;;  %v5965_v30 = vpack.c.bf16 %v4752_v12, %v4752_v12  ;;  %v5967_v25 = vpack.c.bf16 %v4754_v4, %v4754_v4  ;;  %v5071_v54 = vunpack.c.l.b16 %v5964_v17 }
 0x2f6   : > { %v5161_v59 = vsel %vm5114_vm5, %v5160_v18, %v5159_v58  ;;  %v5073_v24 = vunpack.c.l.b16 %v5966_v52 }
 0x2f7   : > { %v5072_v23 = vunpack.c.l.b16 %v5965_v30  ;;  %v5074_v39 = vunpack.c.l.b16 %v5967_v25  ;;  %v5162_v63 = vrot.slane %v5071_v54, 4 }
 0x2f8   : > { %v5166_v62 = vrot.slane %v5073_v24, 2 }
 0x2f9   : > { %v5163_v9 = vsel %vm5117_vm9, %v5162_v63, %v5161_v59  ;;  %v5164_v36 = vrot.slane %v5072_v23, 3  ;;  %v5168_v44 = vrot.slane %v5074_v39, 1 }
 0x2fa   : > { %v6094_v5 = vpop.f32.mrb[16].mxu1 }
 0x2fb   : > { %v3357_v1 = vadd.f32 %v6094_v5, %v7897_v8  ;;  %v3348_v3 = vpop.f32.mrb[17].mxu1  ;;  %v5165_v21 = vsel %vm5120_vm10, %v5164_v36, %v5163_v9 }
 0x2fc   : > { %v3349_v51 = vadd.f32 %v7897_v8, %v3348_v3  ;;  %v6095_v16 = vpop.f32.mrb[18].mxu1  ;;  %v5167_v34 = vsel %vm5123_vm11, %v5166_v62, %v5165_v21 }
 0x2fd   : > { %v3429_v48 = vmax.f32 %v3357_v1, 0.0  ;;  %v3360_v53 = vadd.f32 %v6095_v16, %v7897_v8  ;;  %v3351_v14 = vpop.f32.mrb[19].mxu1  ;;  %v5169_v31 = vsel %vm5126_vm12, %v5168_v44, %v5167_v34 }
 0x2fe   : > { %v3427_v2 = vmax.f32 %v3349_v51, 0.0  ;;  %v3352_v29 = vadd.f32 %v7897_v8, %v3351_v14  ;;  %v5229_v55 = vpack.c.b16 %v5169_v31, %v5169_v31 }
 0x2ff   : > { %v3781_v10 = vcombine.high %v3429_v48, %v3429_v48  ;;  %v3788_v56 = vrot.slane %v3429_v48, %v7900_v49  ;;  %v3430_v0 = vmax.f32 %v3360_v53, 0.0 }
 0x300   : > { %v3747_v13 = vcombine.high %v3427_v2, %v3427_v2  ;;  %v3754_v19 = vrot.slane %v3427_v2, %v7900_v49  ;;  %5246 = vst.msk [vmem:[%s7927_s18 + $0xc] sm:$0xf] %vm253_vm1, %v5229_v55  ;;  %v3428_v38 = vmax.f32 %v3352_v29, 0.0 }
 0x301   : > { %v3795_v42 = vrot.slane %v3781_v10, %v7900_v49  ;;  %v3796_v11 = vcombine.high %v3788_v56, %v3788_v56  ;;  %v3798_v37 = vcombine.high %v3430_v0, %v3430_v0  ;;  %v3805_v43 = vrot.slane %v3430_v0, %v7900_v49 }
 0x302   : > { %v3761_v41 = vrot.slane %v3747_v13, %v7900_v49  ;;  %v3762_v7 = vcombine.high %v3754_v19, %v3754_v19  ;;  %v5740_v8 = vrot.slane %v3754_v19, 9  ;;  %v5804_v61 = vrot.slane %v3788_v56, 9 }
 0x303   : > { %v3797_v46 = vcombine.high %v3795_v42, %v3795_v42  ;;  %v3812_v28 = vrot.slane %v3798_v37, %v7900_v49  ;;  %v5805_v40 = vrot.slane %v3796_v11, 9  ;;  %v3813_v47 = vcombine.high %v3805_v43, %v3805_v43 }
 0x304   : > { %v3763_v22 = vcombine.high %v3761_v41, %v3761_v41  ;;  %v5741_v26 = vrot.slane %v3762_v7, 9  ;;  %v5742_v27 = vrot.slane %v3761_v41, 9  ;;  %v4371_v20 = vadd.f32 %v5740_v8, %v3754_v19 }
 0x305   : > { %v5806_v60 = vrot.slane %v3795_v42, 9  ;;  %v5807_v50 = vrot.slane %v3797_v46, 9  ;;  %v3814_v33 = vcombine.high %v3812_v28, %v3812_v28  ;;  %v3764_v45 = vcombine.high %v3428_v38, %v3428_v38 }
 0x306   : > { %v5743_v35 = vrot.slane %v3763_v22, 9  ;;  %v4372_v57 = vadd.f32 %v5741_v26, %v3762_v7  ;;  %v4373_v32 = vadd.f32 %v5742_v27, %v3761_v41  ;;  %v4435_v15 = vadd.f32 %v4371_v20, %v3788_v56 }
 0x307   : > { %v5808_v4 = vrot.slane %v3805_v43, 9  ;;  %v5809_v17 = vrot.slane %v3813_v47, 9  ;;  %v3771_v52 = vrot.slane %v3428_v38, %v7900_v49  ;;  %v3778_v59 = vrot.slane %v3764_v45, %v7900_v49 }
 0x308   : > { %v4374_v6 = vadd.f32 %v5743_v35, %v3763_v22  ;;  %v4436_v18 = vadd.f32 %v4372_v57, %v3796_v11  ;;  %v4437_v58 = vadd.f32 %v4373_v32, %v3795_v42  ;;  %v4691_v12 = vadd.f32 %v5804_v61, %v4435_v15 }
 0x309   : > { %v3779_v23 = vcombine.high %v3771_v52, %v3771_v52  ;;  %v3780_v39 = vcombine.high %v3778_v59, %v3778_v59  ;;  %v5744_v63 = vrot.slane %v3771_v52, 9  ;;  %v5746_v5 = vrot.slane %v3778_v59, 9 }
 0x30a   : > { %v4438_v30 = vadd.f32 %v4374_v6, %v3797_v46  ;;  %v4692_v25 = vadd.f32 %v5805_v40, %v4436_v18  ;;  %v4693_v54 = vadd.f32 %v5806_v60, %v4437_v58  ;;  %v4755_v24 = vmul.f32 0.25, %v4691_v12  ;;  %v8010_v12 = vld [vmem:[%s8099_s4] ss:$0 sm:$0xff] }
 0x30b   : > { %v5810_v3 = vrot.slane %v3812_v28, 9  ;;  %v5745_v62 = vrot.slane %v3779_v23, 9  ;;  %v5747_v51 = vrot.slane %v3780_v39, 9  ;;  %v4375_v16 = vadd.f32 %v5744_v63, %v3771_v52 }
 0x30c   : > { %v4694_v9 = vadd.f32 %v5807_v50, %v4438_v30  ;;  %v4756_v36 = vmul.f32 0.25, %v4692_v25  ;;  %v4757_v1 = vmul.f32 0.25, %v4693_v54  ;;  %v4377_v21 = vadd.f32 %v5746_v5, %v3778_v59 }
 0x30d   : > { %v5968_v48 = vpack.c.bf16 %v4755_v24, %v4755_v24  ;;  %v4376_v34 = vadd.f32 %v5745_v62, %v3779_v23  ;;  %v4378_v2 = vadd.f32 %v5747_v51, %v3780_v39  ;;  %v4439_v29 = vadd.f32 %v4375_v16, %v3805_v43 }
 0x30e   : > { %v4758_v44 = vmul.f32 0.25, %v4694_v9  ;;  %v5969_v53 = vpack.c.bf16 %v4756_v36, %v4756_v36  ;;  %v5970_v14 = vpack.c.bf16 %v4757_v1, %v4757_v1  ;;  %v4441_v31 = vadd.f32 %v4377_v21, %v3812_v28 }
 0x30f   : > { %v5811_v55 = vrot.slane %v3814_v33, 9  ;;  %v4440_v13 = vadd.f32 %v4376_v34, %v3813_v47  ;;  %v4442_v19 = vadd.f32 %v4378_v2, %v3814_v33  ;;  %v4695_v42 = vadd.f32 %v5808_v4, %v4439_v29 }
 0x310   : > { %v5971_v10 = vpack.c.bf16 %v4758_v44, %v4758_v44  ;;  %v5076_v56 = vunpack.c.l.b16 %v5969_v53  ;;  %v5077_v0 = vunpack.c.l.b16 %v5970_v14  ;;  %v4697_v11 = vadd.f32 %v5810_v3, %v4441_v31 }
 0x311   : > { %v5075_v37 = vunpack.c.l.b16 %v5968_v48  ;;  %v4696_v46 = vadd.f32 %v5809_v17, %v4440_v13  ;;  %v4698_v38 = vadd.f32 %v5811_v55, %v4442_v19  ;;  %v4759_v22 = vmul.f32 0.25, %v4695_v42 }
 0x312   : > { %v5078_v41 = vunpack.c.l.b16 %v5971_v10  ;;  %v5170_v7 = vrot.slane %v5076_v56, 7  ;;  %v5172_v8 = vrot.slane %v5077_v0, 6  ;;  %v4761_v26 = vmul.f32 0.25, %v4697_v11 }
 0x313   : > { %v4760_v20 = vmul.f32 0.25, %v4696_v46  ;;  %v4762_v61 = vmul.f32 0.25, %v4698_v38  ;;  %v5972_v40 = vpack.c.bf16 %v4759_v22, %v4759_v22 }
 0x314   : > { %v5171_v27 = vsel %vm5108_vm2, %v5170_v7, %v5075_v37  ;;  %v5174_v43 = vrot.slane %v5078_v41, 5  ;;  %v5974_v47 = vpack.c.bf16 %v4761_v26, %v4761_v26 }
 0x315   : > { %v5173_v28 = vsel %vm5111_vm4, %v5172_v8, %v5171_v27  ;;  %v5973_v57 = vpack.c.bf16 %v4760_v20, %v4760_v20  ;;  %v5975_v32 = vpack.c.bf16 %v4762_v61, %v4762_v61  ;;  %v5079_v15 = vunpack.c.l.b16 %v5972_v40 }
 0x316   : > { %v5175_v35 = vsel %vm5114_vm5, %v5174_v43, %v5173_v28  ;;  %v5081_v60 = vunpack.c.l.b16 %v5974_v47 }
 0x317   : > { %v5080_v50 = vunpack.c.l.b16 %v5973_v57  ;;  %v5082_v33 = vunpack.c.l.b16 %v5975_v32  ;;  %v5176_v45 = vrot.slane %v5079_v15, 4 }
 0x318   : > { %v5180_v52 = vrot.slane %v5081_v60, 2 }
 0x319   : > { %v5177_v18 = vsel %vm5117_vm9, %v5176_v45, %v5175_v35  ;;  %v5178_v58 = vrot.slane %v5080_v50, 3  ;;  %v5182_v54 = vrot.slane %v5082_v33, 1 }
 0x31a   : > { %v6098_v6 = vpop.f32.mrb[20].mxu1 }
 0x31b   : > { %v3373_v4 = vadd.f32 %v8010_v12, %v6098_v6  ;;  %v3364_v17 = vpop.f32.mrb[21].mxu1  ;;  %v5179_v25 = vsel %vm5120_vm10, %v5178_v58, %v5177_v18 }
 0x31c   : > { %v3365_v59 = vadd.f32 %v8010_v12, %v3364_v17  ;;  %v6099_v30 = vpop.f32.mrb[22].mxu1  ;;  %v5181_v63 = vsel %vm5123_vm11, %v5180_v52, %v5179_v25 }
 0x31d   : > { %v3433_v24 = vmax.f32 %v3373_v4, 0.0  ;;  %v3376_v23 = vadd.f32 %v8010_v12, %v6099_v30  ;;  %v3367_v39 = vpop.f32.mrb[23].mxu1  ;;  %v5183_v36 = vsel %vm5126_vm12, %v5182_v54, %v5181_v63 }
 0x31e   : > { %v3431_v5 = vmax.f32 %v3365_v59, 0.0  ;;  %v3368_v9 = vadd.f32 %v8010_v12, %v3367_v39  ;;  %v5230_v51 = vpack.c.b16 %v5183_v36, %v5183_v36 }
 0x31f   : > { %v3849_v1 = vcombine.high %v3433_v24, %v3433_v24  ;;  %v3856_v3 = vrot.slane %v3433_v24, %v7900_v49  ;;  %v3434_v62 = vmax.f32 %v3376_v23, 0.0 }
 0x320   : > { %v3815_v16 = vcombine.high %v3431_v5, %v3431_v5  ;;  %v3822_v21 = vrot.slane %v3431_v5, %v7900_v49  ;;  %5247 = vst.msk [vmem:[%s7927_s18 + $0x10] sm:$0xf] %vm253_vm1, %v5230_v51  ;;  %v3432_v56 = vmax.f32 %v3368_v9, 0.0 }
 0x321   : > { %v3863_v44 = vrot.slane %v3849_v1, %v7900_v49  ;;  %v3864_v48 = vcombine.high %v3856_v3, %v3856_v3  ;;  %v3866_v53 = vcombine.high %v3434_v62, %v3434_v62  ;;  %v3873_v29 = vrot.slane %v3434_v62, %v7900_v49 }
 0x322   : > { %v3829_v14 = vrot.slane %v3815_v16, %v7900_v49  ;;  %v3830_v34 = vcombine.high %v3822_v21, %v3822_v21  ;;  %v5748_v2 = vrot.slane %v3822_v21, 9  ;;  %v5812_v42 = vrot.slane %v3856_v3, 9 }
 0x323   : > { %v3865_v31 = vcombine.high %v3863_v44, %v3863_v44  ;;  %v3880_v10 = vrot.slane %v3866_v53, %v7900_v49  ;;  %v5813_v11 = vrot.slane %v3864_v48, 9  ;;  %v3881_v37 = vcombine.high %v3873_v29, %v3873_v29 }
 0x324   : > { %v3831_v0 = vcombine.high %v3829_v14, %v3829_v14  ;;  %v5749_v55 = vrot.slane %v3830_v34, 9  ;;  %v5750_v13 = vrot.slane %v3829_v14, 9  ;;  %v4379_v19 = vadd.f32 %v5748_v2, %v3822_v21 }
 0x325   : > { %v5814_v38 = vrot.slane %v3863_v44, 9  ;;  %v5815_v22 = vrot.slane %v3865_v31, 9  ;;  %v3882_v26 = vcombine.high %v3880_v10, %v3880_v10  ;;  %v3832_v27 = vcombine.high %v3432_v56, %v3432_v56 }
 0x326   : > { %v5751_v41 = vrot.slane %v3831_v0, 9  ;;  %v4380_v7 = vadd.f32 %v5749_v55, %v3830_v34  ;;  %v4381_v8 = vadd.f32 %v5750_v13, %v3829_v14  ;;  %v4443_v46 = vadd.f32 %v4379_v19, %v3856_v3 }
 0x327   : > { %v5816_v40 = vrot.slane %v3873_v29, 9  ;;  %v5817_v47 = vrot.slane %v3881_v37, 9  ;;  %v3839_v35 = vrot.slane %v3432_v56, %v7900_v49  ;;  %v3846_v57 = vrot.slane %v3832_v27, %v7900_v49 }
 0x328   : > { %v4382_v43 = vadd.f32 %v5751_v41, %v3831_v0  ;;  %v4444_v28 = vadd.f32 %v4380_v7, %v3864_v48  ;;  %v4445_v20 = vadd.f32 %v4381_v8, %v3863_v44  ;;  %v4699_v61 = vadd.f32 %v5812_v42, %v4443_v46 }
 0x329   : > { %v3847_v33 = vcombine.high %v3839_v35, %v3839_v35  ;;  %v3848_v45 = vcombine.high %v3846_v57, %v3846_v57  ;;  %v5752_v6 = vrot.slane %v3839_v35, 9  ;;  %v5754_v18 = vrot.slane %v3846_v57, 9 }
 0x32a   : > { %v4446_v32 = vadd.f32 %v4382_v43, %v3865_v31  ;;  %v4700_v15 = vadd.f32 %v5813_v11, %v4444_v28  ;;  %v4701_v60 = vadd.f32 %v5814_v38, %v4445_v20  ;;  %v4763_v50 = vmul.f32 0.25, %v4699_v61 }
 0x32b   : > { %v5818_v52 = vrot.slane %v3880_v10, 9  ;;  %v5753_v59 = vrot.slane %v3847_v33, 9  ;;  %v5755_v30 = vrot.slane %v3848_v45, 9  ;;  %v4383_v25 = vadd.f32 %v5752_v6, %v3839_v35 }
 0x32c   : > { %v4702_v58 = vadd.f32 %v5815_v22, %v4446_v32  ;;  %v4764_v4 = vmul.f32 0.25, %v4700_v15  ;;  %v4765_v17 = vmul.f32 0.25, %v4701_v60  ;;  %v4385_v54 = vadd.f32 %v5754_v18, %v3846_v57 }
 0x32d   : > { %v5976_v23 = vpack.c.bf16 %v4763_v50, %v4763_v50  ;;  %v4384_v5 = vadd.f32 %v5753_v59, %v3847_v33  ;;  %v4386_v9 = vadd.f32 %v5755_v30, %v3848_v45  ;;  %v4447_v36 = vadd.f32 %v4383_v25, %v3873_v29 }
 0x32e   : > { %v4766_v24 = vmul.f32 0.25, %v4702_v58  ;;  %v5977_v39 = vpack.c.bf16 %v4764_v4, %v4764_v4  ;;  %v5978_v63 = vpack.c.bf16 %v4765_v17, %v4765_v17  ;;  %v4449_v1 = vadd.f32 %v4385_v54, %v3880_v10 }
 0x32f   : > { %v5819_v16 = vrot.slane %v3882_v26, 9  ;;  %v4448_v21 = vadd.f32 %v4384_v5, %v3881_v37  ;;  %v4450_v44 = vadd.f32 %v4386_v9, %v3882_v26  ;;  %v4703_v48 = vadd.f32 %v5816_v40, %v4447_v36 }
 0x330   : > { %v5979_v3 = vpack.c.bf16 %v4766_v24, %v4766_v24  ;;  %v5084_v62 = vunpack.c.l.b16 %v5977_v39  ;;  %v5085_v51 = vunpack.c.l.b16 %v5978_v63  ;;  %v4705_v53 = vadd.f32 %v5818_v52, %v4449_v1 }
 0x331   : > { %v5083_v14 = vunpack.c.l.b16 %v5976_v23  ;;  %v4704_v56 = vadd.f32 %v5817_v47, %v4448_v21  ;;  %v4706_v0 = vadd.f32 %v5819_v16, %v4450_v44  ;;  %v4767_v55 = vmul.f32 0.25, %v4703_v48 }
 0x332   : > { %v5086_v34 = vunpack.c.l.b16 %v5979_v3  ;;  %v5184_v2 = vrot.slane %v5084_v62, 7  ;;  %v5186_v31 = vrot.slane %v5085_v51, 6  ;;  %v4769_v13 = vmul.f32 0.25, %v4705_v53 }
 0x333   : > { %v4768_v11 = vmul.f32 0.25, %v4704_v56  ;;  %v4770_v41 = vmul.f32 0.25, %v4706_v0  ;;  %v5980_v37 = vpack.c.bf16 %v4767_v55, %v4767_v55 }
 0x334   : > { %v5185_v19 = vsel %vm5108_vm2, %v5184_v2, %v5083_v14  ;;  %v5188_v29 = vrot.slane %v5086_v34, 5  ;;  %v6102_v10 = vpop.f32.mrb[24].mxu1  ;;  %v5982_v8 = vpack.c.bf16 %v4769_v13, %v4769_v13 }
 0x335   : > { %v5187_v42 = vsel %vm5111_vm4, %v5186_v31, %v5185_v19  ;;  %v3380_v7 = vpop.f32.mrb[25].mxu1  ;;  %v3389_v38 = vadd.f32 %v8010_v12, %v6102_v10  ;;  %v5981_v27 = vpack.c.bf16 %v4768_v11, %v4768_v11  ;;  %v5983_v43 = vpack.c.bf16 %v4770_v41, %v4770_v41 }
 0x336   : > { %v5189_v46 = vsel %vm5114_vm5, %v5188_v29, %v5187_v42  ;;  %v3381_v22 = vadd.f32 %v8010_v12, %v3380_v7  ;;  %v6103_v26 = vpop.f32.mrb[26].mxu1  ;;  %v5087_v28 = vunpack.c.l.b16 %v5980_v37  ;;  %v5089_v40 = vunpack.c.l.b16 %v5982_v8 }
 0x337   : > { %v3392_v20 = vadd.f32 %v8010_v12, %v6103_v26  ;;  %v3383_v61 = vpop.f32.mrb[27].mxu1  ;;  %v3437_v47 = vmax.f32 %v3389_v38, 0.0  ;;  %v5088_v32 = vunpack.c.l.b16 %v5981_v27  ;;  %v5090_v15 = vunpack.c.l.b16 %v5983_v43 }
 0x338   : > { %v3435_v35 = vmax.f32 %v3381_v22, 0.0  ;;  %v3384_v57 = vadd.f32 %v8010_v12, %v3383_v61  ;;  %v5190_v60 = vrot.slane %v5087_v28, 4  ;;  %v5194_v33 = vrot.slane %v5089_v40, 2 }
 0x339   : > { %v3438_v50 = vmax.f32 %v3392_v20, 0.0  ;;  %v3917_v45 = vcombine.high %v3437_v47, %v3437_v47  ;;  %v3924_v6 = vrot.slane %v3437_v47, %v7900_v49  ;;  %v5192_v4 = vrot.slane %v5088_v32, 3 }
 0x33a   : > { %v3883_v18 = vcombine.high %v3435_v35, %v3435_v35  ;;  %v5191_v58 = vsel %vm5117_vm9, %v5190_v60, %v5189_v46  ;;  %v5196_v17 = vrot.slane %v5090_v15, 1  ;;  %v3890_v52 = vrot.slane %v3435_v35, %v7900_v49 }
 0x33b   : > { %v3931_v59 = vrot.slane %v3917_v45, %v7900_v49  ;;  %v3932_v30 = vcombine.high %v3924_v6, %v3924_v6  ;;  %v5820_v25 = vrot.slane %v3924_v6, 9  ;;  %v5193_v24 = vsel %vm5120_vm10, %v5192_v4, %v5191_v58 }
 0x33c   : > { %v3897_v54 = vrot.slane %v3883_v18, %v7900_v49  ;;  %v3898_v23 = vcombine.high %v3890_v52, %v3890_v52  ;;  %v5756_v39 = vrot.slane %v3890_v52, 9  ;;  %v3934_v63 = vcombine.high %v3438_v50, %v3438_v50 }
 0x33d   : > { %v5195_v5 = vsel %vm5123_vm11, %v5194_v33, %v5193_v24  ;;  %v3933_v9 = vcombine.high %v3931_v59, %v3931_v59  ;;  %v5821_v36 = vrot.slane %v3932_v30, 9  ;;  %v5822_v1 = vrot.slane %v3931_v59, 9 }
 0x33e   : > { %v5197_v3 = vsel %vm5126_vm12, %v5196_v17, %v5195_v5  ;;  %v3899_v62 = vcombine.high %v3897_v54, %v3897_v54  ;;  %v5757_v51 = vrot.slane %v3898_v23, 9  ;;  %v5758_v16 = vrot.slane %v3897_v54, 9 }
 0x33f   : > { %v5231_v21 = vpack.c.b16 %v5197_v3, %v5197_v3  ;;  %v5823_v44 = vrot.slane %v3933_v9, 9  ;;  %v4387_v48 = vadd.f32 %v5756_v39, %v3890_v52  ;;  %v3941_v53 = vrot.slane %v3438_v50, %v7900_v49 }
 0x340   : > { %v5759_v14 = vrot.slane %v3899_v62, 9  ;;  %v4388_v34 = vadd.f32 %v5757_v51, %v3898_v23  ;;  %v4389_v2 = vadd.f32 %v5758_v16, %v3897_v54  ;;  %v3948_v31 = vrot.slane %v3934_v63, %v7900_v49 }
 0x341   : > { %5248 = vst.msk [vmem:[%s7927_s18 + $0x14] sm:$0xf] %vm253_vm1, %v5231_v21  ;;  %v4451_v56 = vadd.f32 %v4387_v48, %v3924_v6  ;;  %v3949_v0 = vcombine.high %v3941_v53, %v3941_v53  ;;  %v5824_v55 = vrot.slane %v3941_v53, 9  ;;  %v3436_v13 = vmax.f32 %v3384_v57, 0.0 }
 0x342   : > { %v4390_v19 = vadd.f32 %v5759_v14, %v3899_v62  ;;  %v4452_v29 = vadd.f32 %v4388_v34, %v3932_v30  ;;  %v4453_v10 = vadd.f32 %v4389_v2, %v3931_v59  ;;  %v3950_v42 = vcombine.high %v3948_v31, %v3948_v31 }
 0x343   : > { %v6106_v11 = vpop.f32.mrb[28].mxu1  ;;  %v4707_v41 = vadd.f32 %v5820_v25, %v4451_v56  ;;  %v5825_v37 = vrot.slane %v3949_v0, 9  ;;  %v5826_v7 = vrot.slane %v3948_v31, 9  ;;  %v3900_v8 = vcombine.high %v3436_v13, %v3436_v13 }
 0x344   : > { %v3396_v46 = vpop.f32.mrb[29].mxu1  ;;  %v4454_v38 = vadd.f32 %v4390_v19, %v3933_v9  ;;  %v4708_v22 = vadd.f32 %v5821_v36, %v4452_v29  ;;  %v4709_v26 = vadd.f32 %v5822_v1, %v4453_v10  ;;  %v5827_v27 = vrot.slane %v3950_v42, 9 }
 0x345   : > { %v6107_v43 = vpop.f32.mrb[30].mxu1  ;;  %v4771_v28 = vmul.f32 0.25, %v4707_v41  ;;  %v3907_v20 = vrot.slane %v3436_v13, %v7900_v49  ;;  %v3914_v61 = vrot.slane %v3900_v8, %v7900_v49  ;;  %v3405_v40 = vadd.f32 %v8010_v12, %v6106_v11 }
 0x346   : > { %v3399_v47 = vpop.f32.mrb[31].mxu1  ;;  %v4710_v35 = vadd.f32 %v5823_v44, %v4454_v38  ;;  %v4772_v57 = vmul.f32 0.25, %v4708_v22  ;;  %v4773_v32 = vmul.f32 0.25, %v4709_v26  ;;  %v3397_v15 = vadd.f32 %v8010_v12, %v3396_v46 }
 0x347   : > { %v5984_v60 = vpack.c.bf16 %v4771_v28, %v4771_v28  ;;  %v3915_v50 = vcombine.high %v3907_v20, %v3907_v20  ;;  %v3916_v33 = vcombine.high %v3914_v61, %v3914_v61  ;;  %v5760_v45 = vrot.slane %v3907_v20, 9 }
 0x348   : > { %v4774_v6 = vmul.f32 0.25, %v4710_v35  ;;  %v5985_v18 = vpack.c.bf16 %v4772_v57, %v4772_v57  ;;  %v5986_v58 = vpack.c.bf16 %v4773_v32, %v4773_v32  ;;  %v5762_v4 = vrot.slane %v3914_v61, 9 }
 0x349   : > { %v5091_v17 = vunpack.c.l.b16 %v5984_v60  ;;  %v5761_v52 = vrot.slane %v3915_v50, 9  ;;  %v5763_v59 = vrot.slane %v3916_v33, 9  ;;  %v4391_v30 = vadd.f32 %v5760_v45, %v3907_v20 }
 0x34a   : > { %v5987_v25 = vpack.c.bf16 %v4774_v6, %v4774_v6  ;;  %v5092_v54 = vunpack.c.l.b16 %v5985_v18  ;;  %v5093_v24 = vunpack.c.l.b16 %v5986_v58  ;;  %v4393_v23 = vadd.f32 %v5762_v4, %v3914_v61 }
 0x34b   : > { %v4392_v39 = vadd.f32 %v5761_v52, %v3915_v50  ;;  %v4394_v63 = vadd.f32 %v5763_v59, %v3916_v33  ;;  %v4455_v5 = vadd.f32 %v4391_v30, %v3941_v53  ;;  %v3441_v9 = vmax.f32 %v3405_v40, 0.0 }
 0x34c   : > { %v5094_v36 = vunpack.c.l.b16 %v5987_v25  ;;  %v5198_v1 = vrot.slane %v5092_v54, 7  ;;  %v5200_v3 = vrot.slane %v5093_v24, 6  ;;  %v4457_v62 = vadd.f32 %v4393_v23, %v3948_v31 }
 0x34d   : > { %v4456_v51 = vadd.f32 %v4392_v39, %v3949_v0  ;;  %v4458_v16 = vadd.f32 %v4394_v63, %v3950_v42  ;;  %v4711_v21 = vadd.f32 %v5824_v55, %v4455_v5  ;;  %v3985_v44 = vcombine.high %v3441_v9, %v3441_v9 }
 0x34e   : > { %v5199_v48 = vsel %vm5108_vm2, %v5198_v1, %v5091_v17  ;;  %v5202_v14 = vrot.slane %v5094_v36, 5  ;;  %v4713_v34 = vadd.f32 %v5826_v7, %v4457_v62  ;;  %v3992_v2 = vrot.slane %v3441_v9, %v7900_v49 }
 0x34f   : > { %v5201_v56 = vsel %vm5111_vm4, %v5200_v3, %v5199_v48  ;;  %v4712_v13 = vadd.f32 %v5825_v37, %v4456_v51  ;;  %v4714_v19 = vadd.f32 %v5827_v27, %v4458_v16  ;;  %v4775_v53 = vmul.f32 0.25, %v4711_v21 }
 0x350   : > { %v4777_v29 = vmul.f32 0.25, %v4713_v34  ;;  %v5203_v10 = vsel %vm5114_vm5, %v5202_v14, %v5201_v56  ;;  %v3999_v55 = vrot.slane %v3985_v44, %v7900_v49  ;;  %v4000_v41 = vcombine.high %v3992_v2, %v3992_v2 }
 0x351   : > { %v4776_v11 = vmul.f32 0.25, %v4712_v13  ;;  %v4778_v31 = vmul.f32 0.25, %v4714_v19  ;;  %v5988_v0 = vpack.c.bf16 %v4775_v53, %v4775_v53  ;;  %v3439_v38 = vmax.f32 %v3397_v15, 0.0 }
 0x352   : > { %v5990_v42 = vpack.c.bf16 %v4777_v29, %v4777_v29  ;;  %v5828_v26 = vrot.slane %v3992_v2, 9  ;;  %v3408_v37 = vadd.f32 %v8010_v12, %v6107_v43  ;;  %v3400_v27 = vadd.f32 %v8010_v12, %v3399_v47 }
 0x353   : > { %v5989_v8 = vpack.c.bf16 %v4776_v11, %v4776_v11  ;;  %v5991_v46 = vpack.c.bf16 %v4778_v31, %v4778_v31  ;;  %v5095_v7 = vunpack.c.l.b16 %v5988_v0  ;;  %v3951_v40 = vcombine.high %v3439_v38, %v3439_v38 }
 0x354   : > { %v5097_v22 = vunpack.c.l.b16 %v5990_v42  ;;  %v4001_v57 = vcombine.high %v3999_v55, %v3999_v55  ;;  %v3958_v32 = vrot.slane %v3439_v38, %v7900_v49  ;;  %v3442_v60 = vmax.f32 %v3408_v37, 0.0 }
 0x355   : > { %v5096_v28 = vunpack.c.l.b16 %v5989_v8  ;;  %v5098_v20 = vunpack.c.l.b16 %v5991_v46  ;;  %v5204_v61 = vrot.slane %v5095_v7, 4  ;;  %v3965_v15 = vrot.slane %v3951_v40, %v7900_v49 }
 0x356   : > { %v5208_v35 = vrot.slane %v5097_v22, 2  ;;  %v3440_v45 = vmax.f32 %v3400_v27, 0.0  ;;  %v3966_v6 = vcombine.high %v3958_v32, %v3958_v32  ;;  %v5764_v18 = vrot.slane %v3958_v32, 9 }
 0x357   : > { %v5205_v50 = vsel %vm5117_vm9, %v5204_v61, %v5203_v10  ;;  %v5206_v33 = vrot.slane %v5096_v28, 3  ;;  %v4002_v43 = vcombine.high %v3442_v60, %v3442_v60  ;;  %v8063_v12 = vrot.slane %v3442_v60, %v7900_v49 }
 0x358   : > { %v5210_v58 = vrot.slane %v5098_v20, 1  ;;  %v3967_v4 = vcombine.high %v3965_v15, %v3965_v15  ;;  %v5766_v17 = vrot.slane %v3965_v15, 9  ;;  %v5765_v59 = vrot.slane %v3966_v6, 9 }
 0x359   : > { %v5207_v47 = vsel %vm5120_vm10, %v5206_v33, %v5205_v50  ;;  %v4395_v30 = vadd.f32 %v5764_v18, %v3958_v32  ;;  %v4016_v25 = vrot.slane %v4002_v43, %v7900_v49  ;;  %v3968_v39 = vcombine.high %v3440_v45, %v3440_v45 }
 0x35a   : > { %v5209_v52 = vsel %vm5123_vm11, %v5208_v35, %v5207_v47  ;;  %v5767_v24 = vrot.slane %v3967_v4, 9  ;;  %v4397_v23 = vadd.f32 %v5766_v17, %v3965_v15  ;;  %v4396_v5 = vadd.f32 %v5765_v59, %v3966_v6 }
 0x35b   : > { %v5211_v54 = vsel %vm5126_vm12, %v5210_v58, %v5209_v52  ;;  %v4459_v9 = vadd.f32 %v4395_v30, %v3992_v2  ;;  %v4017_v36 = vcombine.high %v8063_v12, %v8063_v12  ;;  %v5829_v1 = vrot.slane %v4000_v41, 9 }
 0x35c   : > { %v5232_v63 = vpack.c.b16 %v5211_v54, %v5211_v54  ;;  %v5830_v3 = vrot.slane %v3999_v55, 9  ;;  %v4398_v62 = vadd.f32 %v5767_v24, %v3967_v4  ;;  %v4461_v51 = vadd.f32 %v4397_v23, %v3999_v55 }
 0x35d   : > { %v5831_v16 = vrot.slane %v4001_v57, 9  ;;  %v4460_v21 = vadd.f32 %v4396_v5, %v4000_v41  ;;  %v4715_v44 = vadd.f32 %v5828_v26, %v4459_v9  ;;  %v4018_v48 = vcombine.high %v4016_v25, %v4016_v25 }
 0x35e   : > { %5249 = vst.msk [vmem:[%s7927_s18 + $0x18] sm:$0xf] %vm253_vm1, %v5232_v63  ;;  %v4462_v14 = vadd.f32 %v4398_v62, %v4001_v57  ;;  %v4717_v34 = vadd.f32 %v5830_v3, %v4461_v51  ;;  %v3975_v56 = vrot.slane %v3440_v45, %v7900_v49  ;;  %v3982_v13 = vrot.slane %v3968_v39, %v7900_v49 }
 0x35f   : > { %v4716_v2 = vadd.f32 %v5829_v1, %v4460_v21  ;;  %v4779_v19 = vmul.f32 0.25, %v4715_v44  ;;  %v5832_v53 = vrot.slane %v8063_v12, 9  ;;  %v5833_v29 = vrot.slane %v4017_v36, 9 }
 0x360   : > { %v4718_v10 = vadd.f32 %v5831_v16, %v4462_v14  ;;  %v4781_v11 = vmul.f32 0.25, %v4717_v34  ;;  %v3983_v31 = vcombine.high %v3975_v56, %v3975_v56  ;;  %v3984_v0 = vcombine.high %v3982_v13, %v3982_v13 }
 0x361   : > { %v4780_v42 = vmul.f32 0.25, %v4716_v2  ;;  %v5834_v55 = vrot.slane %v4016_v25, 9  ;;  %v5768_v41 = vrot.slane %v3975_v56, 9  ;;  %v5770_v8 = vrot.slane %v3982_v13, 9 }
 0x362   : > { %v4782_v46 = vmul.f32 0.25, %v4718_v10  ;;  %v5994_v7 = vpack.c.bf16 %v4781_v11, %v4781_v11  ;;  %v5769_v38 = vrot.slane %v3983_v31, 9  ;;  %v5771_v22 = vrot.slane %v3984_v0, 9 }
 0x363   : > { %v5992_v26 = vpack.c.bf16 %v4779_v19, %v4779_v19  ;;  %v5993_v37 = vpack.c.bf16 %v4780_v42, %v4780_v42  ;;  %v4399_v49 = vadd.f32 %v5768_v41, %v3975_v56  ;;  %v4401_v27 = vadd.f32 %v5770_v8, %v3982_v13 }
 0x364   : > { %v5995_v28 = vpack.c.bf16 %v4782_v46, %v4782_v46  ;;  %v5101_v20 = vunpack.c.l.b16 %v5994_v7  ;;  %v4400_v61 = vadd.f32 %v5769_v38, %v3983_v31  ;;  %v4402_v40 = vadd.f32 %v5771_v22, %v3984_v0 }
 0x365   : > { %v5100_v35 = vunpack.c.l.b16 %v5993_v37  ;;  %v5835_v57 = vrot.slane %v4018_v48, 9  ;;  %v4463_v32 = vadd.f32 %v4399_v49, %v8063_v12  ;;  %v4465_v60 = vadd.f32 %v4401_v27, %v4016_v25 }
 0x366   : > { %v5102_v50 = vunpack.c.l.b16 %v5995_v28  ;;  %v5214_v33 = vrot.slane %v5101_v20, 6  ;;  %v4464_v15 = vadd.f32 %v4400_v61, %v4017_v36  ;;  %v4466_v45 = vadd.f32 %v4402_v40, %v4018_v48 }
 0x367   : > { %v5099_v6 = vunpack.c.l.b16 %v5992_v26  ;;  %v5212_v18 = vrot.slane %v5100_v35, 7  ;;  %v4719_v43 = vadd.f32 %v5832_v53, %v4463_v32  ;;  %v4721_v47 = vadd.f32 %v5834_v55, %v4465_v60 }
 0x368   : > { %v5216_v58 = vrot.slane %v5102_v50, 5  ;;  %v4720_v4 = vadd.f32 %v5833_v29, %v4464_v15  ;;  %v4722_v17 = vadd.f32 %v5835_v57, %v4466_v45 }
 0x369   : > { %v5213_v52 = vsel %vm5108_vm2, %v5212_v18, %v5099_v6  ;;  %v4783_v59 = vmul.f32 0.25, %v4719_v43  ;;  %v4785_v30 = vmul.f32 0.25, %v4721_v47 }
 0x36a   : > { %v5215_v54 = vsel %vm5111_vm4, %v5214_v33, %v5213_v52  ;;  %v4784_v24 = vmul.f32 0.25, %v4720_v4  ;;  %v4786_v12 = vmul.f32 0.25, %v4722_v17 }
 0x36b   : > { %v5996_v25 = vpack.c.bf16 %v4783_v59, %v4783_v59  ;;  %v5998_v23 = vpack.c.bf16 %v4785_v30, %v4785_v30  ;;  %v5217_v39 = vsel %vm5114_vm5, %v5216_v58, %v5215_v54 }
 0x36c   : > { %v5997_v63 = vpack.c.bf16 %v4784_v24, %v4784_v24  ;;  %v5999_v5 = vpack.c.bf16 %v4786_v12, %v4786_v12 }
 0x36d   : > { %v5103_v9 = vunpack.c.l.b16 %v5996_v25  ;;  %v5105_v36 = vunpack.c.l.b16 %v5998_v23 }
 0x36e   : > { %v5104_v1 = vunpack.c.l.b16 %v5997_v63  ;;  %v5106_v3 = vunpack.c.l.b16 %v5999_v5 }
 0x36f   : > { %v5218_v62 = vrot.slane %v5103_v9, 4  ;;  %v5222_v21 = vrot.slane %v5105_v36, 2 }
 0x370   : > { %v5220_v51 = vrot.slane %v5104_v1, 3  ;;  %v5224_v48 = vrot.slane %v5106_v3, 1 }
 0x371   : > { %v5219_v16 = vsel %vm5117_vm9, %v5218_v62, %v5217_v39 }
 0x372   : > { %v5221_v44 = vsel %vm5120_vm10, %v5220_v51, %v5219_v16 }
 0x373   : > { %v5223_v14 = vsel %vm5123_vm11, %v5222_v21, %v5221_v44 }
 0x374   : > { %v5225_v34 = vsel %vm5126_vm12, %v5224_v48, %v5223_v14 }
 0x375   : > { %v5233_v56 = vpack.c.b16 %v5225_v34, %v5225_v34 }
 0x377   : > { %5250 = vst.msk [vmem:[%s7927_s18 + $0x1c] sm:$0xf] %vm253_vm1, %v5233_v56 }
 0x378 PF: > { %s15_s20 = sadd.s32 1, %s6333_s20   ;;  %s8143_s18 = smov %s6329_s19 }
 0x379   : > { %p12_p5 = scmp.ge.s32.totalorder %s15_s20, 4   ;;  %s8144_s19 = smov %s8146_s21 }
 0x37b   :  { %14 = sbr.rel (!%p12_p5) target bundleno = 2 (0x2), region = 78 }

</bundles_post_ra>
